<compile_context>
chip_gen: v7x
topology: tpu7x:2x2x1
jax: 0.10.0
libtpu: 0.0.40
codegen_flags: <defaults>
</compile_context>

<pallas_src>
import math
import jax
import jax.numpy as jnp
from jax import lax
from jax.experimental import pallas as pl
from jax.experimental.pallas import tpu as pltpu

# ----- small, module-consistent shapes -----
B, S = 2, 8            # batch, sequence length
BS = B * S
H = 128                # hidden size          (768 in the original)
NH = 4                 # attention heads      (12 in the original)
HD = H // NH           # head dim
I = 256                # intermediate size    (3072 in the original)
VOCAB = 128            # vocab size           (30522 in the original)
MAX_POS = 64           # max position embeddings
TYPE_VOCAB = 2
N_LAYERS = 3           # num hidden layers    (12 in the original; all layers
                       # share ONE weight set, exactly like the PyTorch spec)
LN_EPS = 1e-12
ATT_SCALE = 1.0 / math.sqrt(HD)

# rows of the packed [16, H] parameter slab
ROW_EMB_G, ROW_EMB_B = 0, 1
ROW_BQ, ROW_BK, ROW_BV = 2, 3, 4
ROW_BO = 5
ROW_G1, ROW_B1 = 6, 7
ROW_BO2 = 8
ROW_G2, ROW_B2 = 9, 10
SLAB_ROWS = 16


def _layernorm(x, gamma, beta):
    # one-pass variance: E[x^2] - mu^2 (two independent lane reductions)
    mu = jnp.mean(x, axis=-1, keepdims=True)
    ms = jnp.mean(x * x, axis=-1, keepdims=True)
    var = jnp.maximum(ms - mu * mu, 0.0)
    return (x - mu) * lax.rsqrt(var + LN_EPS) * gamma + beta


def _gelu_exact(x):
    # matches torch.nn.functional.gelu (erf form)
    return 0.5 * x * (1.0 + lax.erf(x * (1.0 / math.sqrt(2.0))))


# ------------------------- fused Pallas kernel -------------------------

def bert_fused_kernel(emb_ref, mask_ref, slab_ref, bi_ref,
                      wqkv_ref, wo_ref, wi_ref, wo2_ref,
                      out_ref, ctx_ref):
    mask = mask_ref[...]                      # [BS, BS] additive mask
    slab = slab_ref[...]                      # [16, H] packed small params
    bi = bi_ref[...]                          # [1, I]

    def row(i):
        return slab[i:i + 1, :]               # [1, H]

    # embedding LayerNorm (dropout p=0.1 is identity at inference)
    hidden = _layernorm(emb_ref[...], row(ROW_EMB_G), row(ROW_EMB_B))  # [BS, H] f32

    def layer(_, x):
        xb = x.astype(jnp.bfloat16)            # bf16 at MXU inputs, f32 accumulation

        # --- fused QKV projection: one [BS,H] x [H,3H] dot ---
        qkv = jnp.dot(xb, wqkv_ref[...], preferred_element_type=jnp.float32)  # [BS, 3H]
        # 1/sqrt(HD) is pre-folded into wq/bq on the host.
        q = (qkv[:, 0 * H:1 * H] + row(ROW_BQ)).astype(jnp.bfloat16)
        k = (qkv[:, 1 * H:2 * H] + row(ROW_BK)).astype(jnp.bfloat16)
        v = (qkv[:, 2 * H:3 * H] + row(ROW_BV)).astype(jnp.bfloat16)

        # --- per-head attention on static 32-lane slices; context written
        #     straight into its lane slice of the VMEM scratch ---
        for h in range(NH):                    # static unroll over heads
            sl = slice(h * HD, (h + 1) * HD)
            s = lax.dot_general(q[:, sl], k[:, sl],
                                dimension_numbers=(((1,), (1,)), ((), ())),
                                preferred_element_type=jnp.float32)      # [BS, BS]
            s = s + mask
            s = s - jnp.max(s, axis=-1, keepdims=True)
            e = jnp.exp(s)
            p = e * pl.reciprocal(jnp.sum(e, axis=-1, keepdims=True), approx=True)
            ctx_ref[:, sl] = jnp.dot(p.astype(jnp.bfloat16), v[:, sl],
                                     preferred_element_type=jnp.float32)  # [BS, HD]

        # --- single full-width output projection (+ bias) ---
        attn = jnp.dot(ctx_ref[...].astype(jnp.bfloat16), wo_ref[...],
                       preferred_element_type=jnp.float32) + row(ROW_BO)

        # --- attention output residual + LayerNorm ---
        h1 = _layernorm(attn + x, row(ROW_G1), row(ROW_B1))

        # --- feed-forward: GELU MLP + residual + LayerNorm ---
        inter = _gelu_exact(
            jnp.dot(h1.astype(jnp.bfloat16), wi_ref[...],
                    preferred_element_type=jnp.float32) + bi)
        ff = jnp.dot(inter.astype(jnp.bfloat16), wo2_ref[...],
                     preferred_element_type=jnp.float32) + row(ROW_BO2)
        return _layernorm(ff + h1, row(ROW_G2), row(ROW_B2))

    # encoder: same (VMEM-resident) weights applied N_LAYERS times, exactly as
    # in the PyTorch module (ModuleList of the SAME BertLayer instance).
    out_ref[...] = lax.fori_loop(0, N_LAYERS, layer, hidden, unroll=True)


# ------------------------- wrappers -------------------------

def bert_model_forward(input_ids, token_type_ids, attention_mask,
                       word_emb, pos_emb, type_emb, packed_params):
    slab, bi, wqkv, wo, wi, wo2 = packed_params

    # embeddings (gathers are glue in plain JAX)
    pos_ids = jnp.arange(S, dtype=jnp.int32)
    emb = word_emb[input_ids] + pos_emb[pos_ids][None, :, :] + type_emb[token_type_ids]
    emb_flat = emb.reshape(BS, H).astype(jnp.float32)

    # additive mask [BS, BS]: BERT padding mask per key token within a batch
    # item, and -1e9 (exact zero after exp) between different batch items so
    # folding batch into the sublane dim preserves per-batch attention.
    key_mask = ((1.0 - attention_mask.astype(jnp.float32)) * -10000.0).reshape(BS)
    batch_ids = jnp.repeat(jnp.arange(B, dtype=jnp.int32), S)
    same_batch = batch_ids[:, None] == batch_ids[None, :]
    mask2d = jnp.where(same_batch, key_mask[None, :], jnp.float32(-1e9))

    out_flat = pl.pallas_call(
        bert_fused_kernel,
        out_shape=jax.ShapeDtypeStruct((BS, H), jnp.float32),
        scratch_shapes=[pltpu.VMEM((BS, H), jnp.float32)],   # per-layer ctx assembly
    )(emb_flat, mask2d, slab, bi, wqkv, wo, wi, wo2)
    return out_flat.reshape(B, S, H)


bert_model_forward_jit = jax.jit(bert_model_forward)


def pack_params(emb_g, emb_b, wq, bq, wk, bk, wv, bv, wo, bo,
                g1, b1, wi, bi, wo2, bo2, g2, b2):
    """Host-side one-time packing: fold attention scale, fuse QKV, pack the
    small [1, H] vectors into one slab, store matmul weights in bf16."""
    wq_s = wq * ATT_SCALE
    bq_s = bq * ATT_SCALE
    wqkv = jnp.concatenate([wq_s, wk, wv], axis=1).astype(jnp.bfloat16)   # [H, 3H]

    slab = jnp.zeros((SLAB_ROWS, H), jnp.float32)
    rows = {ROW_EMB_G: emb_g, ROW_EMB_B: emb_b,
            ROW_BQ: bq_s, ROW_BK: bk, ROW_BV: bv, ROW_BO: bo,
            ROW_G1: g1, ROW_B1: b1, ROW_BO2: bo2,
            ROW_G2: g2, ROW_B2: b2}
    for r, vec in rows.items():
        slab = slab.at[r, :].set(vec.reshape(H))

    return (slab,
            bi.reshape(1, I).astype(jnp.float32),
            wqkv,
            wo.astype(jnp.bfloat16),
            wi.astype(jnp.bfloat16),
            wo2.astype(jnp.bfloat16))


# ------------------------- main -------------------------

if __name__ == "__main__":
    key = jax.random.PRNGKey(0)
    keys = jax.random.split(key, 16)

    def init(k, shape):
        return (0.02 * jax.random.normal(k, shape)).astype(jnp.float32)

    word_emb = init(keys[0], (VOCAB, H))
    pos_emb = init(keys[1], (MAX_POS, H))
    type_emb = init(keys[2], (TYPE_VOCAB, H))
    emb_g = jnp.ones((1, H), jnp.float32)
    emb_b = jnp.zeros((1, H), jnp.float32)

    # linear weights in [in, out] layout (transposed vs. PyTorch nn.Linear)
    wq = init(keys[3], (H, H)); bq = init(keys[4], (1, H))
    wk = init(keys[5], (H, H)); bk = init(keys[6], (1, H))
    wv = init(keys[7], (H, H)); bv = init(keys[8], (1, H))
    wo = init(keys[9], (H, H)); bo = init(keys[10], (1, H))
    g1 = jnp.ones((1, H), jnp.float32); b1 = jnp.zeros((1, H), jnp.float32)
    wi = init(keys[11], (H, I)); bi = init(keys[12], (1, I))
    wo2 = init(keys[13], (I, H)); bo2 = init(keys[14], (1, H))
    g2 = jnp.ones((1, H), jnp.float32); b2 = jnp.zeros((1, H), jnp.float32)

    packed_params = pack_params(emb_g, emb_b, wq, bq, wk, bk, wv, bv, wo, bo,
                                g1, b1, wi, bi, wo2, bo2, g2, b2)

    input_ids = jnp.array([[5, 17, 99, 3, 42, 7, 120, 1],
                           [2, 64, 31, 88, 9, 55, 11, 0]], dtype=jnp.int32)
    token_type_ids = jnp.zeros((B, S), dtype=jnp.int32)
    attention_mask = jnp.ones((B, S), dtype=jnp.float32)

    out = bert_model_forward_jit(input_ids, token_type_ids, attention_mask,
                                 word_emb, pos_emb, type_emb, packed_params)
    out = jax.block_until_ready(out)
    assert out.shape == (B, S, H) and out.dtype == jnp.float32
    assert bool(jnp.all(jnp.isfinite(out)))
    print("KERNEL_OK")
</pallas_src>

<mosaic_0001>
module attributes {stable_mosaic.version = 11 : i64} {
  func.func @bert_fused_kernel(%arg0: memref<16x128xf32, #tpu.memory_space<vmem>>, %arg1: memref<16x16xf32, #tpu.memory_space<vmem>>, %arg2: memref<16x128xf32, #tpu.memory_space<vmem>>, %arg3: memref<1x256xf32, #tpu.memory_space<vmem>>, %arg4: memref<128x384xbf16, #tpu.memory_space<vmem>>, %arg5: memref<128x128xbf16, #tpu.memory_space<vmem>>, %arg6: memref<128x256xbf16, #tpu.memory_space<vmem>>, %arg7: memref<256x128xbf16, #tpu.memory_space<vmem>>, %arg8: memref<16x128xf32, #tpu.memory_space<vmem>>, %arg9: memref<16x128xf32, #tpu.memory_space<vmem>>) attributes {dimension_semantics = [], scalar_prefetch = 0 : i64, scratch_operands = 1 : i64, tpu.core_type = #tpu.core_type<tc>} {
    %c0 = arith.constant 0 : index
    %c0_0 = arith.constant 0 : index
    %0 = vector.load %arg1[%c0, %c0_0] : memref<16x16xf32, #tpu.memory_space<vmem>>, vector<16x16xf32>
    %c0_1 = arith.constant 0 : index
    %c0_2 = arith.constant 0 : index
    %1 = vector.load %arg2[%c0_1, %c0_2] : memref<16x128xf32, #tpu.memory_space<vmem>>, vector<16x128xf32>
    %c0_3 = arith.constant 0 : index
    %c0_4 = arith.constant 0 : index
    %2 = vector.load %arg3[%c0_3, %c0_4] : memref<1x256xf32, #tpu.memory_space<vmem>>, vector<1x256xf32>
    %c0_5 = arith.constant 0 : index
    %c0_6 = arith.constant 0 : index
    %3 = vector.load %arg0[%c0_5, %c0_6] : memref<16x128xf32, #tpu.memory_space<vmem>>, vector<16x128xf32>
    %4 = vector.extract_strided_slice %1 {offsets = [0, 0], sizes = [1, 128], strides = [1, 1]} : vector<16x128xf32> to vector<1x128xf32>
    %5 = vector.extract_strided_slice %1 {offsets = [1, 0], sizes = [1, 128], strides = [1, 1]} : vector<16x128xf32> to vector<1x128xf32>
    %cst = arith.constant dense<0.000000e+00> : vector<16xf32>
    %6 = vector.multi_reduction <add>, %3, %cst [1] : vector<16x128xf32> to vector<16xf32>
    %7 = vector.shape_cast %6 : vector<16xf32> to vector<16x1xf32>
    %cst_7 = arith.constant 1.280000e+02 : f32
    %8 = vector.broadcast %cst_7 : f32 to vector<16x1xf32>
    %9 = arith.divf %7, %8 : vector<16x1xf32>
    %10 = arith.mulf %3, %3 : vector<16x128xf32>
    %cst_8 = arith.constant dense<0.000000e+00> : vector<16xf32>
    %11 = vector.multi_reduction <add>, %10, %cst_8 [1] : vector<16x128xf32> to vector<16xf32>
    %12 = vector.shape_cast %11 : vector<16xf32> to vector<16x1xf32>
    %cst_9 = arith.constant 1.280000e+02 : f32
    %13 = vector.broadcast %cst_9 : f32 to vector<16x1xf32>
    %14 = arith.divf %12, %13 : vector<16x1xf32>
    %15 = arith.mulf %9, %9 : vector<16x1xf32>
    %16 = arith.subf %14, %15 : vector<16x1xf32>
    %cst_10 = arith.constant 0.000000e+00 : f32
    %17 = vector.broadcast %cst_10 : f32 to vector<16x1xf32>
    %18 = arith.maximumf %16, %17 : vector<16x1xf32>
    %19 = vector.broadcast %9 : vector<16x1xf32> to vector<16x128xf32>
    %20 = arith.subf %3, %19 : vector<16x128xf32>
    %cst_11 = arith.constant 9.99999996E-13 : f32
    %21 = vector.broadcast %cst_11 : f32 to vector<16x1xf32>
    %22 = arith.addf %18, %21 : vector<16x1xf32>
    %23 = math.rsqrt %22 : vector<16x1xf32>
    %24 = vector.broadcast %23 : vector<16x1xf32> to vector<16x128xf32>
    %25 = arith.mulf %20, %24 : vector<16x128xf32>
    %26 = vector.broadcast %4 : vector<1x128xf32> to vector<16x128xf32>
    %27 = arith.mulf %25, %26 : vector<16x128xf32>
    %28 = vector.broadcast %5 : vector<1x128xf32> to vector<16x128xf32>
    %29 = arith.addf %27, %28 : vector<16x128xf32>
    %c0_i32 = arith.constant 0 : i32
    %30 = arith.truncf %29 : vector<16x128xf32> to vector<16x128xbf16>
    %c0_12 = arith.constant 0 : index
    %c0_13 = arith.constant 0 : index
    %31 = vector.load %arg4[%c0_12, %c0_13] : memref<128x384xbf16, #tpu.memory_space<vmem>>, vector<128x384xbf16>
    %cst_14 = arith.constant dense<0.000000e+00> : vector<16x384xf32>
    %32 = tpu.matmul %30, %31, %cst_14 {dimension_numbers = #tpu.dot_dimension_numbers<[1], [0], [0], [1], [0, 0, 1, 1], [], []>} : vector<16x128xbf16>, vector<128x384xbf16>, vector<16x384xf32> -> vector<16x384xf32>
    %33 = vector.extract_strided_slice %32 {offsets = [0, 0], sizes = [16, 128], strides = [1, 1]} : vector<16x384xf32> to vector<16x128xf32>
    %34 = vector.extract_strided_slice %1 {offsets = [2, 0], sizes = [1, 128], strides = [1, 1]} : vector<16x128xf32> to vector<1x128xf32>
    %35 = vector.broadcast %34 : vector<1x128xf32> to vector<16x128xf32>
    %36 = arith.addf %33, %35 : vector<16x128xf32>
    %37 = arith.truncf %36 : vector<16x128xf32> to vector<16x128xbf16>
    %38 = vector.extract_strided_slice %32 {offsets = [0, 128], sizes = [16, 128], strides = [1, 1]} : vector<16x384xf32> to vector<16x128xf32>
    %39 = vector.extract_strided_slice %1 {offsets = [3, 0], sizes = [1, 128], strides = [1, 1]} : vector<16x128xf32> to vector<1x128xf32>
    %40 = vector.broadcast %39 : vector<1x128xf32> to vector<16x128xf32>
    %41 = arith.addf %38, %40 : vector<16x128xf32>
    %42 = arith.truncf %41 : vector<16x128xf32> to vector<16x128xbf16>
    %43 = vector.extract_strided_slice %32 {offsets = [0, 256], sizes = [16, 128], strides = [1, 1]} : vector<16x384xf32> to vector<16x128xf32>
    %44 = vector.extract_strided_slice %1 {offsets = [4, 0], sizes = [1, 128], strides = [1, 1]} : vector<16x128xf32> to vector<1x128xf32>
    %45 = vector.broadcast %44 : vector<1x128xf32> to vector<16x128xf32>
    %46 = arith.addf %43, %45 : vector<16x128xf32>
    %47 = arith.truncf %46 : vector<16x128xf32> to vector<16x128xbf16>
    %48 = vector.extract_strided_slice %37 {offsets = [0, 0], sizes = [16, 32], strides = [1, 1]} : vector<16x128xbf16> to vector<16x32xbf16>
    %49 = vector.extract_strided_slice %42 {offsets = [0, 0], sizes = [16, 32], strides = [1, 1]} : vector<16x128xbf16> to vector<16x32xbf16>
    %cst_15 = arith.constant dense<0.000000e+00> : vector<16x16xf32>
    %50 = tpu.matmul %48, %49, %cst_15 {dimension_numbers = #tpu.dot_dimension_numbers<[1], [1], [0], [0], [0, 0, 1, 0], [], []>} : vector<16x32xbf16>, vector<16x32xbf16>, vector<16x16xf32> -> vector<16x16xf32>
    %51 = arith.addf %50, %0 : vector<16x16xf32>
    %cst_16 = arith.constant dense<0xFF800000> : vector<16xf32>
    %52 = vector.multi_reduction <maximumf>, %51, %cst_16 [1] : vector<16x16xf32> to vector<16xf32>
    %53 = vector.shape_cast %52 : vector<16xf32> to vector<16x1xf32>
    %54 = vector.broadcast %53 : vector<16x1xf32> to vector<16x16xf32>
    %55 = arith.subf %51, %54 : vector<16x16xf32>
    %56 = math.exp %55 : vector<16x16xf32>
    %cst_17 = arith.constant dense<0.000000e+00> : vector<16xf32>
    %57 = vector.multi_reduction <add>, %56, %cst_17 [1] : vector<16x16xf32> to vector<16xf32>
    %58 = vector.shape_cast %57 : vector<16xf32> to vector<16x1xf32>
    %59 = tpu.reciprocal %58 {approx = true} : vector<16x1xf32> -> vector<16x1xf32>
    %60 = vector.broadcast %59 : vector<16x1xf32> to vector<16x16xf32>
    %61 = arith.mulf %56, %60 : vector<16x16xf32>
    %62 = arith.truncf %61 : vector<16x16xf32> to vector<16x16xbf16>
    %63 = vector.extract_strided_slice %47 {offsets = [0, 0], sizes = [16, 32], strides = [1, 1]} : vector<16x128xbf16> to vector<16x32xbf16>
    %cst_18 = arith.constant dense<0.000000e+00> : vector<16x32xf32>
    %64 = tpu.matmul %62, %63, %cst_18 {dimension_numbers = #tpu.dot_dimension_numbers<[1], [0], [0], [1], [0, 0, 1, 1], [], []>} : vector<16x16xbf16>, vector<16x32xbf16>, vector<16x32xf32> -> vector<16x32xf32>
    %c0_19 = arith.constant 0 : index
    %c0_20 = arith.constant 0 : index
    %65 = vector.load %arg9[%c0_19, %c0_20] : memref<16x128xf32, #tpu.memory_space<vmem>>, vector<16x32xf32>
    tpu.vector_store %arg9[%c0_19, %c0_20], %64 {strides = array<i32>} : memref<16x128xf32, #tpu.memory_space<vmem>>, vector<16x32xf32>,
    %66 = vector.extract_strided_slice %37 {offsets = [0, 32], sizes = [16, 32], strides = [1, 1]} : vector<16x128xbf16> to vector<16x32xbf16>
    %67 = vector.extract_strided_slice %42 {offsets = [0, 32], sizes = [16, 32], strides = [1, 1]} : vector<16x128xbf16> to vector<16x32xbf16>
    %cst_21 = arith.constant dense<0.000000e+00> : vector<16x16xf32>
    %68 = tpu.matmul %66, %67, %cst_21 {dimension_numbers = #tpu.dot_dimension_numbers<[1], [1], [0], [0], [0, 0, 1, 0], [], []>} : vector<16x32xbf16>, vector<16x32xbf16>, vector<16x16xf32> -> vector<16x16xf32>
    %69 = arith.addf %68, %0 : vector<16x16xf32>
    %cst_22 = arith.constant dense<0xFF800000> : vector<16xf32>
    %70 = vector.multi_reduction <maximumf>, %69, %cst_22 [1] : vector<16x16xf32> to vector<16xf32>
    %71 = vector.shape_cast %70 : vector<16xf32> to vector<16x1xf32>
    %72 = vector.broadcast %71 : vector<16x1xf32> to vector<16x16xf32>
    %73 = arith.subf %69, %72 : vector<16x16xf32>
    %74 = math.exp %73 : vector<16x16xf32>
    %cst_23 = arith.constant dense<0.000000e+00> : vector<16xf32>
    %75 = vector.multi_reduction <add>, %74, %cst_23 [1] : vector<16x16xf32> to vector<16xf32>
    %76 = vector.shape_cast %75 : vector<16xf32> to vector<16x1xf32>
    %77 = tpu.reciprocal %76 {approx = true} : vector<16x1xf32> -> vector<16x1xf32>
    %78 = vector.broadcast %77 : vector<16x1xf32> to vector<16x16xf32>
    %79 = arith.mulf %74, %78 : vector<16x16xf32>
    %80 = arith.truncf %79 : vector<16x16xf32> to vector<16x16xbf16>
    %81 = vector.extract_strided_slice %47 {offsets = [0, 32], sizes = [16, 32], strides = [1, 1]} : vector<16x128xbf16> to vector<16x32xbf16>
    %cst_24 = arith.constant dense<0.000000e+00> : vector<16x32xf32>
    %82 = tpu.matmul %80, %81, %cst_24 {dimension_numbers = #tpu.dot_dimension_numbers<[1], [0], [0], [1], [0, 0, 1, 1], [], []>} : vector<16x16xbf16>, vector<16x32xbf16>, vector<16x32xf32> -> vector<16x32xf32>
    %c0_25 = arith.constant 0 : index
    %c32 = arith.constant 32 : index
    %83 = vector.load %arg9[%c0_25, %c32] : memref<16x128xf32, #tpu.memory_space<vmem>>, vector<16x32xf32>
    tpu.vector_store %arg9[%c0_25, %c32], %82 {strides = array<i32>} : memref<16x128xf32, #tpu.memory_space<vmem>>, vector<16x32xf32>,
    %84 = vector.extract_strided_slice %37 {offsets = [0, 64], sizes = [16, 32], strides = [1, 1]} : vector<16x128xbf16> to vector<16x32xbf16>
    %85 = vector.extract_strided_slice %42 {offsets = [0, 64], sizes = [16, 32], strides = [1, 1]} : vector<16x128xbf16> to vector<16x32xbf16>
    %cst_26 = arith.constant dense<0.000000e+00> : vector<16x16xf32>
    %86 = tpu.matmul %84, %85, %cst_26 {dimension_numbers = #tpu.dot_dimension_numbers<[1], [1], [0], [0], [0, 0, 1, 0], [], []>} : vector<16x32xbf16>, vector<16x32xbf16>, vector<16x16xf32> -> vector<16x16xf32>
    %87 = arith.addf %86, %0 : vector<16x16xf32>
    %cst_27 = arith.constant dense<0xFF800000> : vector<16xf32>
    %88 = vector.multi_reduction <maximumf>, %87, %cst_27 [1] : vector<16x16xf32> to vector<16xf32>
    %89 = vector.shape_cast %88 : vector<16xf32> to vector<16x1xf32>
    %90 = vector.broadcast %89 : vector<16x1xf32> to vector<16x16xf32>
    %91 = arith.subf %87, %90 : vector<16x16xf32>
    %92 = math.exp %91 : vector<16x16xf32>
    %cst_28 = arith.constant dense<0.000000e+00> : vector<16xf32>
    %93 = vector.multi_reduction <add>, %92, %cst_28 [1] : vector<16x16xf32> to vector<16xf32>
    %94 = vector.shape_cast %93 : vector<16xf32> to vector<16x1xf32>
    %95 = tpu.reciprocal %94 {approx = true} : vector<16x1xf32> -> vector<16x1xf32>
    %96 = vector.broadcast %95 : vector<16x1xf32> to vector<16x16xf32>
    %97 = arith.mulf %92, %96 : vector<16x16xf32>
    %98 = arith.truncf %97 : vector<16x16xf32> to vector<16x16xbf16>
    %99 = vector.extract_strided_slice %47 {offsets = [0, 64], sizes = [16, 32], strides = [1, 1]} : vector<16x128xbf16> to vector<16x32xbf16>
    %cst_29 = arith.constant dense<0.000000e+00> : vector<16x32xf32>
    %100 = tpu.matmul %98, %99, %cst_29 {dimension_numbers = #tpu.dot_dimension_numbers<[1], [0], [0], [1], [0, 0, 1, 1], [], []>} : vector<16x16xbf16>, vector<16x32xbf16>, vector<16x32xf32> -> vector<16x32xf32>
    %c0_30 = arith.constant 0 : index
    %c64 = arith.constant 64 : index
    %101 = vector.load %arg9[%c0_30, %c64] : memref<16x128xf32, #tpu.memory_space<vmem>>, vector<16x32xf32>
    tpu.vector_store %arg9[%c0_30, %c64], %100 {strides = array<i32>} : memref<16x128xf32, #tpu.memory_space<vmem>>, vector<16x32xf32>,
    %102 = vector.extract_strided_slice %37 {offsets = [0, 96], sizes = [16, 32], strides = [1, 1]} : vector<16x128xbf16> to vector<16x32xbf16>
    %103 = vector.extract_strided_slice %42 {offsets = [0, 96], sizes = [16, 32], strides = [1, 1]} : vector<16x128xbf16> to vector<16x32xbf16>
    %cst_31 = arith.constant dense<0.000000e+00> : vector<16x16xf32>
    %104 = tpu.matmul %102, %103, %cst_31 {dimension_numbers = #tpu.dot_dimension_numbers<[1], [1], [0], [0], [0, 0, 1, 0], [], []>} : vector<16x32xbf16>, vector<16x32xbf16>, vector<16x16xf32> -> vector<16x16xf32>
    %105 = arith.addf %104, %0 : vector<16x16xf32>
    %cst_32 = arith.constant dense<0xFF800000> : vector<16xf32>
    %106 = vector.multi_reduction <maximumf>, %105, %cst_32 [1] : vector<16x16xf32> to vector<16xf32>
    %107 = vector.shape_cast %106 : vector<16xf32> to vector<16x1xf32>
    %108 = vector.broadcast %107 : vector<16x1xf32> to vector<16x16xf32>
    %109 = arith.subf %105, %108 : vector<16x16xf32>
    %110 = math.exp %109 : vector<16x16xf32>
    %cst_33 = arith.constant dense<0.000000e+00> : vector<16xf32>
    %111 = vector.multi_reduction <add>, %110, %cst_33 [1] : vector<16x16xf32> to vector<16xf32>
    %112 = vector.shape_cast %111 : vector<16xf32> to vector<16x1xf32>
    %113 = tpu.reciprocal %112 {approx = true} : vector<16x1xf32> -> vector<16x1xf32>
    %114 = vector.broadcast %113 : vector<16x1xf32> to vector<16x16xf32>
    %115 = arith.mulf %110, %114 : vector<16x16xf32>
    %116 = arith.truncf %115 : vector<16x16xf32> to vector<16x16xbf16>
    %117 = vector.extract_strided_slice %47 {offsets = [0, 96], sizes = [16, 32], strides = [1, 1]} : vector<16x128xbf16> to vector<16x32xbf16>
    %cst_34 = arith.constant dense<0.000000e+00> : vector<16x32xf32>
    %118 = tpu.matmul %116, %117, %cst_34 {dimension_numbers = #tpu.dot_dimension_numbers<[1], [0], [0], [1], [0, 0, 1, 1], [], []>} : vector<16x16xbf16>, vector<16x32xbf16>, vector<16x32xf32> -> vector<16x32xf32>
    %c0_35 = arith.constant 0 : index
    %c96 = arith.constant 96 : index
    %119 = vector.load %arg9[%c0_35, %c96] : memref<16x128xf32, #tpu.memory_space<vmem>>, vector<16x32xf32>
    tpu.vector_store %arg9[%c0_35, %c96], %118 {strides = array<i32>} : memref<16x128xf32, #tpu.memory_space<vmem>>, vector<16x32xf32>,
    %c0_36 = arith.constant 0 : index
    %c0_37 = arith.constant 0 : index
    %120 = vector.load %arg9[%c0_36, %c0_37] : memref<16x128xf32, #tpu.memory_space<vmem>>, vector<16x128xf32>
    %121 = arith.truncf %120 : vector<16x128xf32> to vector<16x128xbf16>
    %c0_38 = arith.constant 0 : index
    %c0_39 = arith.constant 0 : index
    %122 = vector.load %arg5[%c0_38, %c0_39] : memref<128x128xbf16, #tpu.memory_space<vmem>>, vector<128x128xbf16>
    %cst_40 = arith.constant dense<0.000000e+00> : vector<16x128xf32>
    %123 = tpu.matmul %121, %122, %cst_40 {dimension_numbers = #tpu.dot_dimension_numbers<[1], [0], [0], [1], [0, 0, 1, 1], [], []>} : vector<16x128xbf16>, vector<128x128xbf16>, vector<16x128xf32> -> vector<16x128xf32>
    %124 = vector.extract_strided_slice %1 {offsets = [5, 0], sizes = [1, 128], strides = [1, 1]} : vector<16x128xf32> to vector<1x128xf32>
    %125 = vector.broadcast %124 : vector<1x128xf32> to vector<16x128xf32>
    %126 = arith.addf %123, %125 : vector<16x128xf32>
    %127 = arith.addf %126, %29 : vector<16x128xf32>
    %128 = vector.extract_strided_slice %1 {offsets = [6, 0], sizes = [1, 128], strides = [1, 1]} : vector<16x128xf32> to vector<1x128xf32>
    %129 = vector.extract_strided_slice %1 {offsets = [7, 0], sizes = [1, 128], strides = [1, 1]} : vector<16x128xf32> to vector<1x128xf32>
    %cst_41 = arith.constant dense<0.000000e+00> : vector<16xf32>
    %130 = vector.multi_reduction <add>, %127, %cst_41 [1] : vector<16x128xf32> to vector<16xf32>
    %131 = vector.shape_cast %130 : vector<16xf32> to vector<16x1xf32>
    %cst_42 = arith.constant 1.280000e+02 : f32
    %132 = vector.broadcast %cst_42 : f32 to vector<16x1xf32>
    %133 = arith.divf %131, %132 : vector<16x1xf32>
    %134 = arith.mulf %127, %127 : vector<16x128xf32>
    %cst_43 = arith.constant dense<0.000000e+00> : vector<16xf32>
    %135 = vector.multi_reduction <add>, %134, %cst_43 [1] : vector<16x128xf32> to vector<16xf32>
    %136 = vector.shape_cast %135 : vector<16xf32> to vector<16x1xf32>
    %cst_44 = arith.constant 1.280000e+02 : f32
    %137 = vector.broadcast %cst_44 : f32 to vector<16x1xf32>
    %138 = arith.divf %136, %137 : vector<16x1xf32>
    %139 = arith.mulf %133, %133 : vector<16x1xf32>
    %140 = arith.subf %138, %139 : vector<16x1xf32>
    %cst_45 = arith.constant 0.000000e+00 : f32
    %141 = vector.broadcast %cst_45 : f32 to vector<16x1xf32>
    %142 = arith.maximumf %140, %141 : vector<16x1xf32>
    %143 = vector.broadcast %133 : vector<16x1xf32> to vector<16x128xf32>
    %144 = arith.subf %127, %143 : vector<16x128xf32>
    %cst_46 = arith.constant 9.99999996E-13 : f32
    %145 = vector.broadcast %cst_46 : f32 to vector<16x1xf32>
    %146 = arith.addf %142, %145 : vector<16x1xf32>
    %147 = math.rsqrt %146 : vector<16x1xf32>
    %148 = vector.broadcast %147 : vector<16x1xf32> to vector<16x128xf32>
    %149 = arith.mulf %144, %148 : vector<16x128xf32>
    %150 = vector.broadcast %128 : vector<1x128xf32> to vector<16x128xf32>
    %151 = arith.mulf %149, %150 : vector<16x128xf32>
    %152 = vector.broadcast %129 : vector<1x128xf32> to vector<16x128xf32>
    %153 = arith.addf %151, %152 : vector<16x128xf32>
    %154 = arith.truncf %153 : vector<16x128xf32> to vector<16x128xbf16>
    %c0_47 = arith.constant 0 : index
    %c0_48 = arith.constant 0 : index
    %155 = vector.load %arg6[%c0_47, %c0_48] : memref<128x256xbf16, #tpu.memory_space<vmem>>, vector<128x256xbf16>
    %cst_49 = arith.constant dense<0.000000e+00> : vector<16x256xf32>
    %156 = tpu.matmul %154, %155, %cst_49 {dimension_numbers = #tpu.dot_dimension_numbers<[1], [0], [0], [1], [0, 0, 1, 1], [], []>} : vector<16x128xbf16>, vector<128x256xbf16>, vector<16x256xf32> -> vector<16x256xf32>
    %157 = vector.broadcast %2 : vector<1x256xf32> to vector<16x256xf32>
    %158 = arith.addf %156, %157 : vector<16x256xf32>
    %cst_50 = arith.constant 5.000000e-01 : f32
    %159 = vector.broadcast %cst_50 : f32 to vector<16x256xf32>
    %160 = arith.mulf %159, %158 : vector<16x256xf32>
    %cst_51 = arith.constant 0.707106769 : f32
    %161 = vector.broadcast %cst_51 : f32 to vector<16x256xf32>
    %162 = arith.mulf %158, %161 : vector<16x256xf32>
    %163 = math.erf %162 : vector<16x256xf32>
    %cst_52 = arith.constant 1.000000e+00 : f32
    %164 = vector.broadcast %cst_52 : f32 to vector<16x256xf32>
    %165 = arith.addf %164, %163 : vector<16x256xf32>
    %166 = arith.mulf %160, %165 : vector<16x256xf32>
    %167 = arith.truncf %166 : vector<16x256xf32> to vector<16x256xbf16>
    %c0_53 = arith.constant 0 : index
    %c0_54 = arith.constant 0 : index
    %168 = vector.load %arg7[%c0_53, %c0_54] : memref<256x128xbf16, #tpu.memory_space<vmem>>, vector<256x128xbf16>
    %cst_55 = arith.constant dense<0.000000e+00> : vector<16x128xf32>
    %169 = tpu.matmul %167, %168, %cst_55 {dimension_numbers = #tpu.dot_dimension_numbers<[1], [0], [0], [1], [0, 0, 1, 1], [], []>} : vector<16x256xbf16>, vector<256x128xbf16>, vector<16x128xf32> -> vector<16x128xf32>
    %170 = vector.extract_strided_slice %1 {offsets = [8, 0], sizes = [1, 128], strides = [1, 1]} : vector<16x128xf32> to vector<1x128xf32>
    %171 = vector.broadcast %170 : vector<1x128xf32> to vector<16x128xf32>
    %172 = arith.addf %169, %171 : vector<16x128xf32>
    %173 = arith.addf %172, %153 : vector<16x128xf32>
    %174 = vector.extract_strided_slice %1 {offsets = [9, 0], sizes = [1, 128], strides = [1, 1]} : vector<16x128xf32> to vector<1x128xf32>
    %175 = vector.extract_strided_slice %1 {offsets = [10, 0], sizes = [1, 128], strides = [1, 1]} : vector<16x128xf32> to vector<1x128xf32>
    %cst_56 = arith.constant dense<0.000000e+00> : vector<16xf32>
    %176 = vector.multi_reduction <add>, %173, %cst_56 [1] : vector<16x128xf32> to vector<16xf32>
    %177 = vector.shape_cast %176 : vector<16xf32> to vector<16x1xf32>
    %cst_57 = arith.constant 1.280000e+02 : f32
    %178 = vector.broadcast %cst_57 : f32 to vector<16x1xf32>
    %179 = arith.divf %177, %178 : vector<16x1xf32>
    %180 = arith.mulf %173, %173 : vector<16x128xf32>
    %cst_58 = arith.constant dense<0.000000e+00> : vector<16xf32>
    %181 = vector.multi_reduction <add>, %180, %cst_58 [1] : vector<16x128xf32> to vector<16xf32>
    %182 = vector.shape_cast %181 : vector<16xf32> to vector<16x1xf32>
    %cst_59 = arith.constant 1.280000e+02 : f32
    %183 = vector.broadcast %cst_59 : f32 to vector<16x1xf32>
    %184 = arith.divf %182, %183 : vector<16x1xf32>
    %185 = arith.mulf %179, %179 : vector<16x1xf32>
    %186 = arith.subf %184, %185 : vector<16x1xf32>
    %cst_60 = arith.constant 0.000000e+00 : f32
    %187 = vector.broadcast %cst_60 : f32 to vector<16x1xf32>
    %188 = arith.maximumf %186, %187 : vector<16x1xf32>
    %189 = vector.broadcast %179 : vector<16x1xf32> to vector<16x128xf32>
    %190 = arith.subf %173, %189 : vector<16x128xf32>
    %cst_61 = arith.constant 9.99999996E-13 : f32
    %191 = vector.broadcast %cst_61 : f32 to vector<16x1xf32>
    %192 = arith.addf %188, %191 : vector<16x1xf32>
    %193 = math.rsqrt %192 : vector<16x1xf32>
    %194 = vector.broadcast %193 : vector<16x1xf32> to vector<16x128xf32>
    %195 = arith.mulf %190, %194 : vector<16x128xf32>
    %196 = vector.broadcast %174 : vector<1x128xf32> to vector<16x128xf32>
    %197 = arith.mulf %195, %196 : vector<16x128xf32>
    %198 = vector.broadcast %175 : vector<1x128xf32> to vector<16x128xf32>
    %199 = arith.addf %197, %198 : vector<16x128xf32>
    %c1_i32 = arith.constant 1 : i32
    %200 = arith.truncf %199 : vector<16x128xf32> to vector<16x128xbf16>
    %c0_62 = arith.constant 0 : index
    %c0_63 = arith.constant 0 : index
    %201 = vector.load %arg4[%c0_62, %c0_63] : memref<128x384xbf16, #tpu.memory_space<vmem>>, vector<128x384xbf16>
    %cst_64 = arith.constant dense<0.000000e+00> : vector<16x384xf32>
    %202 = tpu.matmul %200, %201, %cst_64 {dimension_numbers = #tpu.dot_dimension_numbers<[1], [0], [0], [1], [0, 0, 1, 1], [], []>} : vector<16x128xbf16>, vector<128x384xbf16>, vector<16x384xf32> -> vector<16x384xf32>
    %203 = vector.extract_strided_slice %202 {offsets = [0, 0], sizes = [16, 128], strides = [1, 1]} : vector<16x384xf32> to vector<16x128xf32>
    %204 = vector.extract_strided_slice %1 {offsets = [2, 0], sizes = [1, 128], strides = [1, 1]} : vector<16x128xf32> to vector<1x128xf32>
    %205 = vector.broadcast %204 : vector<1x128xf32> to vector<16x128xf32>
    %206 = arith.addf %203, %205 : vector<16x128xf32>
    %207 = arith.truncf %206 : vector<16x128xf32> to vector<16x128xbf16>
    %208 = vector.extract_strided_slice %202 {offsets = [0, 128], sizes = [16, 128], strides = [1, 1]} : vector<16x384xf32> to vector<16x128xf32>
    %209 = vector.extract_strided_slice %1 {offsets = [3, 0], sizes = [1, 128], strides = [1, 1]} : vector<16x128xf32> to vector<1x128xf32>
    %210 = vector.broadcast %209 : vector<1x128xf32> to vector<16x128xf32>
    %211 = arith.addf %208, %210 : vector<16x128xf32>
    %212 = arith.truncf %211 : vector<16x128xf32> to vector<16x128xbf16>
    %213 = vector.extract_strided_slice %202 {offsets = [0, 256], sizes = [16, 128], strides = [1, 1]} : vector<16x384xf32> to vector<16x128xf32>
    %214 = vector.extract_strided_slice %1 {offsets = [4, 0], sizes = [1, 128], strides = [1, 1]} : vector<16x128xf32> to vector<1x128xf32>
    %215 = vector.broadcast %214 : vector<1x128xf32> to vector<16x128xf32>
    %216 = arith.addf %213, %215 : vector<16x128xf32>
    %217 = arith.truncf %216 : vector<16x128xf32> to vector<16x128xbf16>
    %218 = vector.extract_strided_slice %207 {offsets = [0, 0], sizes = [16, 32], strides = [1, 1]} : vector<16x128xbf16> to vector<16x32xbf16>
    %219 = vector.extract_strided_slice %212 {offsets = [0, 0], sizes = [16, 32], strides = [1, 1]} : vector<16x128xbf16> to vector<16x32xbf16>
    %cst_65 = arith.constant dense<0.000000e+00> : vector<16x16xf32>
    %220 = tpu.matmul %218, %219, %cst_65 {dimension_numbers = #tpu.dot_dimension_numbers<[1], [1], [0], [0], [0, 0, 1, 0], [], []>} : vector<16x32xbf16>, vector<16x32xbf16>, vector<16x16xf32> -> vector<16x16xf32>
    %221 = arith.addf %220, %0 : vector<16x16xf32>
    %cst_66 = arith.constant dense<0xFF800000> : vector<16xf32>
    %222 = vector.multi_reduction <maximumf>, %221, %cst_66 [1] : vector<16x16xf32> to vector<16xf32>
    %223 = vector.shape_cast %222 : vector<16xf32> to vector<16x1xf32>
    %224 = vector.broadcast %223 : vector<16x1xf32> to vector<16x16xf32>
    %225 = arith.subf %221, %224 : vector<16x16xf32>
    %226 = math.exp %225 : vector<16x16xf32>
    %cst_67 = arith.constant dense<0.000000e+00> : vector<16xf32>
    %227 = vector.multi_reduction <add>, %226, %cst_67 [1] : vector<16x16xf32> to vector<16xf32>
    %228 = vector.shape_cast %227 : vector<16xf32> to vector<16x1xf32>
    %229 = tpu.reciprocal %228 {approx = true} : vector<16x1xf32> -> vector<16x1xf32>
    %230 = vector.broadcast %229 : vector<16x1xf32> to vector<16x16xf32>
    %231 = arith.mulf %226, %230 : vector<16x16xf32>
    %232 = arith.truncf %231 : vector<16x16xf32> to vector<16x16xbf16>
    %233 = vector.extract_strided_slice %217 {offsets = [0, 0], sizes = [16, 32], strides = [1, 1]} : vector<16x128xbf16> to vector<16x32xbf16>
    %cst_68 = arith.constant dense<0.000000e+00> : vector<16x32xf32>
    %234 = tpu.matmul %232, %233, %cst_68 {dimension_numbers = #tpu.dot_dimension_numbers<[1], [0], [0], [1], [0, 0, 1, 1], [], []>} : vector<16x16xbf16>, vector<16x32xbf16>, vector<16x32xf32> -> vector<16x32xf32>
    %c0_69 = arith.constant 0 : index
    %c0_70 = arith.constant 0 : index
    %235 = vector.load %arg9[%c0_69, %c0_70] : memref<16x128xf32, #tpu.memory_space<vmem>>, vector<16x32xf32>
    tpu.vector_store %arg9[%c0_69, %c0_70], %234 {strides = array<i32>} : memref<16x128xf32, #tpu.memory_space<vmem>>, vector<16x32xf32>,
    %236 = vector.extract_strided_slice %207 {offsets = [0, 32], sizes = [16, 32], strides = [1, 1]} : vector<16x128xbf16> to vector<16x32xbf16>
    %237 = vector.extract_strided_slice %212 {offsets = [0, 32], sizes = [16, 32], strides = [1, 1]} : vector<16x128xbf16> to vector<16x32xbf16>
    %cst_71 = arith.constant dense<0.000000e+00> : vector<16x16xf32>
    %238 = tpu.matmul %236, %237, %cst_71 {dimension_numbers = #tpu.dot_dimension_numbers<[1], [1], [0], [0], [0, 0, 1, 0], [], []>} : vector<16x32xbf16>, vector<16x32xbf16>, vector<16x16xf32> -> vector<16x16xf32>
    %239 = arith.addf %238, %0 : vector<16x16xf32>
    %cst_72 = arith.constant dense<0xFF800000> : vector<16xf32>
    %240 = vector.multi_reduction <maximumf>, %239, %cst_72 [1] : vector<16x16xf32> to vector<16xf32>
    %241 = vector.shape_cast %240 : vector<16xf32> to vector<16x1xf32>
    %242 = vector.broadcast %241 : vector<16x1xf32> to vector<16x16xf32>
    %243 = arith.subf %239, %242 : vector<16x16xf32>
    %244 = math.exp %243 : vector<16x16xf32>
    %cst_73 = arith.constant dense<0.000000e+00> : vector<16xf32>
    %245 = vector.multi_reduction <add>, %244, %cst_73 [1] : vector<16x16xf32> to vector<16xf32>
    %246 = vector.shape_cast %245 : vector<16xf32> to vector<16x1xf32>
    %247 = tpu.reciprocal %246 {approx = true} : vector<16x1xf32> -> vector<16x1xf32>
    %248 = vector.broadcast %247 : vector<16x1xf32> to vector<16x16xf32>
    %249 = arith.mulf %244, %248 : vector<16x16xf32>
    %250 = arith.truncf %249 : vector<16x16xf32> to vector<16x16xbf16>
    %251 = vector.extract_strided_slice %217 {offsets = [0, 32], sizes = [16, 32], strides = [1, 1]} : vector<16x128xbf16> to vector<16x32xbf16>
    %cst_74 = arith.constant dense<0.000000e+00> : vector<16x32xf32>
    %252 = tpu.matmul %250, %251, %cst_74 {dimension_numbers = #tpu.dot_dimension_numbers<[1], [0], [0], [1], [0, 0, 1, 1], [], []>} : vector<16x16xbf16>, vector<16x32xbf16>, vector<16x32xf32> -> vector<16x32xf32>
    %c0_75 = arith.constant 0 : index
    %c32_76 = arith.constant 32 : index
    %253 = vector.load %arg9[%c0_75, %c32_76] : memref<16x128xf32, #tpu.memory_space<vmem>>, vector<16x32xf32>
    tpu.vector_store %arg9[%c0_75, %c32_76], %252 {strides = array<i32>} : memref<16x128xf32, #tpu.memory_space<vmem>>, vector<16x32xf32>,
    %254 = vector.extract_strided_slice %207 {offsets = [0, 64], sizes = [16, 32], strides = [1, 1]} : vector<16x128xbf16> to vector<16x32xbf16>
    %255 = vector.extract_strided_slice %212 {offsets = [0, 64], sizes = [16, 32], strides = [1, 1]} : vector<16x128xbf16> to vector<16x32xbf16>
    %cst_77 = arith.constant dense<0.000000e+00> : vector<16x16xf32>
    %256 = tpu.matmul %254, %255, %cst_77 {dimension_numbers = #tpu.dot_dimension_numbers<[1], [1], [0], [0], [0, 0, 1, 0], [], []>} : vector<16x32xbf16>, vector<16x32xbf16>, vector<16x16xf32> -> vector<16x16xf32>
    %257 = arith.addf %256, %0 : vector<16x16xf32>
    %cst_78 = arith.constant dense<0xFF800000> : vector<16xf32>
    %258 = vector.multi_reduction <maximumf>, %257, %cst_78 [1] : vector<16x16xf32> to vector<16xf32>
    %259 = vector.shape_cast %258 : vector<16xf32> to vector<16x1xf32>
    %260 = vector.broadcast %259 : vector<16x1xf32> to vector<16x16xf32>
    %261 = arith.subf %257, %260 : vector<16x16xf32>
    %262 = math.exp %261 : vector<16x16xf32>
    %cst_79 = arith.constant dense<0.000000e+00> : vector<16xf32>
    %263 = vector.multi_reduction <add>, %262, %cst_79 [1] : vector<16x16xf32> to vector<16xf32>
    %264 = vector.shape_cast %263 : vector<16xf32> to vector<16x1xf32>
    %265 = tpu.reciprocal %264 {approx = true} : vector<16x1xf32> -> vector<16x1xf32>
    %266 = vector.broadcast %265 : vector<16x1xf32> to vector<16x16xf32>
    %267 = arith.mulf %262, %266 : vector<16x16xf32>
    %268 = arith.truncf %267 : vector<16x16xf32> to vector<16x16xbf16>
    %269 = vector.extract_strided_slice %217 {offsets = [0, 64], sizes = [16, 32], strides = [1, 1]} : vector<16x128xbf16> to vector<16x32xbf16>
    %cst_80 = arith.constant dense<0.000000e+00> : vector<16x32xf32>
    %270 = tpu.matmul %268, %269, %cst_80 {dimension_numbers = #tpu.dot_dimension_numbers<[1], [0], [0], [1], [0, 0, 1, 1], [], []>} : vector<16x16xbf16>, vector<16x32xbf16>, vector<16x32xf32> -> vector<16x32xf32>
    %c0_81 = arith.constant 0 : index
    %c64_82 = arith.constant 64 : index
    %271 = vector.load %arg9[%c0_81, %c64_82] : memref<16x128xf32, #tpu.memory_space<vmem>>, vector<16x32xf32>
    tpu.vector_store %arg9[%c0_81, %c64_82], %270 {strides = array<i32>} : memref<16x128xf32, #tpu.memory_space<vmem>>, vector<16x32xf32>,
    %272 = vector.extract_strided_slice %207 {offsets = [0, 96], sizes = [16, 32], strides = [1, 1]} : vector<16x128xbf16> to vector<16x32xbf16>
    %273 = vector.extract_strided_slice %212 {offsets = [0, 96], sizes = [16, 32], strides = [1, 1]} : vector<16x128xbf16> to vector<16x32xbf16>
    %cst_83 = arith.constant dense<0.000000e+00> : vector<16x16xf32>
    %274 = tpu.matmul %272, %273, %cst_83 {dimension_numbers = #tpu.dot_dimension_numbers<[1], [1], [0], [0], [0, 0, 1, 0], [], []>} : vector<16x32xbf16>, vector<16x32xbf16>, vector<16x16xf32> -> vector<16x16xf32>
    %275 = arith.addf %274, %0 : vector<16x16xf32>
    %cst_84 = arith.constant dense<0xFF800000> : vector<16xf32>
    %276 = vector.multi_reduction <maximumf>, %275, %cst_84 [1] : vector<16x16xf32> to vector<16xf32>
    %277 = vector.shape_cast %276 : vector<16xf32> to vector<16x1xf32>
    %278 = vector.broadcast %277 : vector<16x1xf32> to vector<16x16xf32>
    %279 = arith.subf %275, %278 : vector<16x16xf32>
    %280 = math.exp %279 : vector<16x16xf32>
    %cst_85 = arith.constant dense<0.000000e+00> : vector<16xf32>
    %281 = vector.multi_reduction <add>, %280, %cst_85 [1] : vector<16x16xf32> to vector<16xf32>
    %282 = vector.shape_cast %281 : vector<16xf32> to vector<16x1xf32>
    %283 = tpu.reciprocal %282 {approx = true} : vector<16x1xf32> -> vector<16x1xf32>
    %284 = vector.broadcast %283 : vector<16x1xf32> to vector<16x16xf32>
    %285 = arith.mulf %280, %284 : vector<16x16xf32>
    %286 = arith.truncf %285 : vector<16x16xf32> to vector<16x16xbf16>
    %287 = vector.extract_strided_slice %217 {offsets = [0, 96], sizes = [16, 32], strides = [1, 1]} : vector<16x128xbf16> to vector<16x32xbf16>
    %cst_86 = arith.constant dense<0.000000e+00> : vector<16x32xf32>
    %288 = tpu.matmul %286, %287, %cst_86 {dimension_numbers = #tpu.dot_dimension_numbers<[1], [0], [0], [1], [0, 0, 1, 1], [], []>} : vector<16x16xbf16>, vector<16x32xbf16>, vector<16x32xf32> -> vector<16x32xf32>
    %c0_87 = arith.constant 0 : index
    %c96_88 = arith.constant 96 : index
    %289 = vector.load %arg9[%c0_87, %c96_88] : memref<16x128xf32, #tpu.memory_space<vmem>>, vector<16x32xf32>
    tpu.vector_store %arg9[%c0_87, %c96_88], %288 {strides = array<i32>} : memref<16x128xf32, #tpu.memory_space<vmem>>, vector<16x32xf32>,
    %c0_89 = arith.constant 0 : index
    %c0_90 = arith.constant 0 : index
    %290 = vector.load %arg9[%c0_89, %c0_90] : memref<16x128xf32, #tpu.memory_space<vmem>>, vector<16x128xf32>
    %291 = arith.truncf %290 : vector<16x128xf32> to vector<16x128xbf16>
    %c0_91 = arith.constant 0 : index
    %c0_92 = arith.constant 0 : index
    %292 = vector.load %arg5[%c0_91, %c0_92] : memref<128x128xbf16, #tpu.memory_space<vmem>>, vector<128x128xbf16>
    %cst_93 = arith.constant dense<0.000000e+00> : vector<16x128xf32>
    %293 = tpu.matmul %291, %292, %cst_93 {dimension_numbers = #tpu.dot_dimension_numbers<[1], [0], [0], [1], [0, 0, 1, 1], [], []>} : vector<16x128xbf16>, vector<128x128xbf16>, vector<16x128xf32> -> vector<16x128xf32>
    %294 = vector.extract_strided_slice %1 {offsets = [5, 0], sizes = [1, 128], strides = [1, 1]} : vector<16x128xf32> to vector<1x128xf32>
    %295 = vector.broadcast %294 : vector<1x128xf32> to vector<16x128xf32>
    %296 = arith.addf %293, %295 : vector<16x128xf32>
    %297 = arith.addf %296, %199 : vector<16x128xf32>
    %298 = vector.extract_strided_slice %1 {offsets = [6, 0], sizes = [1, 128], strides = [1, 1]} : vector<16x128xf32> to vector<1x128xf32>
    %299 = vector.extract_strided_slice %1 {offsets = [7, 0], sizes = [1, 128], strides = [1, 1]} : vector<16x128xf32> to vector<1x128xf32>
    %cst_94 = arith.constant dense<0.000000e+00> : vector<16xf32>
    %300 = vector.multi_reduction <add>, %297, %cst_94 [1] : vector<16x128xf32> to vector<16xf32>
    %301 = vector.shape_cast %300 : vector<16xf32> to vector<16x1xf32>
    %cst_95 = arith.constant 1.280000e+02 : f32
    %302 = vector.broadcast %cst_95 : f32 to vector<16x1xf32>
    %303 = arith.divf %301, %302 : vector<16x1xf32>
    %304 = arith.mulf %297, %297 : vector<16x128xf32>
    %cst_96 = arith.constant dense<0.000000e+00> : vector<16xf32>
    %305 = vector.multi_reduction <add>, %304, %cst_96 [1] : vector<16x128xf32> to vector<16xf32>
    %306 = vector.shape_cast %305 : vector<16xf32> to vector<16x1xf32>
    %cst_97 = arith.constant 1.280000e+02 : f32
    %307 = vector.broadcast %cst_97 : f32 to vector<16x1xf32>
    %308 = arith.divf %306, %307 : vector<16x1xf32>
    %309 = arith.mulf %303, %303 : vector<16x1xf32>
    %310 = arith.subf %308, %309 : vector<16x1xf32>
    %cst_98 = arith.constant 0.000000e+00 : f32
    %311 = vector.broadcast %cst_98 : f32 to vector<16x1xf32>
    %312 = arith.maximumf %310, %311 : vector<16x1xf32>
    %313 = vector.broadcast %303 : vector<16x1xf32> to vector<16x128xf32>
    %314 = arith.subf %297, %313 : vector<16x128xf32>
    %cst_99 = arith.constant 9.99999996E-13 : f32
    %315 = vector.broadcast %cst_99 : f32 to vector<16x1xf32>
    %316 = arith.addf %312, %315 : vector<16x1xf32>
    %317 = math.rsqrt %316 : vector<16x1xf32>
    %318 = vector.broadcast %317 : vector<16x1xf32> to vector<16x128xf32>
    %319 = arith.mulf %314, %318 : vector<16x128xf32>
    %320 = vector.broadcast %298 : vector<1x128xf32> to vector<16x128xf32>
    %321 = arith.mulf %319, %320 : vector<16x128xf32>
    %322 = vector.broadcast %299 : vector<1x128xf32> to vector<16x128xf32>
    %323 = arith.addf %321, %322 : vector<16x128xf32>
    %324 = arith.truncf %323 : vector<16x128xf32> to vector<16x128xbf16>
    %c0_100 = arith.constant 0 : index
    %c0_101 = arith.constant 0 : index
    %325 = vector.load %arg6[%c0_100, %c0_101] : memref<128x256xbf16, #tpu.memory_space<vmem>>, vector<128x256xbf16>
    %cst_102 = arith.constant dense<0.000000e+00> : vector<16x256xf32>
    %326 = tpu.matmul %324, %325, %cst_102 {dimension_numbers = #tpu.dot_dimension_numbers<[1], [0], [0], [1], [0, 0, 1, 1], [], []>} : vector<16x128xbf16>, vector<128x256xbf16>, vector<16x256xf32> -> vector<16x256xf32>
    %327 = vector.broadcast %2 : vector<1x256xf32> to vector<16x256xf32>
    %328 = arith.addf %326, %327 : vector<16x256xf32>
    %cst_103 = arith.constant 5.000000e-01 : f32
    %329 = vector.broadcast %cst_103 : f32 to vector<16x256xf32>
    %330 = arith.mulf %329, %328 : vector<16x256xf32>
    %cst_104 = arith.constant 0.707106769 : f32
    %331 = vector.broadcast %cst_104 : f32 to vector<16x256xf32>
    %332 = arith.mulf %328, %331 : vector<16x256xf32>
    %333 = math.erf %332 : vector<16x256xf32>
    %cst_105 = arith.constant 1.000000e+00 : f32
    %334 = vector.broadcast %cst_105 : f32 to vector<16x256xf32>
    %335 = arith.addf %334, %333 : vector<16x256xf32>
    %336 = arith.mulf %330, %335 : vector<16x256xf32>
    %337 = arith.truncf %336 : vector<16x256xf32> to vector<16x256xbf16>
    %c0_106 = arith.constant 0 : index
    %c0_107 = arith.constant 0 : index
    %338 = vector.load %arg7[%c0_106, %c0_107] : memref<256x128xbf16, #tpu.memory_space<vmem>>, vector<256x128xbf16>
    %cst_108 = arith.constant dense<0.000000e+00> : vector<16x128xf32>
    %339 = tpu.matmul %337, %338, %cst_108 {dimension_numbers = #tpu.dot_dimension_numbers<[1], [0], [0], [1], [0, 0, 1, 1], [], []>} : vector<16x256xbf16>, vector<256x128xbf16>, vector<16x128xf32> -> vector<16x128xf32>
    %340 = vector.extract_strided_slice %1 {offsets = [8, 0], sizes = [1, 128], strides = [1, 1]} : vector<16x128xf32> to vector<1x128xf32>
    %341 = vector.broadcast %340 : vector<1x128xf32> to vector<16x128xf32>
    %342 = arith.addf %339, %341 : vector<16x128xf32>
    %343 = arith.addf %342, %323 : vector<16x128xf32>
    %344 = vector.extract_strided_slice %1 {offsets = [9, 0], sizes = [1, 128], strides = [1, 1]} : vector<16x128xf32> to vector<1x128xf32>
    %345 = vector.extract_strided_slice %1 {offsets = [10, 0], sizes = [1, 128], strides = [1, 1]} : vector<16x128xf32> to vector<1x128xf32>
    %cst_109 = arith.constant dense<0.000000e+00> : vector<16xf32>
    %346 = vector.multi_reduction <add>, %343, %cst_109 [1] : vector<16x128xf32> to vector<16xf32>
    %347 = vector.shape_cast %346 : vector<16xf32> to vector<16x1xf32>
    %cst_110 = arith.constant 1.280000e+02 : f32
    %348 = vector.broadcast %cst_110 : f32 to vector<16x1xf32>
    %349 = arith.divf %347, %348 : vector<16x1xf32>
    %350 = arith.mulf %343, %343 : vector<16x128xf32>
    %cst_111 = arith.constant dense<0.000000e+00> : vector<16xf32>
    %351 = vector.multi_reduction <add>, %350, %cst_111 [1] : vector<16x128xf32> to vector<16xf32>
    %352 = vector.shape_cast %351 : vector<16xf32> to vector<16x1xf32>
    %cst_112 = arith.constant 1.280000e+02 : f32
    %353 = vector.broadcast %cst_112 : f32 to vector<16x1xf32>
    %354 = arith.divf %352, %353 : vector<16x1xf32>
    %355 = arith.mulf %349, %349 : vector<16x1xf32>
    %356 = arith.subf %354, %355 : vector<16x1xf32>
    %cst_113 = arith.constant 0.000000e+00 : f32
    %357 = vector.broadcast %cst_113 : f32 to vector<16x1xf32>
    %358 = arith.maximumf %356, %357 : vector<16x1xf32>
    %359 = vector.broadcast %349 : vector<16x1xf32> to vector<16x128xf32>
    %360 = arith.subf %343, %359 : vector<16x128xf32>
    %cst_114 = arith.constant 9.99999996E-13 : f32
    %361 = vector.broadcast %cst_114 : f32 to vector<16x1xf32>
    %362 = arith.addf %358, %361 : vector<16x1xf32>
    %363 = math.rsqrt %362 : vector<16x1xf32>
    %364 = vector.broadcast %363 : vector<16x1xf32> to vector<16x128xf32>
    %365 = arith.mulf %360, %364 : vector<16x128xf32>
    %366 = vector.broadcast %344 : vector<1x128xf32> to vector<16x128xf32>
    %367 = arith.mulf %365, %366 : vector<16x128xf32>
    %368 = vector.broadcast %345 : vector<1x128xf32> to vector<16x128xf32>
    %369 = arith.addf %367, %368 : vector<16x128xf32>
    %c2_i32 = arith.constant 2 : i32
    %370 = arith.truncf %369 : vector<16x128xf32> to vector<16x128xbf16>
    %c0_115 = arith.constant 0 : index
    %c0_116 = arith.constant 0 : index
    %371 = vector.load %arg4[%c0_115, %c0_116] : memref<128x384xbf16, #tpu.memory_space<vmem>>, vector<128x384xbf16>
    %cst_117 = arith.constant dense<0.000000e+00> : vector<16x384xf32>
    %372 = tpu.matmul %370, %371, %cst_117 {dimension_numbers = #tpu.dot_dimension_numbers<[1], [0], [0], [1], [0, 0, 1, 1], [], []>} : vector<16x128xbf16>, vector<128x384xbf16>, vector<16x384xf32> -> vector<16x384xf32>
    %373 = vector.extract_strided_slice %372 {offsets = [0, 0], sizes = [16, 128], strides = [1, 1]} : vector<16x384xf32> to vector<16x128xf32>
    %374 = vector.extract_strided_slice %1 {offsets = [2, 0], sizes = [1, 128], strides = [1, 1]} : vector<16x128xf32> to vector<1x128xf32>
    %375 = vector.broadcast %374 : vector<1x128xf32> to vector<16x128xf32>
    %376 = arith.addf %373, %375 : vector<16x128xf32>
    %377 = arith.truncf %376 : vector<16x128xf32> to vector<16x128xbf16>
    %378 = vector.extract_strided_slice %372 {offsets = [0, 128], sizes = [16, 128], strides = [1, 1]} : vector<16x384xf32> to vector<16x128xf32>
    %379 = vector.extract_strided_slice %1 {offsets = [3, 0], sizes = [1, 128], strides = [1, 1]} : vector<16x128xf32> to vector<1x128xf32>
    %380 = vector.broadcast %379 : vector<1x128xf32> to vector<16x128xf32>
    %381 = arith.addf %378, %380 : vector<16x128xf32>
    %382 = arith.truncf %381 : vector<16x128xf32> to vector<16x128xbf16>
    %383 = vector.extract_strided_slice %372 {offsets = [0, 256], sizes = [16, 128], strides = [1, 1]} : vector<16x384xf32> to vector<16x128xf32>
    %384 = vector.extract_strided_slice %1 {offsets = [4, 0], sizes = [1, 128], strides = [1, 1]} : vector<16x128xf32> to vector<1x128xf32>
    %385 = vector.broadcast %384 : vector<1x128xf32> to vector<16x128xf32>
    %386 = arith.addf %383, %385 : vector<16x128xf32>
    %387 = arith.truncf %386 : vector<16x128xf32> to vector<16x128xbf16>
    %388 = vector.extract_strided_slice %377 {offsets = [0, 0], sizes = [16, 32], strides = [1, 1]} : vector<16x128xbf16> to vector<16x32xbf16>
    %389 = vector.extract_strided_slice %382 {offsets = [0, 0], sizes = [16, 32], strides = [1, 1]} : vector<16x128xbf16> to vector<16x32xbf16>
    %cst_118 = arith.constant dense<0.000000e+00> : vector<16x16xf32>
    %390 = tpu.matmul %388, %389, %cst_118 {dimension_numbers = #tpu.dot_dimension_numbers<[1], [1], [0], [0], [0, 0, 1, 0], [], []>} : vector<16x32xbf16>, vector<16x32xbf16>, vector<16x16xf32> -> vector<16x16xf32>
    %391 = arith.addf %390, %0 : vector<16x16xf32>
    %cst_119 = arith.constant dense<0xFF800000> : vector<16xf32>
    %392 = vector.multi_reduction <maximumf>, %391, %cst_119 [1] : vector<16x16xf32> to vector<16xf32>
    %393 = vector.shape_cast %392 : vector<16xf32> to vector<16x1xf32>
    %394 = vector.broadcast %393 : vector<16x1xf32> to vector<16x16xf32>
    %395 = arith.subf %391, %394 : vector<16x16xf32>
    %396 = math.exp %395 : vector<16x16xf32>
    %cst_120 = arith.constant dense<0.000000e+00> : vector<16xf32>
    %397 = vector.multi_reduction <add>, %396, %cst_120 [1] : vector<16x16xf32> to vector<16xf32>
    %398 = vector.shape_cast %397 : vector<16xf32> to vector<16x1xf32>
    %399 = tpu.reciprocal %398 {approx = true} : vector<16x1xf32> -> vector<16x1xf32>
    %400 = vector.broadcast %399 : vector<16x1xf32> to vector<16x16xf32>
    %401 = arith.mulf %396, %400 : vector<16x16xf32>
    %402 = arith.truncf %401 : vector<16x16xf32> to vector<16x16xbf16>
    %403 = vector.extract_strided_slice %387 {offsets = [0, 0], sizes = [16, 32], strides = [1, 1]} : vector<16x128xbf16> to vector<16x32xbf16>
    %cst_121 = arith.constant dense<0.000000e+00> : vector<16x32xf32>
    %404 = tpu.matmul %402, %403, %cst_121 {dimension_numbers = #tpu.dot_dimension_numbers<[1], [0], [0], [1], [0, 0, 1, 1], [], []>} : vector<16x16xbf16>, vector<16x32xbf16>, vector<16x32xf32> -> vector<16x32xf32>
    %c0_122 = arith.constant 0 : index
    %c0_123 = arith.constant 0 : index
    %405 = vector.load %arg9[%c0_122, %c0_123] : memref<16x128xf32, #tpu.memory_space<vmem>>, vector<16x32xf32>
    tpu.vector_store %arg9[%c0_122, %c0_123], %404 {strides = array<i32>} : memref<16x128xf32, #tpu.memory_space<vmem>>, vector<16x32xf32>,
    %406 = vector.extract_strided_slice %377 {offsets = [0, 32], sizes = [16, 32], strides = [1, 1]} : vector<16x128xbf16> to vector<16x32xbf16>
    %407 = vector.extract_strided_slice %382 {offsets = [0, 32], sizes = [16, 32], strides = [1, 1]} : vector<16x128xbf16> to vector<16x32xbf16>
    %cst_124 = arith.constant dense<0.000000e+00> : vector<16x16xf32>
    %408 = tpu.matmul %406, %407, %cst_124 {dimension_numbers = #tpu.dot_dimension_numbers<[1], [1], [0], [0], [0, 0, 1, 0], [], []>} : vector<16x32xbf16>, vector<16x32xbf16>, vector<16x16xf32> -> vector<16x16xf32>
    %409 = arith.addf %408, %0 : vector<16x16xf32>
    %cst_125 = arith.constant dense<0xFF800000> : vector<16xf32>
    %410 = vector.multi_reduction <maximumf>, %409, %cst_125 [1] : vector<16x16xf32> to vector<16xf32>
    %411 = vector.shape_cast %410 : vector<16xf32> to vector<16x1xf32>
    %412 = vector.broadcast %411 : vector<16x1xf32> to vector<16x16xf32>
    %413 = arith.subf %409, %412 : vector<16x16xf32>
    %414 = math.exp %413 : vector<16x16xf32>
    %cst_126 = arith.constant dense<0.000000e+00> : vector<16xf32>
    %415 = vector.multi_reduction <add>, %414, %cst_126 [1] : vector<16x16xf32> to vector<16xf32>
    %416 = vector.shape_cast %415 : vector<16xf32> to vector<16x1xf32>
    %417 = tpu.reciprocal %416 {approx = true} : vector<16x1xf32> -> vector<16x1xf32>
    %418 = vector.broadcast %417 : vector<16x1xf32> to vector<16x16xf32>
    %419 = arith.mulf %414, %418 : vector<16x16xf32>
    %420 = arith.truncf %419 : vector<16x16xf32> to vector<16x16xbf16>
    %421 = vector.extract_strided_slice %387 {offsets = [0, 32], sizes = [16, 32], strides = [1, 1]} : vector<16x128xbf16> to vector<16x32xbf16>
    %cst_127 = arith.constant dense<0.000000e+00> : vector<16x32xf32>
    %422 = tpu.matmul %420, %421, %cst_127 {dimension_numbers = #tpu.dot_dimension_numbers<[1], [0], [0], [1], [0, 0, 1, 1], [], []>} : vector<16x16xbf16>, vector<16x32xbf16>, vector<16x32xf32> -> vector<16x32xf32>
    %c0_128 = arith.constant 0 : index
    %c32_129 = arith.constant 32 : index
    %423 = vector.load %arg9[%c0_128, %c32_129] : memref<16x128xf32, #tpu.memory_space<vmem>>, vector<16x32xf32>
    tpu.vector_store %arg9[%c0_128, %c32_129], %422 {strides = array<i32>} : memref<16x128xf32, #tpu.memory_space<vmem>>, vector<16x32xf32>,
    %424 = vector.extract_strided_slice %377 {offsets = [0, 64], sizes = [16, 32], strides = [1, 1]} : vector<16x128xbf16> to vector<16x32xbf16>
    %425 = vector.extract_strided_slice %382 {offsets = [0, 64], sizes = [16, 32], strides = [1, 1]} : vector<16x128xbf16> to vector<16x32xbf16>
    %cst_130 = arith.constant dense<0.000000e+00> : vector<16x16xf32>
    %426 = tpu.matmul %424, %425, %cst_130 {dimension_numbers = #tpu.dot_dimension_numbers<[1], [1], [0], [0], [0, 0, 1, 0], [], []>} : vector<16x32xbf16>, vector<16x32xbf16>, vector<16x16xf32> -> vector<16x16xf32>
    %427 = arith.addf %426, %0 : vector<16x16xf32>
    %cst_131 = arith.constant dense<0xFF800000> : vector<16xf32>
    %428 = vector.multi_reduction <maximumf>, %427, %cst_131 [1] : vector<16x16xf32> to vector<16xf32>
    %429 = vector.shape_cast %428 : vector<16xf32> to vector<16x1xf32>
    %430 = vector.broadcast %429 : vector<16x1xf32> to vector<16x16xf32>
    %431 = arith.subf %427, %430 : vector<16x16xf32>
    %432 = math.exp %431 : vector<16x16xf32>
    %cst_132 = arith.constant dense<0.000000e+00> : vector<16xf32>
    %433 = vector.multi_reduction <add>, %432, %cst_132 [1] : vector<16x16xf32> to vector<16xf32>
    %434 = vector.shape_cast %433 : vector<16xf32> to vector<16x1xf32>
    %435 = tpu.reciprocal %434 {approx = true} : vector<16x1xf32> -> vector<16x1xf32>
    %436 = vector.broadcast %435 : vector<16x1xf32> to vector<16x16xf32>
    %437 = arith.mulf %432, %436 : vector<16x16xf32>
    %438 = arith.truncf %437 : vector<16x16xf32> to vector<16x16xbf16>
    %439 = vector.extract_strided_slice %387 {offsets = [0, 64], sizes = [16, 32], strides = [1, 1]} : vector<16x128xbf16> to vector<16x32xbf16>
    %cst_133 = arith.constant dense<0.000000e+00> : vector<16x32xf32>
    %440 = tpu.matmul %438, %439, %cst_133 {dimension_numbers = #tpu.dot_dimension_numbers<[1], [0], [0], [1], [0, 0, 1, 1], [], []>} : vector<16x16xbf16>, vector<16x32xbf16>, vector<16x32xf32> -> vector<16x32xf32>
    %c0_134 = arith.constant 0 : index
    %c64_135 = arith.constant 64 : index
    %441 = vector.load %arg9[%c0_134, %c64_135] : memref<16x128xf32, #tpu.memory_space<vmem>>, vector<16x32xf32>
    tpu.vector_store %arg9[%c0_134, %c64_135], %440 {strides = array<i32>} : memref<16x128xf32, #tpu.memory_space<vmem>>, vector<16x32xf32>,
    %442 = vector.extract_strided_slice %377 {offsets = [0, 96], sizes = [16, 32], strides = [1, 1]} : vector<16x128xbf16> to vector<16x32xbf16>
    %443 = vector.extract_strided_slice %382 {offsets = [0, 96], sizes = [16, 32], strides = [1, 1]} : vector<16x128xbf16> to vector<16x32xbf16>
    %cst_136 = arith.constant dense<0.000000e+00> : vector<16x16xf32>
    %444 = tpu.matmul %442, %443, %cst_136 {dimension_numbers = #tpu.dot_dimension_numbers<[1], [1], [0], [0], [0, 0, 1, 0], [], []>} : vector<16x32xbf16>, vector<16x32xbf16>, vector<16x16xf32> -> vector<16x16xf32>
    %445 = arith.addf %444, %0 : vector<16x16xf32>
    %cst_137 = arith.constant dense<0xFF800000> : vector<16xf32>
    %446 = vector.multi_reduction <maximumf>, %445, %cst_137 [1] : vector<16x16xf32> to vector<16xf32>
    %447 = vector.shape_cast %446 : vector<16xf32> to vector<16x1xf32>
    %448 = vector.broadcast %447 : vector<16x1xf32> to vector<16x16xf32>
    %449 = arith.subf %445, %448 : vector<16x16xf32>
    %450 = math.exp %449 : vector<16x16xf32>
    %cst_138 = arith.constant dense<0.000000e+00> : vector<16xf32>
    %451 = vector.multi_reduction <add>, %450, %cst_138 [1] : vector<16x16xf32> to vector<16xf32>
    %452 = vector.shape_cast %451 : vector<16xf32> to vector<16x1xf32>
    %453 = tpu.reciprocal %452 {approx = true} : vector<16x1xf32> -> vector<16x1xf32>
    %454 = vector.broadcast %453 : vector<16x1xf32> to vector<16x16xf32>
    %455 = arith.mulf %450, %454 : vector<16x16xf32>
    %456 = arith.truncf %455 : vector<16x16xf32> to vector<16x16xbf16>
    %457 = vector.extract_strided_slice %387 {offsets = [0, 96], sizes = [16, 32], strides = [1, 1]} : vector<16x128xbf16> to vector<16x32xbf16>
    %cst_139 = arith.constant dense<0.000000e+00> : vector<16x32xf32>
    %458 = tpu.matmul %456, %457, %cst_139 {dimension_numbers = #tpu.dot_dimension_numbers<[1], [0], [0], [1], [0, 0, 1, 1], [], []>} : vector<16x16xbf16>, vector<16x32xbf16>, vector<16x32xf32> -> vector<16x32xf32>
    %c0_140 = arith.constant 0 : index
    %c96_141 = arith.constant 96 : index
    %459 = vector.load %arg9[%c0_140, %c96_141] : memref<16x128xf32, #tpu.memory_space<vmem>>, vector<16x32xf32>
    tpu.vector_store %arg9[%c0_140, %c96_141], %458 {strides = array<i32>} : memref<16x128xf32, #tpu.memory_space<vmem>>, vector<16x32xf32>,
    %c0_142 = arith.constant 0 : index
    %c0_143 = arith.constant 0 : index
    %460 = vector.load %arg9[%c0_142, %c0_143] : memref<16x128xf32, #tpu.memory_space<vmem>>, vector<16x128xf32>
    %461 = arith.truncf %460 : vector<16x128xf32> to vector<16x128xbf16>
    %c0_144 = arith.constant 0 : index
    %c0_145 = arith.constant 0 : index
    %462 = vector.load %arg5[%c0_144, %c0_145] : memref<128x128xbf16, #tpu.memory_space<vmem>>, vector<128x128xbf16>
    %cst_146 = arith.constant dense<0.000000e+00> : vector<16x128xf32>
    %463 = tpu.matmul %461, %462, %cst_146 {dimension_numbers = #tpu.dot_dimension_numbers<[1], [0], [0], [1], [0, 0, 1, 1], [], []>} : vector<16x128xbf16>, vector<128x128xbf16>, vector<16x128xf32> -> vector<16x128xf32>
    %464 = vector.extract_strided_slice %1 {offsets = [5, 0], sizes = [1, 128], strides = [1, 1]} : vector<16x128xf32> to vector<1x128xf32>
    %465 = vector.broadcast %464 : vector<1x128xf32> to vector<16x128xf32>
    %466 = arith.addf %463, %465 : vector<16x128xf32>
    %467 = arith.addf %466, %369 : vector<16x128xf32>
    %468 = vector.extract_strided_slice %1 {offsets = [6, 0], sizes = [1, 128], strides = [1, 1]} : vector<16x128xf32> to vector<1x128xf32>
    %469 = vector.extract_strided_slice %1 {offsets = [7, 0], sizes = [1, 128], strides = [1, 1]} : vector<16x128xf32> to vector<1x128xf32>
    %cst_147 = arith.constant dense<0.000000e+00> : vector<16xf32>
    %470 = vector.multi_reduction <add>, %467, %cst_147 [1] : vector<16x128xf32> to vector<16xf32>
    %471 = vector.shape_cast %470 : vector<16xf32> to vector<16x1xf32>
    %cst_148 = arith.constant 1.280000e+02 : f32
    %472 = vector.broadcast %cst_148 : f32 to vector<16x1xf32>
    %473 = arith.divf %471, %472 : vector<16x1xf32>
    %474 = arith.mulf %467, %467 : vector<16x128xf32>
    %cst_149 = arith.constant dense<0.000000e+00> : vector<16xf32>
    %475 = vector.multi_reduction <add>, %474, %cst_149 [1] : vector<16x128xf32> to vector<16xf32>
    %476 = vector.shape_cast %475 : vector<16xf32> to vector<16x1xf32>
    %cst_150 = arith.constant 1.280000e+02 : f32
    %477 = vector.broadcast %cst_150 : f32 to vector<16x1xf32>
    %478 = arith.divf %476, %477 : vector<16x1xf32>
    %479 = arith.mulf %473, %473 : vector<16x1xf32>
    %480 = arith.subf %478, %479 : vector<16x1xf32>
    %cst_151 = arith.constant 0.000000e+00 : f32
    %481 = vector.broadcast %cst_151 : f32 to vector<16x1xf32>
    %482 = arith.maximumf %480, %481 : vector<16x1xf32>
    %483 = vector.broadcast %473 : vector<16x1xf32> to vector<16x128xf32>
    %484 = arith.subf %467, %483 : vector<16x128xf32>
    %cst_152 = arith.constant 9.99999996E-13 : f32
    %485 = vector.broadcast %cst_152 : f32 to vector<16x1xf32>
    %486 = arith.addf %482, %485 : vector<16x1xf32>
    %487 = math.rsqrt %486 : vector<16x1xf32>
    %488 = vector.broadcast %487 : vector<16x1xf32> to vector<16x128xf32>
    %489 = arith.mulf %484, %488 : vector<16x128xf32>
    %490 = vector.broadcast %468 : vector<1x128xf32> to vector<16x128xf32>
    %491 = arith.mulf %489, %490 : vector<16x128xf32>
    %492 = vector.broadcast %469 : vector<1x128xf32> to vector<16x128xf32>
    %493 = arith.addf %491, %492 : vector<16x128xf32>
    %494 = arith.truncf %493 : vector<16x128xf32> to vector<16x128xbf16>
    %c0_153 = arith.constant 0 : index
    %c0_154 = arith.constant 0 : index
    %495 = vector.load %arg6[%c0_153, %c0_154] : memref<128x256xbf16, #tpu.memory_space<vmem>>, vector<128x256xbf16>
    %cst_155 = arith.constant dense<0.000000e+00> : vector<16x256xf32>
    %496 = tpu.matmul %494, %495, %cst_155 {dimension_numbers = #tpu.dot_dimension_numbers<[1], [0], [0], [1], [0, 0, 1, 1], [], []>} : vector<16x128xbf16>, vector<128x256xbf16>, vector<16x256xf32> -> vector<16x256xf32>
    %497 = vector.broadcast %2 : vector<1x256xf32> to vector<16x256xf32>
    %498 = arith.addf %496, %497 : vector<16x256xf32>
    %cst_156 = arith.constant 5.000000e-01 : f32
    %499 = vector.broadcast %cst_156 : f32 to vector<16x256xf32>
    %500 = arith.mulf %499, %498 : vector<16x256xf32>
    %cst_157 = arith.constant 0.707106769 : f32
    %501 = vector.broadcast %cst_157 : f32 to vector<16x256xf32>
    %502 = arith.mulf %498, %501 : vector<16x256xf32>
    %503 = math.erf %502 : vector<16x256xf32>
    %cst_158 = arith.constant 1.000000e+00 : f32
    %504 = vector.broadcast %cst_158 : f32 to vector<16x256xf32>
    %505 = arith.addf %504, %503 : vector<16x256xf32>
    %506 = arith.mulf %500, %505 : vector<16x256xf32>
    %507 = arith.truncf %506 : vector<16x256xf32> to vector<16x256xbf16>
    %c0_159 = arith.constant 0 : index
    %c0_160 = arith.constant 0 : index
    %508 = vector.load %arg7[%c0_159, %c0_160] : memref<256x128xbf16, #tpu.memory_space<vmem>>, vector<256x128xbf16>
    %cst_161 = arith.constant dense<0.000000e+00> : vector<16x128xf32>
    %509 = tpu.matmul %507, %508, %cst_161 {dimension_numbers = #tpu.dot_dimension_numbers<[1], [0], [0], [1], [0, 0, 1, 1], [], []>} : vector<16x256xbf16>, vector<256x128xbf16>, vector<16x128xf32> -> vector<16x128xf32>
    %510 = vector.extract_strided_slice %1 {offsets = [8, 0], sizes = [1, 128], strides = [1, 1]} : vector<16x128xf32> to vector<1x128xf32>
    %511 = vector.broadcast %510 : vector<1x128xf32> to vector<16x128xf32>
    %512 = arith.addf %509, %511 : vector<16x128xf32>
    %513 = arith.addf %512, %493 : vector<16x128xf32>
    %514 = vector.extract_strided_slice %1 {offsets = [9, 0], sizes = [1, 128], strides = [1, 1]} : vector<16x128xf32> to vector<1x128xf32>
    %515 = vector.extract_strided_slice %1 {offsets = [10, 0], sizes = [1, 128], strides = [1, 1]} : vector<16x128xf32> to vector<1x128xf32>
    %cst_162 = arith.constant dense<0.000000e+00> : vector<16xf32>
    %516 = vector.multi_reduction <add>, %513, %cst_162 [1] : vector<16x128xf32> to vector<16xf32>
    %517 = vector.shape_cast %516 : vector<16xf32> to vector<16x1xf32>
    %cst_163 = arith.constant 1.280000e+02 : f32
    %518 = vector.broadcast %cst_163 : f32 to vector<16x1xf32>
    %519 = arith.divf %517, %518 : vector<16x1xf32>
    %520 = arith.mulf %513, %513 : vector<16x128xf32>
    %cst_164 = arith.constant dense<0.000000e+00> : vector<16xf32>
    %521 = vector.multi_reduction <add>, %520, %cst_164 [1] : vector<16x128xf32> to vector<16xf32>
    %522 = vector.shape_cast %521 : vector<16xf32> to vector<16x1xf32>
    %cst_165 = arith.constant 1.280000e+02 : f32
    %523 = vector.broadcast %cst_165 : f32 to vector<16x1xf32>
    %524 = arith.divf %522, %523 : vector<16x1xf32>
    %525 = arith.mulf %519, %519 : vector<16x1xf32>
    %526 = arith.subf %524, %525 : vector<16x1xf32>
    %cst_166 = arith.constant 0.000000e+00 : f32
    %527 = vector.broadcast %cst_166 : f32 to vector<16x1xf32>
    %528 = arith.maximumf %526, %527 : vector<16x1xf32>
    %529 = vector.broadcast %519 : vector<16x1xf32> to vector<16x128xf32>
    %530 = arith.subf %513, %529 : vector<16x128xf32>
    %cst_167 = arith.constant 9.99999996E-13 : f32
    %531 = vector.broadcast %cst_167 : f32 to vector<16x1xf32>
    %532 = arith.addf %528, %531 : vector<16x1xf32>
    %533 = math.rsqrt %532 : vector<16x1xf32>
    %534 = vector.broadcast %533 : vector<16x1xf32> to vector<16x128xf32>
    %535 = arith.mulf %530, %534 : vector<16x128xf32>
    %536 = vector.broadcast %514 : vector<1x128xf32> to vector<16x128xf32>
    %537 = arith.mulf %535, %536 : vector<16x128xf32>
    %538 = vector.broadcast %515 : vector<1x128xf32> to vector<16x128xf32>
    %539 = arith.addf %537, %538 : vector<16x128xf32>
    %c0_168 = arith.constant 0 : index
    %c0_169 = arith.constant 0 : index
    %540 = vector.load %arg8[%c0_168, %c0_169] : memref<16x128xf32, #tpu.memory_space<vmem>>, vector<16x128xf32>
    tpu.vector_store %arg8[%c0_168, %c0_169], %539 {strides = array<i32>} : memref<16x128xf32, #tpu.memory_space<vmem>>, vector<16x128xf32>,
    return
  }
}

</mosaic_0001>

<bundles_post_ra>
// kernel: bert_model_forward.1
= control target key start
LH: loop header
LB: loop body
LE: loop exit
PB: predicated region body
PF: predicated region fallthrough
CT: control target
= control target key end

     0   :  { %13 = vsyncpa [#allocation4], 0  ;;  %s6346_s0 = inlined_call_operand.vmem [shape: f32[16,128], index: 0, kind: input, shape index: {}]   ;;  %s6347_s1 = inlined_call_operand.vmem [shape: f32[16,16], index: 1, kind: input, shape index: {}]   ;;  %s6348_s2 = inlined_call_operand.hbm [shape: f32[16,128], index: 2, kind: input, shape index: {}]   ;;  %s6349_s3 = inlined_call_operand.vmem [shape: f32[1,256], index: 3, kind: input, shape index: {}]   ;;  %s6350_s4 = inlined_call_operand.vmem [shape: bf16[128,384], index: 4, kind: input, shape index: {}]   ;;  %s6351_s5 = inlined_call_operand.hbm [shape: bf16[128,128], index: 5, kind: input, shape index: {}]   ;;  %s6352_s6 = inlined_call_operand.vmem [shape: bf16[128,256], index: 6, kind: input, shape index: {}]   ;;  %s6353_s7 = inlined_call_operand.vmem [shape: bf16[256,128], index: 7, kind: input, shape index: {}]   ;;  %s6354_s8 = inlined_call_operand.hbm [shape: f32[16,128], index: 8, kind: output, shape index: {}]  }
   0x1   :  { %14 = vsyncpa [#allocation7], 0 }
   0x2   :  { %15 = vsyncpa [#allocation5], 0  ;;  %s5122_s27 = smov [#allocation3]   ;;  %s5050_s9 = scalar_lea.hbm %s6348_s2, 256 }
   0x3   :  { %s25_s28 = sshll.u32 %s5122_s27, 4  ;;  %p5051_p0 = scmp.ne.s32.totalorder %s6348_s2, %s5050_s9  ;;  %s26_s28 = int_to_ptr.vmem [resolvable:$true] %s25_s28 }
   0x4   :  { %p5054_p1 = scmp.lt.u32.totalorder %s5050_s9, %s6348_s2 }
   0x6   :  { %p5056_p2 = pnand %p5054_p1, %p5051_p0 }
   0x8   :  { %5059 = shalt.err (!%p5056_p2)
}
   0x9   :  { %s5060_s14 = scalar_lea.vmem %s26_s28, 256  ;;  %p5065_p4 = scmp.lt.s32.totalorder %s26_s28, %s26_s28 }
   0xa   :  { %p5061_p3 = scmp.ne.s32.totalorder %s26_s28, %s5060_s14  ;;  %p5066_p5 = scmp.lt.s32.totalorder %s5060_s14, %s5060_s14 }
   0xc   :  { %p5067_p6 = por %p5066_p5, %p5065_p4 }
   0xe   :  { %p5068_p7 = pnand %p5067_p6, %p5061_p3 }
  0x10   :  { %5071 = shalt.err (!%p5068_p7)
}
  0x11   :  { %s5123_s15 = smov 128   ;;  %s5124_s16 = smov 8  }
  0x12   :  { %31 = dma.hbm_to_vmem [thread:$0]  %s6348_s2, 256, %s26_s28, [#allocation4], %s5123_s15, %s5123_s15, %s5124_s16  }
  0x13   :  { %s5125_s19 = smov [#allocation6]   ;;  %s5072_s23 = scalar_lea.hbm %s6351_s5, 1024 }
  0x14   :  { %s41_s20 = sshll.u32 %s5125_s19, 4  ;;  %p5073_p8 = scmp.ne.s32.totalorder %s6351_s5, %s5072_s23  ;;  %s42_s20 = int_to_ptr.vmem [resolvable:$true] %s41_s20 }
  0x15   :  { %p5076_p9 = scmp.lt.u32.totalorder %s5072_s23, %s6351_s5 }
  0x17   :  { %p5078_p10 = pnand %p5076_p9, %p5073_p8 }
  0x19   :  { %5081 = shalt.err (!%p5078_p10)
}
  0x1a   :  { %s5082_s29 = scalar_lea.vmem %s42_s20, 1024  ;;  %p5087_p12 = scmp.lt.s32.totalorder %s42_s20, %s42_s20 }
  0x1b   :  { %p5083_p11 = scmp.ne.s32.totalorder %s42_s20, %s5082_s29  ;;  %p5088_p13 = scmp.lt.s32.totalorder %s5082_s29, %s5082_s29 }
  0x1d   :  { %p5089_p0 = por %p5088_p13, %p5087_p12 }
  0x1f   :  { %p5090_p1 = pnand %p5089_p0, %p5083_p11 }
  0x21   :  { %5093 = shalt.err (!%p5090_p1)
}
  0x22   :  { %s5126_s2 = smov 64   ;;  %s5127_s28 = smov 4  }
  0x23   :  { %47 = dma.hbm_to_vmem [thread:$0]  %s6351_s5, 1024, %s42_s20, [#allocation7], %s5126_s2, %s5126_s2, %s5127_s28  }
  0x24   :  { %5116 = dma.done.wait [#allocation4], 256  }
  0x25   :  { %5117 = vsyncadd [#allocation4], 4294967040 }
  0x26   :  { %5118 = dma.done.wait [#allocation7], 1024  }
  0x27   :  { %5119 = vsyncadd [#allocation7], 4294966272  ;;  %v5211_v0 = vld [vmem:[%s6346_s0] sm:$0xff]  ;;  %v5216_v1 = vld [vmem:[%s6346_s0 + $0x8] sm:$0xff]  ;;  %v5128_v7 = vmov 0.0   ;;  %v5129_v26 = vmov 0   ;;  %v95_v44 = vlaneseq }
  0x28   :  { %66 = vadd.xlane.f32.xlu0 %v5211_v0  ;;  %v73_v2 = vmul.f32 %v5211_v0, %v5211_v0  ;;  %v74_v3 = vmul.f32 %v5216_v1, %v5216_v1  ;;  %v4658_v4 = vld [vmem:[%s6350_s4 + $0x4] ss:$12 sps:$4 sm:$0xff]   ;;  %v4660_v5 = vld [vmem:[%s6350_s4] ss:$12 sps:$4 sm:$0xff]   ;;  %v4661_v6 = vld [vmem:[%s6350_s4 + $0x8] ss:$12 sps:$4 sm:$0xff]   ;;  %4382 = vmatprep.subr.bf16.mxu1 %v5128_v7 }
  0x29   :  { %268 = vmatprep.subr.bf16.mxu0 %v4658_v4  ;;  %4383 = vmatpush3.bf16.msra.mxu1 %v4661_v6  ;;  %v4662_v8 = vld [vmem:[%s6350_s4 + $0x1c] ss:$12 sps:$4 sm:$0xff]   ;;  %v4664_v9 = vld [vmem:[%s6350_s4 + $0x18] ss:$12 sps:$4 sm:$0xff]   ;;  %v4665_v10 = vld [vmem:[%s6350_s4 + $0x20] ss:$12 sps:$4 sm:$0xff]  }
  0x2a   :  { %75 = vadd.xlane.f32.xlu1 %v73_v2  ;;  %269 = vmatpush1.bf16.msra.mxu0 %v4660_v5  ;;  %v4666_v11 = vld [vmem:[%s6350_s4 + $0x34] ss:$12 sps:$4 sm:$0xff]   ;;  %v4668_v12 = vld [vmem:[%s6350_s4 + $0x30] ss:$12 sps:$4 sm:$0xff]   ;;  %v4669_v13 = vld [vmem:[%s6350_s4 + $0x38] ss:$12 sps:$4 sm:$0xff]  }
  0x2b   :  { %4384 = vmatprep.subr.bf16.mxu1 %v5128_v7  ;;  %270 = vmatprep.subr.bf16.mxu0 %v4662_v8  ;;  %v4670_v14 = vld [vmem:[%s6350_s4 + $0x4c] ss:$12 sps:$4 sm:$0xff]   ;;  %v4672_v15 = vld [vmem:[%s6350_s4 + $0x48] ss:$12 sps:$4 sm:$0xff]   ;;  %v4673_v16 = vld [vmem:[%s6350_s4 + $0x50] ss:$12 sps:$4 sm:$0xff]  }
  0x2c   :  { %68 = vadd.xlane.f32.xlu0 %v5216_v1  ;;  %v4674_v17 = vld [vmem:[%s6350_s4 + $0x64] ss:$12 sps:$4 sm:$0xff]   ;;  %v4676_v18 = vld [vmem:[%s6350_s4 + $0x60] ss:$12 sps:$4 sm:$0xff]   ;;  %v4677_v19 = vld [vmem:[%s6350_s4 + $0x68] ss:$12 sps:$4 sm:$0xff]   ;;  %300 = vmatprep.mubr.bf16.mxu0 %v5129_v26 }
  0x2d   :  { %4385 = vmatpush3.bf16.msra.mxu1 %v4665_v10  ;;  %v4678_v20 = vld [vmem:[%s6350_s4 + $0x7c] ss:$12 sps:$4 sm:$0xff]   ;;  %v4680_v21 = vld [vmem:[%s6350_s4 + $0x78] ss:$12 sps:$4 sm:$0xff]   ;;  %v4681_v22 = vld [vmem:[%s6350_s4 + $0x80] ss:$12 sps:$4 sm:$0xff]  }
  0x2e   :  { %77 = vadd.xlane.f32.xlu1 %v74_v3  ;;  %271 = vmatpush1.bf16.msra.mxu0 %v4664_v9  ;;  %v4682_v23 = vld [vmem:[%s6350_s4 + $0x94] ss:$12 sps:$4 sm:$0xff]   ;;  %v4684_v24 = vld [vmem:[%s6350_s4 + $0x90] ss:$12 sps:$4 sm:$0xff]   ;;  %v4685_v25 = vld [vmem:[%s6350_s4 + $0x98] ss:$12 sps:$4 sm:$0xff]  }
  0x2f   :  { %4386 = vmatprep.subr.bf16.mxu1 %v5128_v7  ;;  %272 = vmatprep.subr.bf16.mxu0 %v4666_v11  ;;  %vm5130_vm0 = vmmov 0   ;;  %v4686_v27 = vld [vmem:[%s6350_s4 + $0xac] ss:$12 sps:$4 sm:$0xff]   ;;  %v4688_v28 = vld [vmem:[%s6350_s4 + $0xa8] ss:$12 sps:$4 sm:$0xff]   ;;  %v5309_v47 = vshrl.u32 %v95_v44, 7 }
  0x30   :  { %4398 = vmatprep.mubr.msk.bf16.mxu1 %vm5130_vm0, %v5128_v7  ;;  %v4689_v29 = vld [vmem:[%s6350_s4 + $0xb0] ss:$12 sps:$4 sm:$0xff]   ;;  %vm373_vm1 = vcmask 261120   ;;  %vm421_vm2 = vcmask 130048   ;;  %s5131_s22 = smov 96   ;;  %s5132_s23 = smov 32  }
  0x31   :  { %4387 = vmatpush3.bf16.msra.mxu1 %v4669_v13  ;;  %v5312_v48 = vsub.s32 0, %v5309_v47  ;;  %v5314_v49 = vld [vmem:[#allocation3] sm:$0xff]  ;;  %v5320_v54 = vsub.s32 1, %v5309_v47  ;;  %v361_v2 = vsub.s32 3, %v5309_v47  ;;  %vm623_vm3 = vcmask 523520  }
  0x32   :  { %273 = vmatpush1.bf16.msra.mxu0 %v4668_v12  ;;  %4388 = vmatprep.subr.bf16.mxu1 %v5128_v7  ;;  %vm755_vm4 = vcmask 785920   ;;  %vm887_vm5 = vcmask 1048320  }
  0x33   :  { %274 = vmatprep.subr.bf16.mxu0 %v4670_v14  ;;  %v98_v53 = vrot.slane %v5314_v49, %v5312_v48  ;;  %v104_v59 = vrot.slane %v5314_v49, %v5320_v54  ;;  %v5347_v8 = vrot.slane %v5314_v49, %v361_v2 }
  0x35   :  { %4389 = vmatpush3.bf16.msra.mxu1 %v4673_v16 }
  0x36   :  { %275 = vmatpush1.bf16.msra.mxu0 %v4672_v15  ;;  %4390 = vmatprep.subr.bf16.mxu1 %v5128_v7 }
  0x37   :  { %276 = vmatprep.subr.bf16.mxu0 %v4674_v17 }
  0x39   :  { %4391 = vmatpush3.bf16.msra.mxu1 %v4677_v19 }
  0x3a   :  { %277 = vmatpush1.bf16.msra.mxu0 %v4676_v18  ;;  %4392 = vmatprep.subr.bf16.mxu1 %v5128_v7 }
  0x3b   :  { %278 = vmatprep.subr.bf16.mxu0 %v4678_v20 }
  0x3d   :  { %4393 = vmatpush3.bf16.msra.mxu1 %v4681_v22 }
  0x3e   :  { %279 = vmatpush1.bf16.msra.mxu0 %v4680_v21  ;;  %4394 = vmatprep.subr.bf16.mxu1 %v5128_v7 }
  0x3f   :  { %280 = vmatprep.subr.bf16.mxu0 %v4682_v23 }
  0x41   :  { %4395 = vmatpush3.bf16.msra.mxu1 %v4685_v25  ;;  %v5367_v25 = vld [vmem:[%s6347_s1] sm:$0xff] }
  0x42   :  { %281 = vmatpush1.bf16.msra.mxu0 %v4684_v24  ;;  %4396 = vmatprep.subr.bf16.mxu1 %v5128_v7 }
  0x43   :  { %282 = vmatprep.subr.bf16.mxu0 %v4686_v27 }
  0x45   :  { %4397 = vmatpush3.bf16.msra.mxu1 %v4689_v29 }
  0x46   :  { %283 = vmatpush1.bf16.msra.mxu0 %v4688_v28  ;;  %4402 = vmatprep.subr.bf16.mxu1 %v5128_v7  ;;  %v5372_v28 = vld [vmem:[%s6347_s1 + $0x8] sm:$0xff] }
  0x47   :  { %4426 = vmatprep.subr.bf16.mxu0 %v5128_v7 }
  0xb5   :  { %v67_v30 = vpop.xlane.xlu0 %66 }
  0xb6   :  { %v71_v31 = vmul.f32 0.0078125, %v67_v30 }
  0xb7   :  { %v76_v32 = vpop.xlane.xlu1 %75 }
  0xb8   :  { %v81_v33 = vmul.f32 %v71_v31, %v71_v31  ;;  %v79_v34 = vmul.f32 0.0078125, %v76_v32  ;;  %v87_v50 = vsub.f32 %v5211_v0, %v71_v31  ;;  %v354_v0 = vsub.s32 2, %v5309_v47 }
  0xb9   :  { %v69_v35 = vpop.xlane.xlu0 %68 }
  0xba   :  { %v83_v36 = vsub.f32 %v79_v34, %v81_v33  ;;  %v72_v37 = vmul.f32 0.0078125, %v69_v35  ;;  %v5341_v3 = vrot.slane %v5314_v49, %v354_v0 }
  0xbb   :  { %v78_v38 = vpop.xlane.xlu1 %77 }
  0xbc   :  { %v85_v39 = vmax.f32 %v83_v36, 0.0  ;;  %v82_v40 = vmul.f32 %v72_v37, %v72_v37  ;;  %v80_v41 = vmul.f32 0.0078125, %v78_v38  ;;  %v88_v55 = vsub.f32 %v5216_v1, %v72_v37 }
  0xbd   :  { %v368_v1 = vsub.s32 4, %v5309_v47 }
  0xbe   :  { %v89_v42 = vadd.f32 1e-12, %v85_v39  ;;  %v84_v43 = vsub.f32 %v80_v41, %v82_v40 }
  0xbf   :  { %v5344_v4 = vrot.slane %v5314_v49, %v368_v1 }
  0xc0   :  { %4898 = vrsqrt.f32 %v89_v42  ;;  %v86_v45 = vmax.f32 %v84_v43, 0.0 }
  0xc2   :  { %v90_v46 = vadd.f32 1e-12, %v86_v45 }
  0xc4   :  { %4900 = vrsqrt.f32 %v90_v46 }
  0xca   :  { %v4899_v51 = vpop.eup %4898 }
  0xcb   :  { %v93_v52 = vmul.f32 %v4899_v51, %v87_v50 }
  0xcd   :  { %v99_v58 = vmul.f32 %v98_v53, %v93_v52 }
  0xce   :  { %v4901_v56 = vpop.eup %4900 }
  0xcf   :  { %v94_v57 = vmul.f32 %v4901_v56, %v88_v55  ;;  %v5325_v61 = vadd.f32 %v104_v59, %v99_v58 }
  0xd1   :  { %v100_v60 = vmul.f32 %v98_v53, %v94_v57 }
  0xd3   :  { %v5327_v62 = vadd.f32 %v104_v59, %v100_v60 }
  0xd5   :  { %v107_v63 = vpack.c.bf16 %v5327_v62, %v5325_v61 }
  0xd7   :  { %301 = vmatmul.mubr.bf16.vlgmr.msra.gmra.mrb[0].mxu0 %v107_v63  ;;  %4399 = vmatmul.mubr.bf16.vlgmr.msra.gmra.mrb[0].mxu1 %v107_v63 }
  0xd8   :  { %4404 = vmatprep.mubr.msk.bf16.mxu1 %vm5130_vm0, %v5128_v7  ;;  %4428 = vmatprep.mubr.msk.bf16.mxu0 %vm5130_vm0, %v5128_v7 }
 0x1aa   :  { %v302_v5 = vpop.f32.mrb[0].mxu0  ;;  %v345_v6 = vpop.f32.mrb[0].mxu1 }
 0x1ab   :  { %v304_v9 = vpop.f32.mrb[1].mxu0  ;;  %v4400_v10 = vpop.f32.mrb[1].mxu1  ;;  %v356_v13 = vadd.f32 %v5341_v3, %v302_v5  ;;  %v370_v14 = vadd.f32 %v5344_v4, %v345_v6 }
 0x1ac   :  { %v306_v11 = vpop.f32.mrb[2].mxu0  ;;  %v348_v12 = vpop.f32.mrb[2].mxu1  ;;  %v363_v19 = vadd.f32 %v5347_v8, %v304_v9 }
 0x1ad   :  { %v357_v15 = vadd.f32 %v5341_v3, %v306_v11  ;;  %v371_v16 = vadd.f32 %v5344_v4, %v348_v12  ;;  %v308_v17 = vpop.f32.mrb[3].mxu0  ;;  %v4401_v18 = vpop.f32.mrb[3].mxu1 }
 0x1ae   :  { %v364_v20 = vadd.f32 %v5347_v8, %v308_v17 }
 0x1af   :  { %v358_v21 = vpack.c.bf16 %v357_v15, %v356_v13  ;;  %v5355_v22 = vpack.c.bf16 %v371_v16, %v370_v14 }
 0x1b0   :  { %v365_v23 = vpack.c.bf16 %v364_v20, %v363_v19 }
 0x1b2   :  { %v378_v24 = vsel %vm373_vm1, %v365_v23, 0 }
 0x1b3   :  { %4403 = vmatpush3.bf16.xpose.msra.mxu1 %v378_v24 }
 0x1b4   :  { %4408 = vmatprep.subr.bf16.mxu1 %v5128_v7 }
 0x1ba   :  { %4405 = vmatmul.mubr.msk.bf16.vlgmr.msra.gmra.mrb[4].mxu1 %vm373_vm1, %v358_v21 }
 0x1bb   :  { %4409 = vmatpush3.bf16.msra.mxu1 %v5355_v22  ;;  %4410 = vmatprep.mubr.msk.bf16.mxu1 %vm5130_vm0, %v5128_v7 }
 0x1bc   :  { %4414 = vmatprep.subr.bf16.mxu1 %v5128_v7 }
 0x28d   :  { %v414_v27 = vpop.f32.mrb[4].mxu1 }
 0x28e   :  { %v415_v29 = vadd.f32 %v414_v27, %v5367_v25  ;;  %v4406_v30 = vpop.f32.mrb[5].mxu1 }
 0x28f   :  { %v417_v31 = vpop.f32.mrb[6].mxu1 }
 0x290   :  { %v418_v32 = vadd.f32 %v417_v31, %v5372_v28  ;;  %v4407_v33 = vpop.f32.mrb[7].mxu1  ;;  %v422_v34 = vsel %vm421_vm2, %v415_v29, -inf }
 0x291   :  { %423 = vmax.xlane.f32.xlu0 %v422_v34 }
 0x292   :  { %v425_v35 = vsel %vm421_vm2, %v418_v32, -inf }
 0x293   :  { %426 = vmax.xlane.f32.xlu1 %v425_v35 }
 0x31e   :  { %v424_v36 = vpop.xlane.xlu0 %423 }
 0x31f   :  { %v428_v37 = vsub.f32 %v415_v29, %v424_v36 }
 0x320   :  { %v427_v38 = vpop.xlane.xlu1 %426 }
 0x321   :  { %v430_v39 = vmul.f32 1.442695, %v428_v37  ;;  %v429_v40 = vsub.f32 %v418_v32, %v427_v38 }
 0x323   :  { %4902 = vpow2.f32 %v430_v39  ;;  %v432_v41 = vmul.f32 1.442695, %v429_v40 }
 0x325   :  { %4904 = vpow2.f32 %v432_v41 }
 0x32d   :  { %v4903_v42 = vpop.eup %4902 }
 0x32e   :  { %v434_v43 = vsel %vm421_vm2, %v4903_v42, 0.0 }
 0x32f   :  { %v4905_v44 = vpop.eup %4904  ;;  %435 = vadd.xlane.f32.xlu0 %v434_v43 }
 0x330   :  { %v437_v45 = vsel %vm421_vm2, %v4905_v44, 0.0 }
 0x331   :  { %438 = vadd.xlane.f32.xlu1 %v437_v45 }
 0x342   :  { %492 = vrot.lane.b32.xlu1 %v358_v21, %s5131_s22 }
 0x345   :  { %495 = vrot.lane.b32.xlu0 %v365_v23, %s5131_s22 }
 0x346   :  { %628 = vrot.lane.b32.xlu1 %v365_v23, %s5126_s2 }
 0x349   :  { %760 = vrot.lane.b32.xlu0 %v365_v23, %s5132_s23 }
 0x34a   :  { %626 = vrot.lane.b32.xlu1 %v358_v21, %s5126_s2 }
 0x34e   :  { %758 = vrot.lane.b32.xlu1 %v358_v21, %s5132_s23 }
 0x3bc   :  { %v436_v46 = vpop.xlane.xlu0 %435 }
 0x3bd   :  { %4906 = vrcp.f32 %v436_v46 }
 0x3be   :  { %v439_v50 = vpop.xlane.xlu1 %438 }
 0x3bf   :  { %4908 = vrcp.f32 %v439_v50 }
 0x3c0   :  { %v496_v52 = vpop.permute.xlu0 %495 }
 0x3c1   :  { %v501_v1 = vsel %vm373_vm1, %v496_v52, 0 }
 0x3c2   :  { %v493_v51 = vpop.permute.xlu1 %492 }
 0x3c4   :  { %v761_v60 = vpop.permute.xlu0 %760 }
 0x3c5   :  { %v766_v5 = vsel %vm373_vm1, %v761_v60, 0 }
 0x3c6   :  { %v629_v53 = vpop.permute.xlu1 %628 }
 0x3c7   :  { %v4907_v55 = vpop.eup %4906  ;;  %v634_v56 = vsel %vm373_vm1, %v629_v53, 0 }
 0x3c8   :  { %4427 = vmatpush3.bf16.xpose.msra.mxu0 %v634_v56  ;;  %v442_v58 = vmul.f32 %v4907_v55, %v4903_v42 }
 0x3c9   :  { %v4909_v57 = vpop.eup %4908  ;;  %4438 = vmatprep.subr.bf16.mxu0 %v5128_v7 }
 0x3ca   :  { %v443_v59 = vmul.f32 %v4909_v57, %v4905_v44  ;;  %v627_v2 = vpop.permute.xlu1 %626 }
 0x3cc   :  { %v444_v63 = vpack.c.bf16 %v443_v59, %v442_v58 }
 0x3ce   :  { %4411 = vmatmul.mubr.msk.bf16.vlgmr.msra.gmra.mrb[8].mxu1 %vm421_vm2, %v444_v63  ;;  %v759_v6 = vpop.permute.xlu1 %758 }
 0x3cf   :  { %4415 = vmatpush3.bf16.xpose.msra.mxu1 %v501_v1  ;;  %4429 = vmatmul.mubr.msk.bf16.vlgmr.msra.gmra.mrb[4].mxu0 %vm373_vm1, %v627_v2 }
 0x3d0   :  { %4439 = vmatpush3.bf16.xpose.msra.mxu0 %v766_v5  ;;  %4416 = vmatprep.mubr.msk.bf16.mxu1 %vm5130_vm0, %v5128_v7 }
 0x3d1   :  { %4440 = vmatprep.mubr.msk.bf16.mxu0 %vm5130_vm0, %v5128_v7  ;;  %4420 = vmatprep.subr.bf16.mxu1 %v5128_v7 }
 0x3d2   :  { %4450 = vmatprep.subr.bf16.mxu0 %v5128_v7 }
 0x3d6   :  { %4417 = vmatmul.mubr.msk.bf16.vlgmr.msra.gmra.mrb[12].mxu1 %vm373_vm1, %v493_v51 }
 0x3d7   :  { %4441 = vmatmul.mubr.msk.bf16.vlgmr.msra.gmra.mrb[8].mxu0 %vm373_vm1, %v759_v6  ;;  %4422 = vmatprep.mubr.msk.bf16.mxu1 %vm5130_vm0, %v5128_v7 }
 0x3d8   :  { %4466 = vmatprep.mubr.msk.bf16.mxu0 %vm5130_vm0, %v5128_v7 }
 0x4a1   :  { %v482_v9 = vpop.f32.mrb[8].mxu1 }
 0x4a2   :  { %489 = vst.msk [vmem:[#allocation2] sm:$0xff] %vm373_vm1, %v482_v9  ;;  %v4412_v10 = vpop.f32.mrb[9].mxu1  ;;  %v670_v11 = vpop.f32.mrb[4].mxu0 }
 0x4a3   :  { %v485_v12 = vpop.f32.mrb[10].mxu1  ;;  %v4430_v13 = vpop.f32.mrb[5].mxu0  ;;  %v671_v24 = vadd.f32 %v670_v11, %v5367_v25 }
 0x4a4   :  { %490 = vst.msk [vmem:[#allocation2 + $0x8] sm:$0xff] %vm373_vm1, %v485_v12  ;;  %v4413_v14 = vpop.f32.mrb[11].mxu1  ;;  %v673_v15 = vpop.f32.mrb[6].mxu0 }
 0x4a5   :  { %v4431_v16 = vpop.f32.mrb[7].mxu0  ;;  %v674_v35 = vadd.f32 %v673_v15, %v5372_v28  ;;  %v677_v36 = vsel %vm421_vm2, %v671_v24, -inf }
 0x4a7   :  { %v680_v39 = vsel %vm421_vm2, %v674_v35, -inf }
 0x4a9   :  { %v537_v17 = vpop.f32.mrb[12].mxu1 }
 0x4aa   :  { %v538_v18 = vadd.f32 %v537_v17, %v5367_v25  ;;  %v4418_v19 = vpop.f32.mrb[13].mxu1  ;;  %v802_v20 = vpop.f32.mrb[8].mxu0 }
 0x4ab   :  { %v540_v21 = vpop.f32.mrb[14].mxu1  ;;  %v4442_v23 = vpop.f32.mrb[9].mxu0  ;;  %v803_v38 = vadd.f32 %v802_v20, %v5367_v25 }
 0x4ac   :  { %v541_v27 = vadd.f32 %v540_v21, %v5372_v28  ;;  %v4419_v29 = vpop.f32.mrb[15].mxu1  ;;  %v805_v30 = vpop.f32.mrb[10].mxu0  ;;  %v544_v31 = vsel %vm421_vm2, %v538_v18, -inf }
 0x4ad   :  { %545 = vmax.xlane.f32.xlu0 %v544_v31  ;;  %v4443_v32 = vpop.f32.mrb[11].mxu0  ;;  %v806_v33 = vadd.f32 %v805_v30, %v5372_v28  ;;  %v809_v40 = vsel %vm421_vm2, %v803_v38, -inf }
 0x4ae   :  { %v547_v34 = vsel %vm421_vm2, %v541_v27, -inf }
 0x4af   :  { %548 = vmax.xlane.f32.xlu1 %v547_v34  ;;  %v812_v37 = vsel %vm421_vm2, %v806_v33, -inf }
 0x4b1   :  { %678 = vmax.xlane.f32.xlu0 %v677_v36 }
 0x4b3   :  { %813 = vmax.xlane.f32.xlu1 %v812_v37 }
 0x4b5   :  { %681 = vmax.xlane.f32.xlu0 %v680_v39 }
 0x4b9   :  { %810 = vmax.xlane.f32.xlu0 %v809_v40 }
 0x53a   :  { %v546_v41 = vpop.xlane.xlu0 %545 }
 0x53b   :  { %v550_v52 = vsub.f32 %v538_v18, %v546_v41 }
 0x53c   :  { %v549_v42 = vpop.xlane.xlu1 %548 }
 0x53d   :  { %v551_v53 = vsub.f32 %v541_v27, %v549_v42  ;;  %v552_v58 = vmul.f32 1.442695, %v550_v52 }
 0x53e   :  { %v679_v43 = vpop.xlane.xlu0 %678 }
 0x53f   :  { %v683_v44 = vsub.f32 %v671_v24, %v679_v43  ;;  %v554_v59 = vmul.f32 1.442695, %v551_v53  ;;  %v4690_v43 = vld [vmem:[#allocation6] sm:$0xff]  }
 0x540   :  { %v814_v45 = vpop.xlane.xlu1 %813  ;;  %4451 = vmatpush3.bf16.msra.mxu0 %v4690_v43  ;;  %v4716_v43 = vld [vmem:[%s6352_s6 + $0x60] ss:$8 sps:$4 sm:$0xff]  }
 0x541   :  { %v685_v28 = vmul.f32 1.442695, %v683_v44  ;;  %v816_v46 = vsub.f32 %v806_v33, %v814_v45  ;;  %4452 = vmatprep.subr.bf16.mxu0 %v5128_v7  ;;  %v4691_v44 = vld [vmem:[#allocation6 + $0x8] sm:$0xff]   ;;  %v4692_v45 = vld [vmem:[#allocation6 + $0x10] sm:$0xff]  }
 0x542   :  { %v682_v50 = vpop.xlane.xlu0 %681 }
 0x543   :  { %4910 = vpow2.f32 %v685_v28  ;;  %v684_v51 = vsub.f32 %v674_v35, %v682_v50  ;;  %v819_v55 = vmul.f32 1.442695, %v816_v46  ;;  %v4693_v28 = vld [vmem:[#allocation6 + $0x18] sm:$0xff]   ;;  %v4694_v46 = vld [vmem:[#allocation6 + $0x20] sm:$0xff]  }
 0x544   :  { %4453 = vmatpush3.bf16.msra.mxu0 %v4691_v44  ;;  %v4721_v44 = vld [vmem:[%s6352_s6 + $0x74] ss:$8 sps:$4 sm:$0xff]  }
 0x545   :  { %v687_v25 = vmul.f32 1.442695, %v684_v51  ;;  %4454 = vmatprep.subr.bf16.mxu0 %v5128_v7 }
 0x546   :  { %v811_v56 = vpop.xlane.xlu0 %810 }
 0x547   :  { %4912 = vpow2.f32 %v687_v25  ;;  %v815_v57 = vsub.f32 %v803_v38, %v811_v56  ;;  %v4696_v25 = vld [vmem:[#allocation6 + $0x30] sm:$0xff]  }
 0x548   :  { %4914 = vpow2.f32 %v819_v55  ;;  %4455 = vmatpush3.bf16.msra.mxu0 %v4692_v45  ;;  %v4695_v55 = vld [vmem:[#allocation6 + $0x28] sm:$0xff]   ;;  %v4719_v45 = vld [vmem:[%s6352_s6 + $0x70] ss:$8 sps:$4 sm:$0xff]  }
 0x549   :  { %v817_v60 = vmul.f32 1.442695, %v815_v57  ;;  %4456 = vmatprep.subr.bf16.mxu0 %v5128_v7 }
 0x54b   :  { %4916 = vpow2.f32 %v817_v60 }
 0x54c   :  { %4918 = vpow2.f32 %v552_v58  ;;  %4457 = vmatpush3.bf16.msra.mxu0 %v4693_v28  ;;  %v4722_v28 = vld [vmem:[%s6353_s7 + $0x40] sm:$0xff]  }
 0x54d   :  { %v4911_v63 = vpop.eup %4910  ;;  %4920 = vpow2.f32 %v554_v59  ;;  %4458 = vmatprep.subr.bf16.mxu0 %v5128_v7  ;;  %v4697_v59 = vld [vmem:[#allocation6 + $0x38] sm:$0xff]  }
 0x54e   :  { %v689_v1 = vsel %vm421_vm2, %v4911_v63, 0.0 }
 0x54f   :  { %690 = vadd.xlane.f32.xlu0 %v689_v1 }
 0x550   :  { %4459 = vmatpush3.bf16.msra.mxu0 %v4694_v46  ;;  %v4723_v46 = vld [vmem:[%s6353_s7] sm:$0xff]  }
 0x551   :  { %v4913_v2 = vpop.eup %4912  ;;  %4460 = vmatprep.subr.bf16.mxu0 %v5128_v7 }
 0x552   :  { %v692_v5 = vsel %vm421_vm2, %v4913_v2, 0.0  ;;  %v4915_v6 = vpop.eup %4914 }
 0x553   :  { %693 = vadd.xlane.f32.xlu1 %v692_v5  ;;  %v824_v11 = vsel %vm421_vm2, %v4915_v6, 0.0 }
 0x554   :  { %4461 = vmatpush3.bf16.msra.mxu0 %v4695_v55 }
 0x555   :  { %v4917_v9 = vpop.eup %4916  ;;  %4462 = vmatprep.subr.bf16.mxu0 %v5128_v7 }
 0x556   :  { %v4919_v10 = vpop.eup %4918  ;;  %v821_v12 = vsel %vm421_vm2, %v4917_v9, 0.0 }
 0x557   :  { %v4921_v13 = vpop.eup %4920  ;;  %825 = vadd.xlane.f32.xlu1 %v824_v11  ;;  %822 = vadd.xlane.f32.xlu0 %v821_v12  ;;  %v556_v15 = vsel %vm421_vm2, %v4919_v10, 0.0 }
 0x558   :  { %v559_v14 = vsel %vm421_vm2, %v4921_v13, 0.0  ;;  %4463 = vmatpush3.bf16.msra.mxu0 %v4696_v25 }
 0x559   :  { %4464 = vmatprep.subr.bf16.mxu0 %v5128_v7 }
 0x55b   :  { %560 = vadd.xlane.f32.xlu1 %v559_v14  ;;  %557 = vadd.xlane.f32.xlu0 %v556_v15 }
 0x55c   :  { %4465 = vmatpush3.bf16.msra.mxu0 %v4697_v59 }
 0x55d   :  { %4248 = vmatprep.subr.bf16.mxu0 %v4722_v28 }
 0x56c   :  { %700 = vrot.lane.b32.xlu1 %v5355_v22, %s5126_s2 }
 0x570   :  { %832 = vrot.lane.b32.xlu1 %v5355_v22, %s5132_s23 }
 0x571   :  { %568 = vrot.lane.b32.xlu0 %v5355_v22, %s5131_s22 }
 0x5dc   :  { %v691_v16 = vpop.xlane.xlu0 %690 }
 0x5e0   :  { %v694_v17 = vpop.xlane.xlu1 %693 }
 0x5e4   :  { %v826_v18 = vpop.xlane.xlu1 %825  ;;  %v823_v19 = vpop.xlane.xlu0 %822 }
 0x5e8   :  { %v561_v20 = vpop.xlane.xlu1 %560  ;;  %v558_v21 = vpop.xlane.xlu0 %557 }
 0x5e9   :  { %4922 = vrcp.f32 %v561_v20 }
 0x5ea   :  { %4924 = vrcp.f32 %v558_v21 }
 0x5eb   :  { %4926 = vrcp.f32 %v694_v17  ;;  %v911_v17 = vsub.s32 5, %v5309_v47 }
 0x5ec   :  { %v569_v23 = vpop.permute.xlu0 %568  ;;  %4928 = vrcp.f32 %v691_v16  ;;  %v701_v32 = vpop.permute.xlu1 %700 }
 0x5ed   :  { %4421 = vmatpush3.bf16.msra.mxu1 %v569_v23  ;;  %4930 = vrcp.f32 %v826_v18  ;;  %v5461_v18 = vrot.slane %v5314_v49, %v911_v17 }
 0x5ee   :  { %4432 = vmatprep.subr.bf16.mxu1 %v5128_v7  ;;  %4932 = vrcp.f32 %v823_v19 }
 0x5f0   :  { %v833_v39 = vpop.permute.xlu1 %832 }
 0x5f3   :  { %v4923_v24 = vpop.eup %4922 }
 0x5f4   :  { %v4925_v27 = vpop.eup %4924  ;;  %v565_v29 = vmul.f32 %v4923_v24, %v4921_v13 }
 0x5f5   :  { %v564_v30 = vmul.f32 %v4925_v27, %v4919_v10  ;;  %v4927_v31 = vpop.eup %4926 }
 0x5f6   :  { %v4929_v33 = vpop.eup %4928  ;;  %v698_v34 = vmul.f32 %v4927_v31, %v4913_v2 }
 0x5f7   :  { %v566_v22 = vpack.c.bf16 %v565_v29, %v564_v30  ;;  %v697_v35 = vmul.f32 %v4929_v33, %v4911_v63  ;;  %v4931_v36 = vpop.eup %4930  ;;  %v4701_v33 = vld [vmem:[%s6352_s6 + $0x10] ss:$8 sps:$4 sm:$0xff]  }
 0x5f8   :  { %v4933_v38 = vpop.eup %4932  ;;  %v830_v40 = vmul.f32 %v4931_v36, %v4915_v6  ;;  %v4709_v36 = vld [vmem:[%s6352_s6 + $0x34] ss:$8 sps:$4 sm:$0xff]  }
 0x5f9   :  { %4423 = vmatmul.mubr.msk.bf16.vlgmr.msra.gmra.mrb[16].mxu1 %vm421_vm2, %v566_v22  ;;  %v699_v37 = vpack.c.bf16 %v698_v34, %v697_v35  ;;  %v829_v41 = vmul.f32 %v4933_v38, %v4917_v9  ;;  %v4706_v34 = vld [vmem:[%s6352_s6 + $0x24] ss:$8 sps:$4 sm:$0xff]   ;;  %v4704_v35 = vld [vmem:[%s6352_s6 + $0x20] ss:$8 sps:$4 sm:$0xff]  }
 0x5fa   :  { %4433 = vmatpush3.bf16.msra.mxu1 %v701_v32  ;;  %4434 = vmatprep.mubr.msk.bf16.mxu1 %vm5130_vm0, %v5128_v7  ;;  %v4703_v32 = vld [vmem:[%s6352_s6 + $0x14] ss:$8 sps:$4 sm:$0xff]   ;;  %v4712_v38 = vld [vmem:[%s6352_s6 + $0x44] ss:$8 sps:$4 sm:$0xff]  }
 0x5fb   :  { %4444 = vmatprep.subr.bf16.mxu1 %v5128_v7  ;;  %v831_v42 = vpack.c.bf16 %v830_v40, %v829_v41  ;;  %v4715_v40 = vld [vmem:[%s6352_s6 + $0x54] ss:$8 sps:$4 sm:$0xff]   ;;  %v4713_v41 = vld [vmem:[%s6352_s6 + $0x50] ss:$8 sps:$4 sm:$0xff]  }
 0x601   :  { %4435 = vmatmul.mubr.msk.bf16.vlgmr.msra.gmra.mrb[20].mxu1 %vm421_vm2, %v699_v37  ;;  %v4707_v37 = vld [vmem:[%s6352_s6 + $0x30] ss:$8 sps:$4 sm:$0xff]  }
 0x602   :  { %4445 = vmatpush3.bf16.msra.mxu1 %v833_v39  ;;  %4446 = vmatprep.mubr.msk.bf16.mxu1 %vm5130_vm0, %v5128_v7  ;;  %v4710_v39 = vld [vmem:[%s6352_s6 + $0x40] ss:$8 sps:$4 sm:$0xff]  }
 0x609   :  { %4447 = vmatmul.mubr.msk.bf16.vlgmr.msra.gmra.mrb[24].mxu1 %vm421_vm2, %v831_v42  ;;  %v4718_v42 = vld [vmem:[%s6352_s6 + $0x64] ss:$8 sps:$4 sm:$0xff]  }
 0x60a   :  { %1184 = vmatprep.mubr.bf16.mxu1 %v5129_v26 }
 0x6cc   :  { %v608_v50 = vpop.f32.mrb[16].mxu1 }
 0x6cd   :  { %617 = vrot.lane.b32.xlu1 %v608_v50, %s5132_s23  ;;  %v4424_v51 = vpop.f32.mrb[17].mxu1  ;;  %v4724_v50 = vld [vmem:[%s6353_s7 + $0x48] sm:$0xff]  }
 0x6ce   :  { %v611_v52 = vpop.f32.mrb[18].mxu1  ;;  %v4725_v51 = vld [vmem:[%s6353_s7 + $0x8] sm:$0xff]  }
 0x6cf   :  { %619 = vrot.lane.b32.xlu0 %v611_v52, %s5132_s23  ;;  %v4425_v53 = vpop.f32.mrb[19].mxu1 }
 0x6d4   :  { %v740_v56 = vpop.f32.mrb[20].mxu1 }
 0x6d5   :  { %749 = vrot.lane.b32.xlu1 %v740_v56, %s5126_s2  ;;  %v4436_v57 = vpop.f32.mrb[21].mxu1 }
 0x6d6   :  { %v743_v58 = vpop.f32.mrb[22].mxu1 }
 0x6d7   :  { %751 = vrot.lane.b32.xlu0 %v743_v58, %s5126_s2  ;;  %v4437_v60 = vpop.f32.mrb[23].mxu1 }
 0x6dc   :  { %v872_v63 = vpop.f32.mrb[24].mxu1 }
 0x6dd   :  { %881 = vrot.lane.b32.xlu1 %v872_v63, %s5131_s22  ;;  %v4448_v1 = vpop.f32.mrb[25].mxu1 }
 0x6de   :  { %v875_v2 = vpop.f32.mrb[26].mxu1 }
 0x6df   :  { %883 = vrot.lane.b32.xlu0 %v875_v2, %s5131_s22  ;;  %v4449_v5 = vpop.f32.mrb[27].mxu1 }
 0x73f   :  { %v618_v6 = vpop.permute.xlu1 %617 }
 0x740   :  { %624 = vst.msk [vmem:[#allocation2] sm:$0xff] %vm623_vm3, %v618_v6 }
 0x741   :  { %v620_v9 = vpop.permute.xlu0 %619 }
 0x742   :  { %625 = vst.msk [vmem:[#allocation2 + $0x8] sm:$0xff] %vm623_vm3, %v620_v9 }
 0x747   :  { %v750_v10 = vpop.permute.xlu1 %749 }
 0x748   :  { %756 = vst.msk [vmem:[#allocation2] sm:$0xff] %vm755_vm4, %v750_v10 }
 0x749   :  { %v752_v11 = vpop.permute.xlu0 %751 }
 0x74a   :  { %757 = vst.msk [vmem:[#allocation2 + $0x8] sm:$0xff] %vm755_vm4, %v752_v11  ;;  %v1034_v11 = vsub.s32 6, %v5309_v47 }
 0x74f   :  { %v882_v12 = vpop.permute.xlu1 %881 }
 0x750   :  { %888 = vst.msk [vmem:[#allocation2] sm:$0xff] %vm887_vm5, %v882_v12 }
 0x751   :  { %v884_v13 = vpop.permute.xlu0 %883 }
 0x752   :  { %889 = vst.msk [vmem:[#allocation2 + $0x8] sm:$0xff] %vm887_vm5, %v884_v13 }
 0x757   :  { %v890_v14 = vld [vmem:[#allocation2] sm:$0xff] }
 0x759   :  { %v891_v15 = vld [vmem:[#allocation2 + $0x8] sm:$0xff] }
 0x75a   :  { %v892_v16 = vpack.c.bf16 %v891_v15, %v890_v14  ;;  %v5540_v15 = vrot.slane %v5314_v49, %v1034_v11 }
 0x75c   :  { %4467 = vmatmul.mubr.bf16.vlgmr.msra.gmra.mrb[12].mxu0 %v892_v16  ;;  %v1040_v16 = vsub.s32 7, %v5309_v47 }
 0x75d   :  { %4249 = vmatpush3.bf16.msra.mxu0 %v4723_v46 }
 0x75e   :  { %4250 = vmatprep.subr.bf16.mxu0 %v4724_v50 }
 0x761   :  { %4251 = vmatpush3.bf16.msra.mxu0 %v4725_v51 }
 0x82f   :  { %v995_v19 = vpop.f32.mrb[12].mxu0 }
 0x830   :  { %v996_v20 = vadd.f32 %v995_v19, %v5461_v18  ;;  %v4468_v21 = vpop.f32.mrb[13].mxu0 }
 0x831   :  { %v998_v23 = vpop.f32.mrb[14].mxu0 }
 0x832   :  { %v5465_v24 = vadd.f32 %v996_v20, %v5325_v61  ;;  %v999_v27 = vadd.f32 %v998_v23, %v5461_v18  ;;  %v4469_v29 = vpop.f32.mrb[15].mxu0  ;;  %v4698_v61 = vld [vmem:[%s6352_s6] ss:$8 sps:$4 sm:$0xff]   ;;  %v5546_v23 = vrot.slane %v5314_v49, %v1040_v16  ;;  %v4727_v49 = vld [vmem:[%s6353_s7 + $0x10] sm:$0xff]  }
 0x834   :  { %v5469_v30 = vadd.f32 %v999_v27, %v5327_v62  ;;  %1004 = vadd.xlane.f32.xlu1 %v5465_v24  ;;  %v1010_v22 = vmul.f32 %v5465_v24, %v5465_v24  ;;  %v4700_v62 = vld [vmem:[%s6352_s6 + $0x4] ss:$8 sps:$4 sm:$0xff]  }
 0x835   :  { %1152 = vmatprep.subr.bf16.mxu1 %v4700_v62  ;;  %v4730_v62 = vld [vmem:[%s6353_s7 + $0x60] sm:$0xff]  }
 0x836   :  { %1006 = vadd.xlane.f32.xlu0 %v5469_v30  ;;  %v1011_v31 = vmul.f32 %v5469_v30, %v5469_v30  ;;  %1153 = vmatpush1.bf16.msra.mxu1 %v4698_v61  ;;  %v4729_v61 = vld [vmem:[%s6353_s7 + $0x18] sm:$0xff]  }
 0x837   :  { %1154 = vmatprep.subr.bf16.mxu1 %v4703_v32  ;;  %v4731_v32 = vld [vmem:[%s6353_s7 + $0x20] sm:$0xff]  }
 0x83a   :  { %1012 = vadd.xlane.f32.xlu0 %v1010_v22  ;;  %1155 = vmatpush1.bf16.msra.mxu1 %v4701_v33  ;;  %v4732_v33 = vld [vmem:[%s6353_s7 + $0x68] sm:$0xff]  }
 0x83b   :  { %1156 = vmatprep.subr.bf16.mxu1 %v4706_v34  ;;  %v4733_v34 = vld [vmem:[%s6353_s7 + $0x28] sm:$0xff]  }
 0x83e   :  { %1014 = vadd.xlane.f32.xlu0 %v1011_v31  ;;  %1157 = vmatpush1.bf16.msra.mxu1 %v4704_v35  ;;  %v4728_v31 = vld [vmem:[%s6353_s7 + $0x58] sm:$0xff]   ;;  %v4734_v35 = vld [vmem:[%s6353_s7 + $0x70] sm:$0xff]  }
 0x83f   :  { %1158 = vmatprep.subr.bf16.mxu1 %v4709_v36  ;;  %v4735_v36 = vld [vmem:[%s6353_s7 + $0x30] sm:$0xff]  }
 0x842   :  { %1159 = vmatpush1.bf16.msra.mxu1 %v4707_v37  ;;  %v4736_v37 = vld [vmem:[%s6353_s7 + $0x78] sm:$0xff]  }
 0x843   :  { %1160 = vmatprep.subr.bf16.mxu1 %v4712_v38  ;;  %v4737_v38 = vld [vmem:[%s6353_s7 + $0x38] sm:$0xff]  }
 0x846   :  { %1161 = vmatpush1.bf16.msra.mxu1 %v4710_v39  ;;  %v63_v39 = vld [vmem:[%s6349_s3] sm:$0x3] }
 0x847   :  { %1162 = vmatprep.subr.bf16.mxu1 %v4715_v40  ;;  %v5599_v40 = vrot.slane %v63_v39, %v5312_v48 }
 0x84a   :  { %1163 = vmatpush1.bf16.msra.mxu1 %v4713_v41  ;;  %v5602_v41 = vrot.slane %v63_v39, %v5320_v54  ;;  %v4748_v39 = vld [vmem:[%s6350_s4 + $0x34] ss:$12 sps:$4 sm:$0xff]  }
 0x84b   :  { %1164 = vmatprep.subr.bf16.mxu1 %v4718_v42 }
 0x84e   :  { %1165 = vmatpush1.bf16.msra.mxu1 %v4716_v43 }
 0x84f   :  { %1166 = vmatprep.subr.bf16.mxu1 %v4721_v44 }
 0x852   :  { %1167 = vmatpush1.bf16.msra.mxu1 %v4719_v45 }
 0x8c1   :  { %v1005_v52 = vpop.xlane.xlu1 %1004 }
 0x8c2   :  { %v1008_v55 = vmul.f32 0.0078125, %v1005_v52 }
 0x8c3   :  { %v1007_v53 = vpop.xlane.xlu0 %1006 }
 0x8c4   :  { %v1018_v56 = vmul.f32 %v1008_v55, %v1008_v55  ;;  %v1009_v57 = vmul.f32 0.0078125, %v1007_v53  ;;  %v1024_v12 = vsub.f32 %v5465_v24, %v1008_v55 }
 0x8c6   :  { %v1019_v63 = vmul.f32 %v1009_v57, %v1009_v57  ;;  %v1025_v17 = vsub.f32 %v5469_v30, %v1009_v57  ;;  %v4726_v30 = vld [vmem:[%s6353_s7 + $0x50] sm:$0xff]  }
 0x8c7   :  { %v1013_v25 = vpop.xlane.xlu0 %1012  ;;  %4252 = vmatprep.subr.bf16.mxu0 %v4726_v30 }
 0x8c8   :  { %v1016_v58 = vmul.f32 0.0078125, %v1013_v25  ;;  %4253 = vmatpush3.bf16.msra.mxu0 %v4727_v49 }
 0x8c9   :  { %4254 = vmatprep.subr.bf16.mxu0 %v4728_v31 }
 0x8ca   :  { %v1020_v59 = vsub.f32 %v1016_v58, %v1018_v56 }
 0x8cb   :  { %v1015_v60 = vpop.xlane.xlu0 %1014 }
 0x8cc   :  { %v1022_v1 = vmax.f32 %v1020_v59, 0.0  ;;  %v1017_v2 = vmul.f32 0.0078125, %v1015_v60  ;;  %4255 = vmatpush3.bf16.msra.mxu0 %v4729_v61 }
 0x8cd   :  { %4256 = vmatprep.subr.bf16.mxu0 %v4730_v62 }
 0x8ce   :  { %v1026_v5 = vadd.f32 1e-12, %v1022_v1  ;;  %v1021_v6 = vsub.f32 %v1017_v2, %v1019_v63 }
 0x8d0   :  { %4934 = vrsqrt.f32 %v1026_v5  ;;  %v1023_v9 = vmax.f32 %v1021_v6, 0.0  ;;  %4257 = vmatpush3.bf16.msra.mxu0 %v4731_v32 }
 0x8d1   :  { %4258 = vmatprep.subr.bf16.mxu0 %v4732_v33 }
 0x8d2   :  { %v1027_v10 = vadd.f32 1e-12, %v1023_v9 }
 0x8d4   :  { %4936 = vrsqrt.f32 %v1027_v10  ;;  %4259 = vmatpush3.bf16.msra.mxu0 %v4733_v34 }
 0x8d5   :  { %4260 = vmatprep.subr.bf16.mxu0 %v4734_v35  ;;  %v4738_v35 = vld [vmem:[%s6350_s4] ss:$12 sps:$4 sm:$0xff]  }
 0x8d8   :  { %4261 = vmatpush3.bf16.msra.mxu0 %v4735_v36  ;;  %v4744_v36 = vld [vmem:[%s6350_s4 + $0x1c] ss:$12 sps:$4 sm:$0xff]  }
 0x8d9   :  { %4262 = vmatprep.subr.bf16.mxu0 %v4736_v37  ;;  %v4742_v37 = vld [vmem:[%s6350_s4 + $0x18] ss:$12 sps:$4 sm:$0xff]  }
 0x8da   :  { %v4935_v13 = vpop.eup %4934 }
 0x8db   :  { %v1030_v14 = vmul.f32 %v4935_v13, %v1024_v12 }
 0x8dc   :  { %4263 = vmatpush3.bf16.msra.mxu0 %v4737_v38  ;;  %v4745_v38 = vld [vmem:[%s6350_s4 + $0x20] ss:$12 sps:$4 sm:$0xff]  }
 0x8dd   :  { %v1036_v21 = vmul.f32 %v5540_v15, %v1030_v14  ;;  %4470 = vmatprep.subr.bf16.mxu0 %v5128_v7 }
 0x8de   :  { %v4937_v19 = vpop.eup %4936 }
 0x8df   :  { %v1031_v20 = vmul.f32 %v4937_v19, %v1025_v17  ;;  %v5550_v24 = vadd.f32 %v5546_v23, %v1036_v21  ;;  %v5610_v19 = vld [vmem:[#allocation3 + $0x8] sm:$0xff] }
 0x8e1   :  { %v1037_v27 = vmul.f32 %v5540_v15, %v1031_v20  ;;  %v5614_v20 = vrot.slane %v5610_v19, %v5312_v48 }
 0x8e3   :  { %v5553_v29 = vadd.f32 %v5546_v23, %v1037_v27 }
 0x8e5   :  { %v1044_v22 = vpack.c.bf16 %v5553_v29, %v5550_v24 }
 0x8e7   :  { %1185 = vmatmul.mubr.bf16.vlgmr.msra.gmra.mrb[28].mxu1 %v1044_v22 }
 0x8e8   :  { %1625 = vmatprep.mubr.bf16.mxu1 %v5129_v26 }
 0x9ba   :  { %v1186_v42 = vpop.f32.mrb[28].mxu1 }
 0x9bb   :  { %v1187_v43 = vadd.f32 %v1186_v42, %v5599_v40  ;;  %v1188_v44 = vpop.f32.mrb[29].mxu1  ;;  %v4746_v42 = vld [vmem:[%s6350_s4 + $0x30] ss:$12 sps:$4 sm:$0xff]  }
 0x9bc   :  { %v1189_v45 = vadd.f32 %v1188_v44, %v5602_v41  ;;  %v1190_v28 = vpop.f32.mrb[30].mxu1  ;;  %v4752_v44 = vld [vmem:[%s6350_s4 + $0x4c] ss:$12 sps:$4 sm:$0xff]  }
 0x9bd   :  { %v1199_v46 = vmul.f32 0.70710677, %v1187_v43  ;;  %v1191_v50 = vadd.f32 %v1190_v28, %v5599_v40  ;;  %v1192_v51 = vpop.f32.mrb[31].mxu1  ;;  %v1195_v1 = vmul.f32 0.5, %v1187_v43  ;;  %v4749_v43 = vld [vmem:[%s6350_s4 + $0x38] ss:$12 sps:$4 sm:$0xff]  }
 0x9be   :  { %v1200_v52 = vmul.f32 0.70710677, %v1189_v45  ;;  %v1193_v53 = vadd.f32 %v1192_v51, %v5602_v41  ;;  %v1196_v6 = vmul.f32 0.5, %v1189_v45  ;;  %v4750_v45 = vld [vmem:[%s6350_s4 + $0x48] ss:$12 sps:$4 sm:$0xff]  }
 0x9bf   :  { %4938 = verf.f32 %v1199_v46  ;;  %v1201_v55 = vmul.f32 0.70710677, %v1191_v50  ;;  %v1197_v2 = vmul.f32 0.5, %v1191_v50  ;;  %v4753_v28 = vld [vmem:[%s6350_s4 + $0x50] ss:$12 sps:$4 sm:$0xff]  }
 0x9c0   :  { %4940 = verf.f32 %v1200_v52  ;;  %v1202_v25 = vmul.f32 0.70710677, %v1193_v53  ;;  %v1198_v9 = vmul.f32 0.5, %v1193_v53  ;;  %v4756_v46 = vld [vmem:[%s6350_s4 + $0x64] ss:$12 sps:$4 sm:$0xff]  }
 0x9c1   :  { %4942 = verf.f32 %v1201_v55  ;;  %v4754_v50 = vld [vmem:[%s6350_s4 + $0x60] ss:$12 sps:$4 sm:$0xff]   ;;  %v4757_v51 = vld [vmem:[%s6350_s4 + $0x68] ss:$12 sps:$4 sm:$0xff]   ;;  %v4758_v53 = vld [vmem:[%s6350_s4 + $0x78] ss:$12 sps:$4 sm:$0xff]  }
 0x9c2   :  { %4944 = verf.f32 %v1202_v25  ;;  %v4760_v52 = vld [vmem:[%s6350_s4 + $0x7c] ss:$12 sps:$4 sm:$0xff]   ;;  %v4761_v55 = vld [vmem:[%s6350_s4 + $0x80] ss:$12 sps:$4 sm:$0xff]  }
 0x9c3   :  { %v4764_v25 = vld [vmem:[%s6350_s4 + $0x94] ss:$12 sps:$4 sm:$0xff]  }
 0x9c9   :  { %v4939_v56 = vpop.eup %4938 }
 0x9ca   :  { %v4941_v57 = vpop.eup %4940  ;;  %v1207_v58 = vadd.f32 1.0, %v4939_v56  ;;  %v4762_v56 = vld [vmem:[%s6350_s4 + $0x90] ss:$12 sps:$4 sm:$0xff]  }
 0x9cb   :  { %v4943_v59 = vpop.eup %4942  ;;  %v1208_v60 = vadd.f32 1.0, %v4941_v57  ;;  %v4765_v57 = vld [vmem:[%s6350_s4 + $0x98] ss:$12 sps:$4 sm:$0xff]  }
 0x9cc   :  { %v4945_v63 = vpop.eup %4944  ;;  %v1209_v5 = vadd.f32 1.0, %v4943_v59  ;;  %v1211_v11 = vmul.f32 %v1207_v58, %v1195_v1  ;;  %v4768_v58 = vld [vmem:[%s6350_s4 + $0xac] ss:$12 sps:$4 sm:$0xff]   ;;  %v4766_v59 = vld [vmem:[%s6350_s4 + $0xa8] ss:$12 sps:$4 sm:$0xff]  }
 0x9cd   :  { %v1210_v10 = vadd.f32 1.0, %v4945_v63  ;;  %v1212_v13 = vmul.f32 %v1208_v60, %v1196_v6  ;;  %v4769_v60 = vld [vmem:[%s6350_s4 + $0xb0] ss:$12 sps:$4 sm:$0xff]  }
 0x9ce   :  { %v1213_v12 = vmul.f32 %v1209_v5, %v1197_v2 }
 0x9cf   :  { %v1214_v14 = vmul.f32 %v1210_v10, %v1198_v9 }
 0x9d0   :  { %v1215_v16 = vpack.c.bf16 %v1213_v12, %v1211_v11 }
 0x9d1   :  { %v1216_v17 = vpack.c.bf16 %v1214_v14, %v1212_v13 }
 0x9d3   :  { %1381 = vmatprep.mubr.bf16.mxu0 %v1216_v17 }
 0x9d4   :  { %1382 = vmatmul.mubr.bf16.vlgmr.msra.gmra.mrb[16].mxu0 %v1215_v16 }
 0x9d5   :  { %4486 = vmatprep.mubr.msk.bf16.mxu0 %vm5130_vm0, %v5128_v7 }
 0xaa7   :  { %v4264_v21 = vpop.f32.mrb[16].mxu0 }
 0xaa8   :  { %v4265_v27 = vpop.f32.mrb[17].mxu0 }
 0xaa9   :  { %v4266_v22 = vadd.f32 %v4265_v27, %v4264_v21  ;;  %v4267_v30 = vpop.f32.mrb[18].mxu0 }
 0xaaa   :  { %v4268_v49 = vpop.f32.mrb[19].mxu0 }
 0xaab   :  { %v1384_v31 = vadd.f32 %v4266_v22, %v5614_v20  ;;  %v4269_v61 = vadd.f32 %v4268_v49, %v4267_v30  ;;  %v5713_v30 = vrot.slane %v5610_v19, %v5320_v54 }
 0xaad   :  { %v1387_v62 = vadd.f32 %v4269_v61, %v5614_v20  ;;  %v5619_v32 = vadd.f32 %v1384_v31, %v5550_v24  ;;  %v4740_v24 = vld [vmem:[%s6350_s4 + $0x4] ss:$12 sps:$4 sm:$0xff]  }
 0xaae   :  { %1593 = vmatprep.subr.bf16.mxu1 %v4740_v24 }
 0xaaf   :  { %1392 = vadd.xlane.f32.xlu1 %v5619_v32  ;;  %v5623_v33 = vadd.f32 %v1387_v62, %v5553_v29  ;;  %v1398_v48 = vmul.f32 %v5619_v32, %v5619_v32  ;;  %v4741_v29 = vld [vmem:[%s6350_s4 + $0x8] ss:$12 sps:$4 sm:$0xff]   ;;  %1594 = vmatpush1.bf16.msra.mxu1 %v4738_v35 }
 0xab0   :  { %4471 = vmatpush3.bf16.msra.mxu0 %v4741_v29  ;;  %1595 = vmatprep.subr.bf16.mxu1 %v4744_v36 }
 0xab1   :  { %1394 = vadd.xlane.f32.xlu0 %v5623_v33  ;;  %v1399_v34 = vmul.f32 %v5623_v33, %v5623_v33  ;;  %4472 = vmatprep.subr.bf16.mxu0 %v5128_v7 }
 0xab3   :  { %1400 = vadd.xlane.f32.xlu1 %v1398_v48  ;;  %1596 = vmatpush1.bf16.msra.mxu1 %v4742_v37 }
 0xab4   :  { %4473 = vmatpush3.bf16.msra.mxu0 %v4745_v38  ;;  %1597 = vmatprep.subr.bf16.mxu1 %v4748_v39 }
 0xab5   :  { %1402 = vadd.xlane.f32.xlu0 %v1399_v34  ;;  %4474 = vmatprep.subr.bf16.mxu0 %v5128_v7  ;;  %v5720_v34 = vrot.slane %v5610_v19, %v354_v0 }
 0xab7   :  { %1598 = vmatpush1.bf16.msra.mxu1 %v4746_v42 }
 0xab8   :  { %4475 = vmatpush3.bf16.msra.mxu0 %v4749_v43  ;;  %1599 = vmatprep.subr.bf16.mxu1 %v4752_v44 }
 0xab9   :  { %4476 = vmatprep.subr.bf16.mxu0 %v5128_v7 }
 0xabb   :  { %1600 = vmatpush1.bf16.msra.mxu1 %v4750_v45 }
 0xabc   :  { %4477 = vmatpush3.bf16.msra.mxu0 %v4753_v28  ;;  %1601 = vmatprep.subr.bf16.mxu1 %v4756_v46 }
 0xabd   :  { %4478 = vmatprep.subr.bf16.mxu0 %v5128_v7 }
 0xabf   :  { %1602 = vmatpush1.bf16.msra.mxu1 %v4754_v50 }
 0xac0   :  { %4479 = vmatpush3.bf16.msra.mxu0 %v4757_v51  ;;  %1603 = vmatprep.subr.bf16.mxu1 %v4760_v52 }
 0xac1   :  { %4480 = vmatprep.subr.bf16.mxu0 %v5128_v7 }
 0xac3   :  { %1604 = vmatpush1.bf16.msra.mxu1 %v4758_v53 }
 0xac4   :  { %4481 = vmatpush3.bf16.msra.mxu0 %v4761_v55  ;;  %1605 = vmatprep.subr.bf16.mxu1 %v4764_v25 }
 0xac5   :  { %4482 = vmatprep.subr.bf16.mxu0 %v5128_v7 }
 0xac7   :  { %1606 = vmatpush1.bf16.msra.mxu1 %v4762_v56  ;;  %v5754_v56 = vld [vmem:[%s6347_s1] sm:$0xff] }
 0xac8   :  { %4483 = vmatpush3.bf16.msra.mxu0 %v4765_v57  ;;  %1607 = vmatprep.subr.bf16.mxu1 %v4768_v58 }
 0xac9   :  { %4484 = vmatprep.subr.bf16.mxu0 %v5128_v7 }
 0xacb   :  { %1608 = vmatpush1.bf16.msra.mxu1 %v4766_v59 }
 0xacc   :  { %4485 = vmatpush3.bf16.msra.mxu0 %v4769_v60  ;;  %4490 = vmatprep.subr.bf16.mxu1 %v5128_v7  ;;  %v5760_v60 = vld [vmem:[%s6347_s1 + $0x8] sm:$0xff] }
 0xacd   :  { %4514 = vmatprep.subr.bf16.mxu0 %v5128_v7 }
 0xb3c   :  { %v1393_v63 = vpop.xlane.xlu1 %1392 }
 0xb3d   :  { %v1396_v1 = vmul.f32 0.0078125, %v1393_v63 }
 0xb3e   :  { %v1395_v2 = vpop.xlane.xlu0 %1394 }
 0xb3f   :  { %v1397_v5 = vmul.f32 0.0078125, %v1395_v2  ;;  %v1406_v9 = vmul.f32 %v1396_v1, %v1396_v1  ;;  %v1412_v49 = vsub.f32 %v5619_v32, %v1396_v1 }
 0xb40   :  { %v1401_v6 = vpop.xlane.xlu1 %1400 }
 0xb41   :  { %v1404_v10 = vmul.f32 0.0078125, %v1401_v6  ;;  %v1407_v12 = vmul.f32 %v1397_v5, %v1397_v5  ;;  %v1413_v61 = vsub.f32 %v5623_v33, %v1397_v5 }
 0xb42   :  { %v1403_v11 = vpop.xlane.xlu0 %1402 }
 0xb43   :  { %v1408_v13 = vsub.f32 %v1404_v10, %v1406_v9  ;;  %v1405_v14 = vmul.f32 0.0078125, %v1403_v11 }
 0xb45   :  { %v1410_v16 = vmax.f32 %v1408_v13, 0.0  ;;  %v1409_v17 = vsub.f32 %v1405_v14, %v1407_v12 }
 0xb47   :  { %v1414_v21 = vadd.f32 1e-12, %v1410_v16  ;;  %v1411_v27 = vmax.f32 %v1409_v17, 0.0 }
 0xb49   :  { %4946 = vrsqrt.f32 %v1414_v21  ;;  %v1415_v22 = vadd.f32 1e-12, %v1411_v27 }
 0xb4b   :  { %4948 = vrsqrt.f32 %v1415_v22 }
 0xb53   :  { %v4947_v31 = vpop.eup %4946 }
 0xb54   :  { %v1418_v62 = vmul.f32 %v4947_v31, %v1412_v49 }
 0xb55   :  { %v4949_v48 = vpop.eup %4948 }
 0xb56   :  { %v1419_v24 = vmul.f32 %v4949_v48, %v1413_v61  ;;  %v1424_v35 = vmul.f32 %v5713_v30, %v1418_v62 }
 0xb58   :  { %v1425_v29 = vmul.f32 %v5713_v30, %v1419_v24  ;;  %v5725_v54 = vadd.f32 %v5720_v34, %v1424_v35 }
 0xb5a   :  { %v5728_v32 = vadd.f32 %v5720_v34, %v1425_v29 }
 0xb5c   :  { %v1432_v33 = vpack.c.bf16 %v5728_v32, %v5725_v54 }
 0xb5e   :  { %1626 = vmatmul.mubr.bf16.vlgmr.msra.gmra.mrb[32].mxu1 %v1432_v33  ;;  %4487 = vmatmul.mubr.bf16.vlgmr.msra.gmra.mrb[20].mxu0 %v1432_v33 }
 0xb5f   :  { %4492 = vmatprep.mubr.msk.bf16.mxu1 %vm5130_vm0, %v5128_v7  ;;  %4516 = vmatprep.mubr.msk.bf16.mxu0 %vm5130_vm0, %v5128_v7 }
 0xc31   :  { %v1627_v47 = vpop.f32.mrb[32].mxu1  ;;  %v1670_v0 = vpop.f32.mrb[20].mxu0 }
 0xc32   :  { %v1629_v19 = vpop.f32.mrb[33].mxu1  ;;  %v4488_v36 = vpop.f32.mrb[21].mxu0  ;;  %v1677_v39 = vadd.f32 %v1627_v47, %v5341_v3  ;;  %v1683_v42 = vadd.f32 %v1670_v0, %v5344_v4 }
 0xc33   :  { %v1631_v37 = vpop.f32.mrb[34].mxu1  ;;  %v1673_v38 = vpop.f32.mrb[22].mxu0  ;;  %v1680_v46 = vadd.f32 %v1629_v19, %v5347_v8 }
 0xc34   :  { %v1678_v43 = vadd.f32 %v1631_v37, %v5341_v3  ;;  %v1684_v44 = vadd.f32 %v1673_v38, %v5344_v4  ;;  %v1633_v45 = vpop.f32.mrb[35].mxu1  ;;  %v4489_v28 = vpop.f32.mrb[23].mxu0 }
 0xc35   :  { %v1681_v50 = vadd.f32 %v1633_v45, %v5347_v8 }
 0xc36   :  { %v1679_v51 = vpack.c.bf16 %v1678_v43, %v1677_v39  ;;  %v5742_v52 = vpack.c.bf16 %v1684_v44, %v1683_v42 }
 0xc37   :  { %v1682_v53 = vpack.c.bf16 %v1681_v50, %v1680_v46 }
 0xc39   :  { %v1690_v55 = vsel %vm373_vm1, %v1682_v53, 0 }
 0xc3a   :  { %4491 = vmatpush3.bf16.xpose.msra.mxu1 %v1690_v55 }
 0xc3b   :  { %4496 = vmatprep.subr.bf16.mxu1 %v5128_v7 }
 0xc41   :  { %4493 = vmatmul.mubr.msk.bf16.vlgmr.msra.gmra.mrb[36].mxu1 %vm373_vm1, %v1679_v51 }
 0xc42   :  { %4497 = vmatpush3.bf16.msra.mxu1 %v5742_v52  ;;  %4498 = vmatprep.mubr.msk.bf16.mxu1 %vm5130_vm0, %v5128_v7 }
 0xc43   :  { %4502 = vmatprep.subr.bf16.mxu1 %v5128_v7 }
 0xd14   :  { %v1726_v25 = vpop.f32.mrb[36].mxu1 }
 0xd15   :  { %v1727_v57 = vadd.f32 %v5754_v56, %v1726_v25  ;;  %v4494_v58 = vpop.f32.mrb[37].mxu1 }
 0xd16   :  { %v1729_v59 = vpop.f32.mrb[38].mxu1 }
 0xd17   :  { %v1730_v63 = vadd.f32 %v5760_v60, %v1729_v59  ;;  %v4495_v1 = vpop.f32.mrb[39].mxu1  ;;  %v1733_v2 = vsel %vm421_vm2, %v1727_v57, -inf }
 0xd18   :  { %1734 = vmax.xlane.f32.xlu1 %v1733_v2 }
 0xd19   :  { %v1736_v5 = vsel %vm421_vm2, %v1730_v63, -inf }
 0xd1a   :  { %1737 = vmax.xlane.f32.xlu0 %v1736_v5 }
 0xda5   :  { %v1735_v6 = vpop.xlane.xlu1 %1734 }
 0xda6   :  { %v1739_v9 = vsub.f32 %v1727_v57, %v1735_v6 }
 0xda7   :  { %v1738_v10 = vpop.xlane.xlu0 %1737 }
 0xda8   :  { %v1741_v11 = vmul.f32 1.442695, %v1739_v9  ;;  %v1740_v12 = vsub.f32 %v1730_v63, %v1738_v10 }
 0xdaa   :  { %4950 = vpow2.f32 %v1741_v11  ;;  %v1743_v13 = vmul.f32 1.442695, %v1740_v12 }
 0xdac   :  { %4952 = vpow2.f32 %v1743_v13 }
 0xdb4   :  { %v4951_v14 = vpop.eup %4950 }
 0xdb5   :  { %v1745_v16 = vsel %vm421_vm2, %v4951_v14, 0.0 }
 0xdb6   :  { %v4953_v17 = vpop.eup %4952  ;;  %1746 = vadd.xlane.f32.xlu1 %v1745_v16 }
 0xdb7   :  { %v1748_v21 = vsel %vm421_vm2, %v4953_v17, 0.0 }
 0xdb8   :  { %1749 = vadd.xlane.f32.xlu0 %v1748_v21 }
 0xdc7   :  { %1806 = vrot.lane.b32.xlu1 %v1682_v53, %s5131_s22 }
 0xdcb   :  { %1938 = vrot.lane.b32.xlu1 %v1682_v53, %s5126_s2 }
 0xdce   :  { %1803 = vrot.lane.b32.xlu0 %v1679_v51, %s5131_s22 }
 0xdcf   :  { %1936 = vrot.lane.b32.xlu1 %v1679_v51, %s5126_s2 }
 0xdd2   :  { %2067 = vrot.lane.b32.xlu0 %v1679_v51, %s5132_s23 }
 0xdd3   :  { %2069 = vrot.lane.b32.xlu1 %v1682_v53, %s5132_s23 }
 0xe43   :  { %v1747_v27 = vpop.xlane.xlu1 %1746 }
 0xe44   :  { %4954 = vrcp.f32 %v1747_v27 }
 0xe45   :  { %v1750_v22 = vpop.xlane.xlu0 %1749 }
 0xe46   :  { %4956 = vrcp.f32 %v1750_v22 }
 0xe47   :  { %v1807_v49 = vpop.permute.xlu1 %1806 }
 0xe48   :  { %v1812_v19 = vsel %vm373_vm1, %v1807_v49, 0 }
 0xe49   :  { %v1804_v36 = vpop.permute.xlu0 %1803 }
 0xe4b   :  { %v1939_v31 = vpop.permute.xlu1 %1938 }
 0xe4c   :  { %v1944_v61 = vsel %vm373_vm1, %v1939_v31, 0 }
 0xe4d   :  { %4515 = vmatpush3.bf16.xpose.msra.mxu0 %v1944_v61  ;;  %v2068_v37 = vpop.permute.xlu0 %2067 }
 0xe4e   :  { %v4955_v62 = vpop.eup %4954  ;;  %4526 = vmatprep.subr.bf16.mxu0 %v5128_v7 }
 0xe4f   :  { %v1937_v48 = vpop.permute.xlu1 %1936  ;;  %v1753_v35 = vmul.f32 %v4955_v62, %v4951_v14 }
 0xe50   :  { %v4957_v24 = vpop.eup %4956 }
 0xe51   :  { %v1754_v29 = vmul.f32 %v4957_v24, %v4953_v17 }
 0xe53   :  { %v2070_v33 = vpop.permute.xlu1 %2069  ;;  %v1755_v47 = vpack.c.bf16 %v1754_v29, %v1753_v35 }
 0xe54   :  { %v2075_v0 = vsel %vm373_vm1, %v2070_v33, 0  ;;  %4517 = vmatmul.mubr.msk.bf16.vlgmr.msra.gmra.mrb[24].mxu0 %vm373_vm1, %v1937_v48 }
 0xe55   :  { %4499 = vmatmul.mubr.msk.bf16.vlgmr.msra.gmra.mrb[40].mxu1 %vm421_vm2, %v1755_v47  ;;  %4527 = vmatpush3.bf16.xpose.msra.mxu0 %v2075_v0 }
 0xe56   :  { %4503 = vmatpush3.bf16.xpose.msra.mxu1 %v1812_v19  ;;  %4528 = vmatprep.mubr.msk.bf16.mxu0 %vm5130_vm0, %v5128_v7 }
 0xe57   :  { %4504 = vmatprep.mubr.msk.bf16.mxu1 %vm5130_vm0, %v5128_v7  ;;  %4508 = vmatprep.subr.bf16.mxu1 %v5128_v7 }
 0xe58   :  { %4538 = vmatprep.subr.bf16.mxu0 %v5128_v7 }
 0xe5c   :  { %4529 = vmatmul.mubr.msk.bf16.vlgmr.msra.gmra.mrb[28].mxu0 %vm373_vm1, %v2068_v37 }
 0xe5d   :  { %4505 = vmatmul.mubr.msk.bf16.vlgmr.msra.gmra.mrb[44].mxu1 %vm373_vm1, %v1804_v36  ;;  %4554 = vmatprep.mubr.msk.bf16.mxu0 %vm5130_vm0, %v5128_v7 }
 0xe5e   :  { %4510 = vmatprep.mubr.msk.bf16.mxu1 %vm5130_vm0, %v5128_v7 }
 0xf27   :  { %v1980_v38 = vpop.f32.mrb[24].mxu0 }
 0xf28   :  { %v1793_v39 = vpop.f32.mrb[40].mxu1  ;;  %v4518_v42 = vpop.f32.mrb[25].mxu0  ;;  %v1981_v6 = vadd.f32 %v5754_v56, %v1980_v38 }
 0xf29   :  { %1800 = vst.msk [vmem:[#allocation2] sm:$0xff] %vm373_vm1, %v1793_v39  ;;  %v4500_v43 = vpop.f32.mrb[41].mxu1  ;;  %v1983_v44 = vpop.f32.mrb[26].mxu0 }
 0xf2a   :  { %v1796_v45 = vpop.f32.mrb[42].mxu1  ;;  %v4519_v28 = vpop.f32.mrb[27].mxu0  ;;  %v1984_v11 = vadd.f32 %v5760_v60, %v1983_v44  ;;  %v1987_v12 = vsel %vm421_vm2, %v1981_v6, -inf }
 0xf2b   :  { %1801 = vst.msk [vmem:[#allocation2 + $0x8] sm:$0xff] %vm373_vm1, %v1796_v45  ;;  %v4501_v46 = vpop.f32.mrb[43].mxu1 }
 0xf2c   :  { %v1990_v14 = vsel %vm421_vm2, %v1984_v11, -inf }
 0xf2f   :  { %v2111_v50 = vpop.f32.mrb[28].mxu0 }
 0xf30   :  { %v1848_v51 = vpop.f32.mrb[44].mxu1  ;;  %v4530_v53 = vpop.f32.mrb[29].mxu0  ;;  %v2112_v63 = vadd.f32 %v5754_v56, %v2111_v50 }
 0xf31   :  { %v1849_v55 = vadd.f32 %v5754_v56, %v1848_v51  ;;  %v4506_v25 = vpop.f32.mrb[45].mxu1  ;;  %v2114_v57 = vpop.f32.mrb[30].mxu0 }
 0xf32   :  { %v1851_v58 = vpop.f32.mrb[46].mxu1  ;;  %v4531_v59 = vpop.f32.mrb[31].mxu0  ;;  %v2118_v10 = vsel %vm421_vm2, %v2112_v63, -inf  ;;  %v2115_v13 = vadd.f32 %v5760_v60, %v2114_v57 }
 0xf33   :  { %v1852_v1 = vadd.f32 %v5760_v60, %v1851_v58  ;;  %v4507_v2 = vpop.f32.mrb[47].mxu1  ;;  %v1855_v5 = vsel %vm421_vm2, %v1849_v55, -inf }
 0xf34   :  { %1856 = vmax.xlane.f32.xlu1 %v1855_v5  ;;  %v2121_v16 = vsel %vm421_vm2, %v2115_v13, -inf }
 0xf35   :  { %v1858_v9 = vsel %vm421_vm2, %v1852_v1, -inf }
 0xf36   :  { %1859 = vmax.xlane.f32.xlu0 %v1858_v9 }
 0xf38   :  { %2119 = vmax.xlane.f32.xlu1 %v2118_v10 }
 0xf3a   :  { %1988 = vmax.xlane.f32.xlu0 %v1987_v12 }
 0xf3e   :  { %1991 = vmax.xlane.f32.xlu0 %v1990_v14 }
 0xf42   :  { %2122 = vmax.xlane.f32.xlu0 %v2121_v16 }
 0xfc1   :  { %v1857_v56 = vpop.xlane.xlu1 %1856 }
 0xfc2   :  { %v1861_v31 = vsub.f32 %v1849_v55, %v1857_v56 }
 0xfc3   :  { %v1860_v17 = vpop.xlane.xlu0 %1859 }
 0xfc4   :  { %v1862_v61 = vsub.f32 %v1852_v1, %v1860_v17  ;;  %v1863_v60 = vmul.f32 1.442695, %v1861_v31  ;;  %v4771_v31 = vld [vmem:[#allocation6 + $0x8] sm:$0xff]  }
 0xfc5   :  { %v2120_v21 = vpop.xlane.xlu1 %2119 }
 0xfc6   :  { %v2124_v27 = vsub.f32 %v2112_v63, %v2120_v21  ;;  %v1865_v29 = vmul.f32 1.442695, %v1862_v61  ;;  %v4772_v61 = vld [vmem:[#allocation6 + $0x10] sm:$0xff]  }
 0xfc7   :  { %v1989_v22 = vpop.xlane.xlu0 %1988 }
 0xfc8   :  { %v1993_v49 = vsub.f32 %v1981_v6, %v1989_v22  ;;  %v2126_v62 = vmul.f32 1.442695, %v2124_v27 }
 0xfca   :  { %v1995_v48 = vmul.f32 1.442695, %v1993_v49  ;;  %v4770_v49 = vld [vmem:[#allocation6] sm:$0xff]  }
 0xfcb   :  { %v1992_v24 = vpop.xlane.xlu0 %1991  ;;  %4539 = vmatpush3.bf16.msra.mxu0 %v4770_v49  ;;  %v4798_v49 = vld [vmem:[%s6352_s6 + $0x64] ss:$8 sps:$4 sm:$0xff]  }
 0xfcc   :  { %4958 = vpow2.f32 %v1995_v48  ;;  %v1994_v35 = vsub.f32 %v1984_v11, %v1992_v24  ;;  %4540 = vmatprep.subr.bf16.mxu0 %v5128_v7  ;;  %v4774_v48 = vld [vmem:[#allocation6 + $0x20] sm:$0xff]  }
 0xfcd   :  { %4960 = vpow2.f32 %v2126_v62  ;;  %v4773_v62 = vld [vmem:[#allocation6 + $0x18] sm:$0xff]  }
 0xfce   :  { %v1997_v33 = vmul.f32 1.442695, %v1994_v35 }
 0xfcf   :  { %v2123_v47 = vpop.xlane.xlu0 %2122  ;;  %4541 = vmatpush3.bf16.msra.mxu0 %v4771_v31  ;;  %v4796_v31 = vld [vmem:[%s6352_s6 + $0x60] ss:$8 sps:$4 sm:$0xff]  }
 0xfd0   :  { %4962 = vpow2.f32 %v1997_v33  ;;  %v2125_v0 = vsub.f32 %v2115_v13, %v2123_v47  ;;  %4542 = vmatprep.subr.bf16.mxu0 %v5128_v7  ;;  %v4775_v33 = vld [vmem:[#allocation6 + $0x28] sm:$0xff]   ;;  %v4776_v47 = vld [vmem:[#allocation6 + $0x30] sm:$0xff]  }
 0xfd1   :  { %4964 = vpow2.f32 %v1863_v60 }
 0xfd2   :  { %4966 = vpow2.f32 %v1865_v29  ;;  %v2128_v19 = vmul.f32 1.442695, %v2125_v0 }
 0xfd3   :  { %4543 = vmatpush3.bf16.msra.mxu0 %v4772_v61  ;;  %v4801_v61 = vld [vmem:[%s6352_s6 + $0x74] ss:$8 sps:$4 sm:$0xff]  }
 0xfd4   :  { %4968 = vpow2.f32 %v2128_v19  ;;  %4544 = vmatprep.subr.bf16.mxu0 %v5128_v7 }
 0xfd6   :  { %v4959_v36 = vpop.eup %4958 }
 0xfd7   :  { %v1999_v37 = vsel %vm421_vm2, %v4959_v36, 0.0  ;;  %v4961_v38 = vpop.eup %4960  ;;  %4545 = vmatpush3.bf16.msra.mxu0 %v4773_v62  ;;  %v4799_v62 = vld [vmem:[%s6352_s6 + $0x70] ss:$8 sps:$4 sm:$0xff]  }
 0xfd8   :  { %2000 = vadd.xlane.f32.xlu1 %v1999_v37  ;;  %v2130_v43 = vsel %vm421_vm2, %v4961_v38, 0.0  ;;  %4546 = vmatprep.subr.bf16.mxu0 %v5128_v7  ;;  %v4777_v37 = vld [vmem:[#allocation6 + $0x38] sm:$0xff]  }
 0xfda   :  { %v4963_v39 = vpop.eup %4962 }
 0xfdb   :  { %v4965_v42 = vpop.eup %4964  ;;  %v2002_v44 = vsel %vm421_vm2, %v4963_v39, 0.0  ;;  %4547 = vmatpush3.bf16.msra.mxu0 %v4774_v48  ;;  %v4802_v48 = vld [vmem:[%s6353_s7 + $0x40] sm:$0xff]  }
 0xfdc   :  { %v4967_v45 = vpop.eup %4966  ;;  %2131 = vadd.xlane.f32.xlu1 %v2130_v43  ;;  %2003 = vadd.xlane.f32.xlu0 %v2002_v44  ;;  %v1867_v28 = vsel %vm421_vm2, %v4965_v42, 0.0 }
 0xfdd   :  { %v1870_v46 = vsel %vm421_vm2, %v4967_v45, 0.0  ;;  %4548 = vmatprep.subr.bf16.mxu0 %v5128_v7 }
 0xfde   :  { %v4969_v50 = vpop.eup %4968 }
 0xfdf   :  { %v2133_v51 = vsel %vm421_vm2, %v4969_v50, 0.0  ;;  %4549 = vmatpush3.bf16.msra.mxu0 %v4775_v33 }
 0xfe0   :  { %1868 = vadd.xlane.f32.xlu1 %v1867_v28  ;;  %1871 = vadd.xlane.f32.xlu0 %v1870_v46 }
 0xfe1   :  { %4550 = vmatprep.subr.bf16.mxu0 %v5128_v7 }
 0xfe3   :  { %4551 = vmatpush3.bf16.msra.mxu0 %v4776_v47 }
 0xfe4   :  { %2134 = vadd.xlane.f32.xlu0 %v2133_v51  ;;  %4552 = vmatprep.subr.bf16.mxu0 %v5128_v7 }
 0xfe7   :  { %4553 = vmatpush3.bf16.msra.mxu0 %v4777_v37 }
 0xfe8   :  { %4304 = vmatprep.subr.bf16.mxu0 %v4802_v48 }
 0xff1   :  { %1879 = vrot.lane.b32.xlu1 %v5742_v52, %s5131_s22 }
 0xff5   :  { %2141 = vrot.lane.b32.xlu1 %v5742_v52, %s5132_s23 }
 0xffa   :  { %2010 = vrot.lane.b32.xlu0 %v5742_v52, %s5126_s2 }
0x1065   :  { %v2001_v53 = vpop.xlane.xlu1 %2000 }
0x1069   :  { %v2132_v55 = vpop.xlane.xlu1 %2131  ;;  %v2004_v25 = vpop.xlane.xlu0 %2003 }
0x106d   :  { %v1869_v57 = vpop.xlane.xlu1 %1868  ;;  %v1872_v58 = vpop.xlane.xlu0 %1871 }
0x106e   :  { %4970 = vrcp.f32 %v1869_v57 }
0x106f   :  { %4972 = vrcp.f32 %v1872_v58 }
0x1070   :  { %4974 = vrcp.f32 %v2004_v25 }
0x1071   :  { %v1880_v59 = vpop.permute.xlu1 %1879  ;;  %4976 = vrcp.f32 %v2001_v53  ;;  %v2135_v1 = vpop.xlane.xlu0 %2134 }
0x1072   :  { %4509 = vmatpush3.bf16.msra.mxu1 %v1880_v59  ;;  %4978 = vrcp.f32 %v2135_v1 }
0x1073   :  { %4520 = vmatprep.subr.bf16.mxu1 %v5128_v7  ;;  %4980 = vrcp.f32 %v2132_v55 }
0x1075   :  { %v2011_v10 = vpop.permute.xlu0 %2010  ;;  %v2142_v56 = vpop.permute.xlu1 %2141 }
0x1078   :  { %v4971_v63 = vpop.eup %4970 }
0x1079   :  { %v4973_v2 = vpop.eup %4972  ;;  %v1875_v5 = vmul.f32 %v4971_v63, %v4965_v42 }
0x107a   :  { %v1876_v6 = vmul.f32 %v4973_v2, %v4967_v45  ;;  %v4975_v9 = vpop.eup %4974 }
0x107b   :  { %v4977_v11 = vpop.eup %4976  ;;  %v2008_v12 = vmul.f32 %v4975_v9, %v4963_v39 }
0x107c   :  { %v1877_v52 = vpack.c.bf16 %v1876_v6, %v1875_v5  ;;  %v2007_v13 = vmul.f32 %v4977_v11, %v4959_v36  ;;  %v4979_v16 = vpop.eup %4978  ;;  %v4783_v11 = vld [vmem:[%s6352_s6 + $0x14] ss:$8 sps:$4 sm:$0xff]  }
0x107d   :  { %v4981_v17 = vpop.eup %4980  ;;  %v2139_v21 = vmul.f32 %v4979_v16, %v4969_v50  ;;  %v4789_v16 = vld [vmem:[%s6352_s6 + $0x34] ss:$8 sps:$4 sm:$0xff]  }
0x107e   :  { %4511 = vmatmul.mubr.msk.bf16.vlgmr.msra.gmra.mrb[48].mxu1 %vm421_vm2, %v1877_v52  ;;  %v2009_v14 = vpack.c.bf16 %v2008_v12, %v2007_v13  ;;  %v2138_v27 = vmul.f32 %v4981_v17, %v4961_v38  ;;  %v4781_v12 = vld [vmem:[%s6352_s6 + $0x10] ss:$8 sps:$4 sm:$0xff]   ;;  %v4786_v13 = vld [vmem:[%s6352_s6 + $0x24] ss:$8 sps:$4 sm:$0xff]  }
0x107f   :  { %4521 = vmatpush3.bf16.msra.mxu1 %v2011_v10  ;;  %4522 = vmatprep.mubr.msk.bf16.mxu1 %vm5130_vm0, %v5128_v7  ;;  %v4792_v17 = vld [vmem:[%s6352_s6 + $0x44] ss:$8 sps:$4 sm:$0xff]  }
0x1080   :  { %4532 = vmatprep.subr.bf16.mxu1 %v5128_v7  ;;  %v2140_v22 = vpack.c.bf16 %v2139_v21, %v2138_v27  ;;  %v4790_v21 = vld [vmem:[%s6352_s6 + $0x40] ss:$8 sps:$4 sm:$0xff]   ;;  %v4795_v27 = vld [vmem:[%s6352_s6 + $0x54] ss:$8 sps:$4 sm:$0xff]  }
0x1086   :  { %4523 = vmatmul.mubr.msk.bf16.vlgmr.msra.gmra.mrb[52].mxu1 %vm421_vm2, %v2009_v14  ;;  %v4784_v14 = vld [vmem:[%s6352_s6 + $0x20] ss:$8 sps:$4 sm:$0xff]  }
0x1087   :  { %4533 = vmatpush3.bf16.msra.mxu1 %v2142_v56  ;;  %4534 = vmatprep.mubr.msk.bf16.mxu1 %vm5130_vm0, %v5128_v7  ;;  %v4787_v56 = vld [vmem:[%s6352_s6 + $0x30] ss:$8 sps:$4 sm:$0xff]  }
0x108e   :  { %4535 = vmatmul.mubr.msk.bf16.vlgmr.msra.gmra.mrb[56].mxu1 %vm421_vm2, %v2140_v22  ;;  %v4793_v22 = vld [vmem:[%s6352_s6 + $0x50] ss:$8 sps:$4 sm:$0xff]  }
0x108f   :  { %2469 = vmatprep.mubr.bf16.mxu1 %v5129_v26 }
0x1151   :  { %v1919_v24 = vpop.f32.mrb[48].mxu1 }
0x1152   :  { %1928 = vrot.lane.b32.xlu1 %v1919_v24, %s5132_s23  ;;  %v4512_v35 = vpop.f32.mrb[49].mxu1  ;;  %v4803_v24 = vld [vmem:[%s6353_s7] sm:$0xff]  }
0x1153   :  { %v1922_v60 = vpop.f32.mrb[50].mxu1  ;;  %v4804_v35 = vld [vmem:[%s6353_s7 + $0x48] sm:$0xff]  }
0x1154   :  { %v4513_v29 = vpop.f32.mrb[51].mxu1 }
0x1156   :  { %1930 = vrot.lane.b32.xlu1 %v1922_v60, %s5132_s23  ;;  %v4805_v60 = vld [vmem:[%s6353_s7 + $0x8] sm:$0xff]  }
0x1159   :  { %v2050_v0 = vpop.f32.mrb[52].mxu1 }
0x115a   :  { %2059 = vrot.lane.b32.xlu0 %v2050_v0, %s5126_s2  ;;  %v4524_v19 = vpop.f32.mrb[53].mxu1 }
0x115b   :  { %v2053_v36 = vpop.f32.mrb[54].mxu1 }
0x115c   :  { %2061 = vrot.lane.b32.xlu1 %v2053_v36, %s5126_s2  ;;  %v4525_v38 = vpop.f32.mrb[55].mxu1 }
0x1161   :  { %v2181_v39 = vpop.f32.mrb[56].mxu1 }
0x1162   :  { %2190 = vrot.lane.b32.xlu0 %v2181_v39, %s5131_s22  ;;  %v4536_v42 = vpop.f32.mrb[57].mxu1 }
0x1163   :  { %v2184_v43 = vpop.f32.mrb[58].mxu1 }
0x1164   :  { %2192 = vrot.lane.b32.xlu1 %v2184_v43, %s5131_s22  ;;  %v4537_v44 = vpop.f32.mrb[59].mxu1 }
0x11c4   :  { %v1929_v45 = vpop.permute.xlu1 %1928 }
0x11c5   :  { %1934 = vst.msk [vmem:[#allocation2] sm:$0xff] %vm623_vm3, %v1929_v45 }
0x11c8   :  { %v1931_v28 = vpop.permute.xlu1 %1930 }
0x11c9   :  { %1935 = vst.msk [vmem:[#allocation2 + $0x8] sm:$0xff] %vm623_vm3, %v1931_v28 }
0x11cc   :  { %v2060_v46 = vpop.permute.xlu0 %2059 }
0x11cd   :  { %2065 = vst.msk [vmem:[#allocation2] sm:$0xff] %vm755_vm4, %v2060_v46 }
0x11ce   :  { %v2062_v50 = vpop.permute.xlu1 %2061 }
0x11cf   :  { %2066 = vst.msk [vmem:[#allocation2 + $0x8] sm:$0xff] %vm755_vm4, %v2062_v50 }
0x11d4   :  { %v2191_v51 = vpop.permute.xlu0 %2190 }
0x11d5   :  { %2196 = vst.msk [vmem:[#allocation2] sm:$0xff] %vm887_vm5, %v2191_v51 }
0x11d6   :  { %v2193_v53 = vpop.permute.xlu1 %2192 }
0x11d7   :  { %2197 = vst.msk [vmem:[#allocation2 + $0x8] sm:$0xff] %vm887_vm5, %v2193_v53 }
0x11dc   :  { %v2198_v55 = vld [vmem:[#allocation2] sm:$0xff] }
0x11de   :  { %v2199_v25 = vld [vmem:[#allocation2 + $0x8] sm:$0xff] }
0x11df   :  { %v2200_v57 = vpack.c.bf16 %v2199_v25, %v2198_v55 }
0x11e1   :  { %4555 = vmatmul.mubr.bf16.vlgmr.msra.gmra.mrb[32].mxu0 %v2200_v57 }
0x11e2   :  { %4305 = vmatpush3.bf16.msra.mxu0 %v4803_v24 }
0x11e3   :  { %4306 = vmatprep.subr.bf16.mxu0 %v4804_v35 }
0x11e6   :  { %4307 = vmatpush3.bf16.msra.mxu0 %v4805_v60 }
0x12b4   :  { %v2299_v58 = vpop.f32.mrb[32].mxu0 }
0x12b5   :  { %v2300_v59 = vadd.f32 %v2299_v58, %v5461_v18  ;;  %v4556_v63 = vpop.f32.mrb[33].mxu0 }
0x12b6   :  { %v2302_v1 = vpop.f32.mrb[34].mxu0 }
0x12b7   :  { %v5848_v2 = vadd.f32 %v2300_v59, %v5725_v54  ;;  %v2303_v5 = vadd.f32 %v2302_v1, %v5461_v18  ;;  %v4557_v6 = vpop.f32.mrb[35].mxu0  ;;  %v4780_v54 = vld [vmem:[%s6352_s6 + $0x4] ss:$8 sps:$4 sm:$0xff]  }
0x12b8   :  { %2437 = vmatprep.subr.bf16.mxu1 %v4780_v54  ;;  %v4810_v54 = vld [vmem:[%s6353_s7 + $0x60] sm:$0xff]  }
0x12b9   :  { %v5852_v52 = vadd.f32 %v2303_v5, %v5728_v32  ;;  %2308 = vadd.xlane.f32.xlu0 %v5848_v2  ;;  %v2314_v9 = vmul.f32 %v5848_v2, %v5848_v2  ;;  %v4778_v32 = vld [vmem:[%s6352_s6] ss:$8 sps:$4 sm:$0xff]  }
0x12ba   :  { %2438 = vmatpush1.bf16.msra.mxu1 %v4778_v32  ;;  %v4811_v32 = vld [vmem:[%s6353_s7 + $0x20] sm:$0xff]  }
0x12bb   :  { %2310 = vadd.xlane.f32.xlu1 %v5852_v52  ;;  %v2315_v10 = vmul.f32 %v5852_v52, %v5852_v52  ;;  %2439 = vmatprep.subr.bf16.mxu1 %v4783_v11  ;;  %v4812_v11 = vld [vmem:[%s6353_s7 + $0x68] sm:$0xff]  }
0x12bd   :  { %2316 = vadd.xlane.f32.xlu0 %v2314_v9  ;;  %v4808_v9 = vld [vmem:[%s6353_s7 + $0x58] sm:$0xff]  }
0x12be   :  { %2440 = vmatpush1.bf16.msra.mxu1 %v4781_v12  ;;  %v4813_v12 = vld [vmem:[%s6353_s7 + $0x28] sm:$0xff]  }
0x12bf   :  { %2441 = vmatprep.subr.bf16.mxu1 %v4786_v13  ;;  %v4814_v13 = vld [vmem:[%s6353_s7 + $0x70] sm:$0xff]  }
0x12c1   :  { %2318 = vadd.xlane.f32.xlu0 %v2315_v10  ;;  %v4809_v10 = vld [vmem:[%s6353_s7 + $0x18] sm:$0xff]  }
0x12c2   :  { %2442 = vmatpush1.bf16.msra.mxu1 %v4784_v14  ;;  %v4815_v14 = vld [vmem:[%s6353_s7 + $0x30] sm:$0xff]  }
0x12c3   :  { %2443 = vmatprep.subr.bf16.mxu1 %v4789_v16  ;;  %v4816_v16 = vld [vmem:[%s6353_s7 + $0x78] sm:$0xff]  }
0x12c6   :  { %2444 = vmatpush1.bf16.msra.mxu1 %v4787_v56  ;;  %v4817_v56 = vld [vmem:[%s6353_s7 + $0x38] sm:$0xff]  }
0x12c7   :  { %2445 = vmatprep.subr.bf16.mxu1 %v4792_v17 }
0x12ca   :  { %2446 = vmatpush1.bf16.msra.mxu1 %v4790_v21 }
0x12cb   :  { %2447 = vmatprep.subr.bf16.mxu1 %v4795_v27 }
0x12ce   :  { %2448 = vmatpush1.bf16.msra.mxu1 %v4793_v22 }
0x12cf   :  { %2449 = vmatprep.subr.bf16.mxu1 %v4798_v49 }
0x12d2   :  { %2450 = vmatpush1.bf16.msra.mxu1 %v4796_v31 }
0x12d3   :  { %2451 = vmatprep.subr.bf16.mxu1 %v4801_v61 }
0x12d6   :  { %2452 = vmatpush1.bf16.msra.mxu1 %v4799_v62 }
0x1346   :  { %v2309_v29 = vpop.xlane.xlu0 %2308 }
0x1347   :  { %v2312_v33 = vmul.f32 0.0078125, %v2309_v29 }
0x1348   :  { %v2311_v47 = vpop.xlane.xlu1 %2310 }
0x1349   :  { %v2322_v19 = vmul.f32 %v2312_v33, %v2312_v33  ;;  %v2313_v36 = vmul.f32 0.0078125, %v2311_v47  ;;  %v2328_v51 = vsub.f32 %v5848_v2, %v2312_v33  ;;  %v4806_v2 = vld [vmem:[%s6353_s7 + $0x50] sm:$0xff]  }
0x134a   :  { %v2317_v0 = vpop.xlane.xlu0 %2316  ;;  %4308 = vmatprep.subr.bf16.mxu0 %v4806_v2 }
0x134b   :  { %v2320_v37 = vmul.f32 0.0078125, %v2317_v0  ;;  %v2323_v42 = vmul.f32 %v2313_v36, %v2313_v36  ;;  %v2329_v25 = vsub.f32 %v5852_v52, %v2313_v36  ;;  %v4807_v52 = vld [vmem:[%s6353_s7 + $0x10] sm:$0xff]  }
0x134c   :  { %4309 = vmatpush3.bf16.msra.mxu0 %v4807_v52 }
0x134d   :  { %v2324_v38 = vsub.f32 %v2320_v37, %v2322_v19  ;;  %4310 = vmatprep.subr.bf16.mxu0 %v4808_v9 }
0x134e   :  { %v2319_v39 = vpop.xlane.xlu0 %2318 }
0x134f   :  { %v2326_v43 = vmax.f32 %v2324_v38, 0.0  ;;  %v2321_v44 = vmul.f32 0.0078125, %v2319_v39 }
0x1350   :  { %4311 = vmatpush3.bf16.msra.mxu0 %v4809_v10 }
0x1351   :  { %v2330_v45 = vadd.f32 1e-12, %v2326_v43  ;;  %v2325_v28 = vsub.f32 %v2321_v44, %v2323_v42  ;;  %4312 = vmatprep.subr.bf16.mxu0 %v4810_v54 }
0x1353   :  { %4982 = vrsqrt.f32 %v2330_v45  ;;  %v2327_v46 = vmax.f32 %v2325_v28, 0.0 }
0x1354   :  { %4313 = vmatpush3.bf16.msra.mxu0 %v4811_v32  ;;  %v4818_v32 = vld [vmem:[%s6350_s4] ss:$12 sps:$4 sm:$0xff]  }
0x1355   :  { %v2331_v50 = vadd.f32 1e-12, %v2327_v46  ;;  %4314 = vmatprep.subr.bf16.mxu0 %v4812_v11  ;;  %v4824_v11 = vld [vmem:[%s6350_s4 + $0x1c] ss:$12 sps:$4 sm:$0xff]  }
0x1357   :  { %4984 = vrsqrt.f32 %v2331_v50 }
0x1358   :  { %4315 = vmatpush3.bf16.msra.mxu0 %v4813_v12  ;;  %v4822_v12 = vld [vmem:[%s6350_s4 + $0x18] ss:$12 sps:$4 sm:$0xff]  }
0x1359   :  { %4316 = vmatprep.subr.bf16.mxu0 %v4814_v13  ;;  %v4825_v13 = vld [vmem:[%s6350_s4 + $0x20] ss:$12 sps:$4 sm:$0xff]  }
0x135c   :  { %4317 = vmatpush3.bf16.msra.mxu0 %v4815_v14  ;;  %v4828_v14 = vld [vmem:[%s6350_s4 + $0x34] ss:$12 sps:$4 sm:$0xff]  }
0x135d   :  { %v4983_v53 = vpop.eup %4982  ;;  %4318 = vmatprep.subr.bf16.mxu0 %v4816_v16  ;;  %v4826_v16 = vld [vmem:[%s6350_s4 + $0x30] ss:$12 sps:$4 sm:$0xff]  }
0x135e   :  { %v2334_v55 = vmul.f32 %v4983_v53, %v2328_v51 }
0x1360   :  { %v2336_v59 = vmul.f32 %v2334_v55, %v5540_v15  ;;  %4319 = vmatpush3.bf16.msra.mxu0 %v4817_v56  ;;  %v4829_v56 = vld [vmem:[%s6350_s4 + $0x38] ss:$12 sps:$4 sm:$0xff]  }
0x1361   :  { %v4985_v57 = vpop.eup %4984  ;;  %4558 = vmatprep.subr.bf16.mxu0 %v5128_v7 }
0x1362   :  { %v2335_v58 = vmul.f32 %v4985_v57, %v2329_v25  ;;  %v5925_v1 = vadd.f32 %v2336_v59, %v5546_v23 }
0x1364   :  { %v2337_v63 = vmul.f32 %v2335_v58, %v5540_v15 }
0x1366   :  { %v5928_v5 = vadd.f32 %v2337_v63, %v5546_v23 }
0x1368   :  { %v2340_v6 = vpack.c.bf16 %v5928_v5, %v5925_v1 }
0x136a   :  { %2470 = vmatmul.mubr.bf16.vlgmr.msra.gmra.mrb[60].mxu1 %v2340_v6 }
0x136b   :  { %2898 = vmatprep.mubr.bf16.mxu1 %v5129_v26 }
0x143d   :  { %v2471_v17 = vpop.f32.mrb[60].mxu1 }
0x143e   :  { %v2472_v21 = vadd.f32 %v2471_v17, %v5599_v40  ;;  %v2473_v27 = vpop.f32.mrb[61].mxu1  ;;  %v4832_v17 = vld [vmem:[%s6350_s4 + $0x4c] ss:$12 sps:$4 sm:$0xff]  }
0x143f   :  { %v2474_v22 = vadd.f32 %v2473_v27, %v5602_v41  ;;  %v2475_v49 = vpop.f32.mrb[62].mxu1  ;;  %v4833_v27 = vld [vmem:[%s6350_s4 + $0x50] ss:$12 sps:$4 sm:$0xff]  }
0x1440   :  { %v2484_v31 = vmul.f32 0.70710677, %v2472_v21  ;;  %v2476_v61 = vadd.f32 %v2475_v49, %v5599_v40  ;;  %v2477_v62 = vpop.f32.mrb[63].mxu1  ;;  %v2480_v37 = vmul.f32 0.5, %v2472_v21  ;;  %v4830_v21 = vld [vmem:[%s6350_s4 + $0x48] ss:$12 sps:$4 sm:$0xff]  }
0x1441   :  { %v2485_v48 = vmul.f32 0.70710677, %v2474_v22  ;;  %v2478_v24 = vadd.f32 %v2477_v62, %v5602_v41  ;;  %v2481_v42 = vmul.f32 0.5, %v2474_v22  ;;  %v4836_v22 = vld [vmem:[%s6350_s4 + $0x64] ss:$12 sps:$4 sm:$0xff]  }
0x1442   :  { %4986 = verf.f32 %v2484_v31  ;;  %v2486_v35 = vmul.f32 0.70710677, %v2476_v61  ;;  %v2482_v38 = vmul.f32 0.5, %v2476_v61  ;;  %v4834_v49 = vld [vmem:[%s6350_s4 + $0x60] ss:$12 sps:$4 sm:$0xff]  }
0x1443   :  { %4988 = verf.f32 %v2485_v48  ;;  %v2487_v60 = vmul.f32 0.70710677, %v2478_v24  ;;  %v2483_v43 = vmul.f32 0.5, %v2478_v24  ;;  %v4837_v31 = vld [vmem:[%s6350_s4 + $0x68] ss:$12 sps:$4 sm:$0xff]  }
0x1444   :  { %4990 = verf.f32 %v2486_v35  ;;  %v4840_v61 = vld [vmem:[%s6350_s4 + $0x7c] ss:$12 sps:$4 sm:$0xff]   ;;  %v4838_v62 = vld [vmem:[%s6350_s4 + $0x78] ss:$12 sps:$4 sm:$0xff]   ;;  %v4841_v48 = vld [vmem:[%s6350_s4 + $0x80] ss:$12 sps:$4 sm:$0xff]  }
0x1445   :  { %4992 = verf.f32 %v2487_v60  ;;  %v4844_v24 = vld [vmem:[%s6350_s4 + $0x94] ss:$12 sps:$4 sm:$0xff]   ;;  %v4842_v35 = vld [vmem:[%s6350_s4 + $0x90] ss:$12 sps:$4 sm:$0xff]   ;;  %v4845_v60 = vld [vmem:[%s6350_s4 + $0x98] ss:$12 sps:$4 sm:$0xff]  }
0x144c   :  { %v4987_v29 = vpop.eup %4986 }
0x144d   :  { %v4989_v33 = vpop.eup %4988  ;;  %v2492_v47 = vadd.f32 1.0, %v4987_v29  ;;  %v4848_v29 = vld [vmem:[%s6350_s4 + $0xac] ss:$12 sps:$4 sm:$0xff]  }
0x144e   :  { %v4991_v0 = vpop.eup %4990  ;;  %v2493_v19 = vadd.f32 1.0, %v4989_v33  ;;  %v4846_v33 = vld [vmem:[%s6350_s4 + $0xa8] ss:$12 sps:$4 sm:$0xff]  }
0x144f   :  { %v4993_v36 = vpop.eup %4992  ;;  %v2494_v39 = vadd.f32 1.0, %v4991_v0  ;;  %v2496_v45 = vmul.f32 %v2492_v47, %v2480_v37  ;;  %v4849_v47 = vld [vmem:[%s6350_s4 + $0xb0] ss:$12 sps:$4 sm:$0xff]  }
0x1450   :  { %v2495_v44 = vadd.f32 1.0, %v4993_v36  ;;  %v2497_v46 = vmul.f32 %v2493_v19, %v2481_v42 }
0x1451   :  { %v2498_v28 = vmul.f32 %v2494_v39, %v2482_v38 }
0x1452   :  { %v2499_v50 = vmul.f32 %v2495_v44, %v2483_v43 }
0x1453   :  { %v2500_v51 = vpack.c.bf16 %v2498_v28, %v2496_v45 }
0x1454   :  { %v2501_v53 = vpack.c.bf16 %v2499_v50, %v2497_v46 }
0x1456   :  { %2662 = vmatprep.mubr.bf16.mxu0 %v2501_v53 }
0x1457   :  { %2663 = vmatmul.mubr.bf16.vlgmr.msra.gmra.mrb[36].mxu0 %v2500_v51 }
0x1458   :  { %4574 = vmatprep.mubr.msk.bf16.mxu0 %vm5130_vm0, %v5128_v7 }
0x152a   :  { %v4320_v55 = vpop.f32.mrb[36].mxu0 }
0x152b   :  { %v4321_v25 = vpop.f32.mrb[37].mxu0 }
0x152c   :  { %v4322_v57 = vadd.f32 %v4321_v25, %v4320_v55  ;;  %v4323_v58 = vpop.f32.mrb[38].mxu0 }
0x152d   :  { %v4324_v59 = vpop.f32.mrb[39].mxu0 }
0x152e   :  { %v2665_v63 = vadd.f32 %v4322_v57, %v5614_v20  ;;  %v4325_v6 = vadd.f32 %v4324_v59, %v4323_v58 }
0x1530   :  { %v2668_v2 = vadd.f32 %v4325_v6, %v5614_v20  ;;  %v5979_v52 = vadd.f32 %v2665_v63, %v5925_v1  ;;  %v4820_v1 = vld [vmem:[%s6350_s4 + $0x4] ss:$12 sps:$4 sm:$0xff]  }
0x1531   :  { %2866 = vmatprep.subr.bf16.mxu1 %v4820_v1 }
0x1532   :  { %2673 = vadd.xlane.f32.xlu0 %v5979_v52  ;;  %v5983_v9 = vadd.f32 %v2668_v2, %v5928_v5  ;;  %v2679_v10 = vmul.f32 %v5979_v52, %v5979_v52  ;;  %v4821_v5 = vld [vmem:[%s6350_s4 + $0x8] ss:$12 sps:$4 sm:$0xff]   ;;  %2867 = vmatpush1.bf16.msra.mxu1 %v4818_v32 }
0x1533   :  { %4559 = vmatpush3.bf16.msra.mxu0 %v4821_v5  ;;  %2868 = vmatprep.subr.bf16.mxu1 %v4824_v11 }
0x1534   :  { %2675 = vadd.xlane.f32.xlu1 %v5983_v9  ;;  %v2680_v54 = vmul.f32 %v5983_v9, %v5983_v9  ;;  %4560 = vmatprep.subr.bf16.mxu0 %v5128_v7 }
0x1536   :  { %2681 = vadd.xlane.f32.xlu0 %v2679_v10  ;;  %2869 = vmatpush1.bf16.msra.mxu1 %v4822_v12 }
0x1537   :  { %4561 = vmatpush3.bf16.msra.mxu0 %v4825_v13  ;;  %2870 = vmatprep.subr.bf16.mxu1 %v4828_v14 }
0x1538   :  { %2683 = vadd.xlane.f32.xlu1 %v2680_v54  ;;  %4562 = vmatprep.subr.bf16.mxu0 %v5128_v7 }
0x153a   :  { %2871 = vmatpush1.bf16.msra.mxu1 %v4826_v16 }
0x153b   :  { %4563 = vmatpush3.bf16.msra.mxu0 %v4829_v56  ;;  %2872 = vmatprep.subr.bf16.mxu1 %v4832_v17 }
0x153c   :  { %4564 = vmatprep.subr.bf16.mxu0 %v5128_v7 }
0x153e   :  { %2873 = vmatpush1.bf16.msra.mxu1 %v4830_v21 }
0x153f   :  { %4565 = vmatpush3.bf16.msra.mxu0 %v4833_v27  ;;  %2874 = vmatprep.subr.bf16.mxu1 %v4836_v22 }
0x1540   :  { %4566 = vmatprep.subr.bf16.mxu0 %v5128_v7 }
0x1542   :  { %2875 = vmatpush1.bf16.msra.mxu1 %v4834_v49 }
0x1543   :  { %4567 = vmatpush3.bf16.msra.mxu0 %v4837_v31  ;;  %2876 = vmatprep.subr.bf16.mxu1 %v4840_v61 }
0x1544   :  { %4568 = vmatprep.subr.bf16.mxu0 %v5128_v7 }
0x1546   :  { %2877 = vmatpush1.bf16.msra.mxu1 %v4838_v62 }
0x1547   :  { %4569 = vmatpush3.bf16.msra.mxu0 %v4841_v48  ;;  %2878 = vmatprep.subr.bf16.mxu1 %v4844_v24 }
0x1548   :  { %4570 = vmatprep.subr.bf16.mxu0 %v5128_v7 }
0x154a   :  { %2879 = vmatpush1.bf16.msra.mxu1 %v4842_v35 }
0x154b   :  { %4571 = vmatpush3.bf16.msra.mxu0 %v4845_v60  ;;  %2880 = vmatprep.subr.bf16.mxu1 %v4848_v29  ;;  %v6111_v60 = vld [vmem:[%s6347_s1 + $0x8] sm:$0xff] }
0x154c   :  { %4572 = vmatprep.subr.bf16.mxu0 %v5128_v7 }
0x154e   :  { %2881 = vmatpush1.bf16.msra.mxu1 %v4846_v33 }
0x154f   :  { %4573 = vmatpush3.bf16.msra.mxu0 %v4849_v47  ;;  %4578 = vmatprep.subr.bf16.mxu1 %v5128_v7 }
0x1550   :  { %4602 = vmatprep.subr.bf16.mxu0 %v5128_v7 }
0x15bf   :  { %v2674_v0 = vpop.xlane.xlu0 %2673 }
0x15c0   :  { %v2677_v19 = vmul.f32 0.0078125, %v2674_v0 }
0x15c1   :  { %v2676_v36 = vpop.xlane.xlu1 %2675 }
0x15c2   :  { %v2678_v37 = vmul.f32 0.0078125, %v2676_v36  ;;  %v2687_v39 = vmul.f32 %v2677_v19, %v2677_v19  ;;  %v2693_v25 = vsub.f32 %v5979_v52, %v2677_v19 }
0x15c3   :  { %v2682_v38 = vpop.xlane.xlu0 %2681 }
0x15c4   :  { %v2685_v42 = vmul.f32 0.0078125, %v2682_v38  ;;  %v2688_v44 = vmul.f32 %v2678_v37, %v2678_v37  ;;  %v2694_v58 = vsub.f32 %v5983_v9, %v2678_v37 }
0x15c5   :  { %v2684_v43 = vpop.xlane.xlu1 %2683 }
0x15c6   :  { %v2689_v45 = vsub.f32 %v2685_v42, %v2687_v39  ;;  %v2686_v28 = vmul.f32 0.0078125, %v2684_v43 }
0x15c8   :  { %v2691_v46 = vmax.f32 %v2689_v45, 0.0  ;;  %v2690_v50 = vsub.f32 %v2686_v28, %v2688_v44 }
0x15ca   :  { %v2695_v51 = vadd.f32 1e-12, %v2691_v46  ;;  %v2692_v53 = vmax.f32 %v2690_v50, 0.0 }
0x15cc   :  { %4994 = vrsqrt.f32 %v2695_v51  ;;  %v2696_v55 = vadd.f32 1e-12, %v2692_v53 }
0x15ce   :  { %4996 = vrsqrt.f32 %v2696_v55 }
0x15d6   :  { %v4995_v57 = vpop.eup %4994 }
0x15d7   :  { %v2699_v59 = vmul.f32 %v4995_v57, %v2693_v25 }
0x15d8   :  { %v4997_v63 = vpop.eup %4996 }
0x15d9   :  { %v2700_v6 = vmul.f32 %v4997_v63, %v2694_v58  ;;  %v2701_v2 = vmul.f32 %v2699_v59, %v5713_v30 }
0x15db   :  { %v2702_v10 = vmul.f32 %v2700_v6, %v5713_v30  ;;  %v6076_v54 = vadd.f32 %v2701_v2, %v5720_v34 }
0x15dd   :  { %v6079_v1 = vadd.f32 %v2702_v10, %v5720_v34 }
0x15df   :  { %v2705_v32 = vpack.c.bf16 %v6079_v1, %v6076_v54 }
0x15e1   :  { %2899 = vmatmul.mubr.bf16.vlgmr.msra.gmra.mrb[64].mxu1 %v2705_v32  ;;  %4575 = vmatmul.mubr.bf16.vlgmr.msra.gmra.mrb[40].mxu0 %v2705_v32 }
0x15e2   :  { %4580 = vmatprep.mubr.msk.bf16.mxu1 %vm5130_vm0, %v5128_v7  ;;  %4604 = vmatprep.mubr.msk.bf16.mxu0 %vm5130_vm0, %v5128_v7 }
0x16b4   :  { %v2900_v52 = vpop.f32.mrb[64].mxu1  ;;  %v2943_v9 = vpop.f32.mrb[40].mxu0 }
0x16b5   :  { %v2902_v5 = vpop.f32.mrb[65].mxu1  ;;  %v4576_v11 = vpop.f32.mrb[41].mxu0  ;;  %v2950_v14 = vadd.f32 %v2900_v52, %v5341_v3  ;;  %v2956_v16 = vadd.f32 %v2943_v9, %v5344_v4 }
0x16b6   :  { %v2904_v12 = vpop.f32.mrb[66].mxu1  ;;  %v2946_v13 = vpop.f32.mrb[42].mxu0  ;;  %v2953_v22 = vadd.f32 %v2902_v5, %v5347_v8 }
0x16b7   :  { %v2951_v56 = vadd.f32 %v2904_v12, %v5341_v3  ;;  %v2957_v17 = vadd.f32 %v2946_v13, %v5344_v4  ;;  %v2906_v21 = vpop.f32.mrb[67].mxu1  ;;  %v4577_v27 = vpop.f32.mrb[43].mxu0  ;;  %v6105_v4 = vld [vmem:[%s6347_s1] sm:$0xff] }
0x16b8   :  { %v2954_v49 = vadd.f32 %v2906_v21, %v5347_v8 }
0x16b9   :  { %v2952_v31 = vpack.c.bf16 %v2951_v56, %v2950_v14  ;;  %v6093_v61 = vpack.c.bf16 %v2957_v17, %v2956_v16 }
0x16ba   :  { %v2955_v62 = vpack.c.bf16 %v2954_v49, %v2953_v22 }
0x16bc   :  { %v2963_v48 = vsel %vm373_vm1, %v2955_v62, 0 }
0x16bd   :  { %4579 = vmatpush3.bf16.xpose.msra.mxu1 %v2963_v48 }
0x16be   :  { %4584 = vmatprep.subr.bf16.mxu1 %v5128_v7 }
0x16c4   :  { %4581 = vmatmul.mubr.msk.bf16.vlgmr.msra.gmra.mrb[68].mxu1 %vm373_vm1, %v2952_v31 }
0x16c5   :  { %4585 = vmatpush3.bf16.msra.mxu1 %v6093_v61  ;;  %4586 = vmatprep.mubr.msk.bf16.mxu1 %vm5130_vm0, %v5128_v7 }
0x16c6   :  { %4590 = vmatprep.subr.bf16.mxu1 %v5128_v7 }
0x1797   :  { %v2999_v3 = vpop.f32.mrb[68].mxu1 }
0x1798   :  { %v3000_v8 = vadd.f32 %v6105_v4, %v2999_v3  ;;  %v4582_v24 = vpop.f32.mrb[69].mxu1 }
0x1799   :  { %v3002_v35 = vpop.f32.mrb[70].mxu1 }
0x179a   :  { %v3003_v29 = vadd.f32 %v6111_v60, %v3002_v35  ;;  %v4583_v33 = vpop.f32.mrb[71].mxu1  ;;  %v3006_v47 = vsel %vm421_vm2, %v3000_v8, -inf }
0x179b   :  { %3007 = vmax.xlane.f32.xlu0 %v3006_v47 }
0x179c   :  { %v3009_v0 = vsel %vm421_vm2, %v3003_v29, -inf }
0x179d   :  { %3010 = vmax.xlane.f32.xlu1 %v3009_v0 }
0x1828   :  { %v3008_v19 = vpop.xlane.xlu0 %3007 }
0x1829   :  { %v3012_v36 = vsub.f32 %v3000_v8, %v3008_v19 }
0x182a   :  { %v3011_v37 = vpop.xlane.xlu1 %3010 }
0x182b   :  { %v3014_v38 = vmul.f32 1.442695, %v3012_v36  ;;  %v3013_v39 = vsub.f32 %v3003_v29, %v3011_v37 }
0x182d   :  { %4998 = vpow2.f32 %v3014_v38  ;;  %v3016_v42 = vmul.f32 1.442695, %v3013_v39 }
0x182f   :  { %5000 = vpow2.f32 %v3016_v42 }
0x1837   :  { %v4999_v43 = vpop.eup %4998 }
0x1838   :  { %v3018_v44 = vsel %vm421_vm2, %v4999_v43, 0.0 }
0x1839   :  { %v5001_v45 = vpop.eup %5000  ;;  %3019 = vadd.xlane.f32.xlu0 %v3018_v44 }
0x183a   :  { %v3021_v28 = vsel %vm421_vm2, %v5001_v45, 0.0 }
0x183b   :  { %3022 = vadd.xlane.f32.xlu1 %v3021_v28 }
0x184c   :  { %3076 = vrot.lane.b32.xlu1 %v2952_v31, %s5131_s22 }
0x184f   :  { %3079 = vrot.lane.b32.xlu0 %v2955_v62, %s5131_s22 }
0x1850   :  { %3211 = vrot.lane.b32.xlu1 %v2955_v62, %s5126_s2 }
0x1853   :  { %3342 = vrot.lane.b32.xlu0 %v2955_v62, %s5132_s23 }
0x1854   :  { %3209 = vrot.lane.b32.xlu1 %v2952_v31, %s5126_s2 }
0x1858   :  { %3340 = vrot.lane.b32.xlu1 %v2952_v31, %s5132_s23 }
0x18c6   :  { %v3020_v46 = vpop.xlane.xlu0 %3019 }
0x18c7   :  { %5002 = vrcp.f32 %v3020_v46 }
0x18c8   :  { %v3023_v50 = vpop.xlane.xlu1 %3022 }
0x18c9   :  { %5004 = vrcp.f32 %v3023_v50 }
0x18ca   :  { %v3080_v53 = vpop.permute.xlu0 %3079 }
0x18cb   :  { %v3085_v10 = vsel %vm373_vm1, %v3080_v53, 0 }
0x18cc   :  { %v3077_v51 = vpop.permute.xlu1 %3076 }
0x18ce   :  { %v3343_v6 = vpop.permute.xlu0 %3342 }
0x18cf   :  { %v3348_v52 = vsel %vm373_vm1, %v3343_v6, 0 }
0x18d0   :  { %v3212_v55 = vpop.permute.xlu1 %3211 }
0x18d1   :  { %v5003_v25 = vpop.eup %5002  ;;  %v3217_v57 = vsel %vm373_vm1, %v3212_v55, 0 }
0x18d2   :  { %4603 = vmatpush3.bf16.xpose.msra.mxu0 %v3217_v57  ;;  %v3026_v59 = vmul.f32 %v5003_v25, %v4999_v43 }
0x18d3   :  { %v5005_v58 = vpop.eup %5004  ;;  %4614 = vmatprep.subr.bf16.mxu0 %v5128_v7 }
0x18d4   :  { %v3027_v63 = vmul.f32 %v5005_v58, %v5001_v45  ;;  %v3210_v32 = vpop.permute.xlu1 %3209 }
0x18d6   :  { %v3028_v2 = vpack.c.bf16 %v3027_v63, %v3026_v59 }
0x18d8   :  { %4587 = vmatmul.mubr.msk.bf16.vlgmr.msra.gmra.mrb[72].mxu1 %vm421_vm2, %v3028_v2  ;;  %v3341_v9 = vpop.permute.xlu1 %3340 }
0x18d9   :  { %4591 = vmatpush3.bf16.xpose.msra.mxu1 %v3085_v10  ;;  %4605 = vmatmul.mubr.msk.bf16.vlgmr.msra.gmra.mrb[44].mxu0 %vm373_vm1, %v3210_v32 }
0x18da   :  { %4615 = vmatpush3.bf16.xpose.msra.mxu0 %v3348_v52  ;;  %4592 = vmatprep.mubr.msk.bf16.mxu1 %vm5130_vm0, %v5128_v7 }
0x18db   :  { %4616 = vmatprep.mubr.msk.bf16.mxu0 %vm5130_vm0, %v5128_v7  ;;  %4596 = vmatprep.subr.bf16.mxu1 %v5128_v7 }
0x18dc   :  { %4626 = vmatprep.subr.bf16.mxu0 %v5128_v7 }
0x18e0   :  { %4593 = vmatmul.mubr.msk.bf16.vlgmr.msra.gmra.mrb[76].mxu1 %vm373_vm1, %v3077_v51 }
0x18e1   :  { %4617 = vmatmul.mubr.msk.bf16.vlgmr.msra.gmra.mrb[48].mxu0 %vm373_vm1, %v3341_v9  ;;  %4598 = vmatprep.mubr.msk.bf16.mxu1 %vm5130_vm0, %v5128_v7 }
0x18e2   :  { %4642 = vmatprep.mubr.msk.bf16.mxu0 %vm5130_vm0, %v5128_v7 }
0x19ab   :  { %v3066_v5 = vpop.f32.mrb[72].mxu1 }
0x19ac   :  { %3073 = vst.msk [vmem:[#allocation2] sm:$0xff] %vm373_vm1, %v3066_v5  ;;  %v4588_v11 = vpop.f32.mrb[73].mxu1  ;;  %v3253_v12 = vpop.f32.mrb[44].mxu0 }
0x19ad   :  { %v3069_v13 = vpop.f32.mrb[74].mxu1  ;;  %v4606_v14 = vpop.f32.mrb[45].mxu0  ;;  %v3254_v48 = vadd.f32 %v6105_v4, %v3253_v12 }
0x19ae   :  { %3074 = vst.msk [vmem:[#allocation2 + $0x8] sm:$0xff] %vm373_vm1, %v3069_v13  ;;  %v4589_v16 = vpop.f32.mrb[75].mxu1  ;;  %v3256_v56 = vpop.f32.mrb[46].mxu0 }
0x19af   :  { %v4607_v17 = vpop.f32.mrb[47].mxu0  ;;  %v3257_v0 = vadd.f32 %v6111_v60, %v3256_v56  ;;  %v3260_v19 = vsel %vm421_vm2, %v3254_v48, -inf }
0x19b1   :  { %v3263_v38 = vsel %vm421_vm2, %v3257_v0, -inf }
0x19b3   :  { %v3121_v21 = vpop.f32.mrb[76].mxu1 }
0x19b4   :  { %v3122_v27 = vadd.f32 %v6105_v4, %v3121_v21  ;;  %v4594_v22 = vpop.f32.mrb[77].mxu1  ;;  %v3384_v49 = vpop.f32.mrb[48].mxu0 }
0x19b5   :  { %v3124_v31 = vpop.f32.mrb[78].mxu1  ;;  %v4618_v62 = vpop.f32.mrb[49].mxu0  ;;  %v3385_v37 = vadd.f32 %v6105_v4, %v3384_v49 }
0x19b6   :  { %v3125_v3 = vadd.f32 %v6111_v60, %v3124_v31  ;;  %v4595_v8 = vpop.f32.mrb[79].mxu1  ;;  %v3387_v24 = vpop.f32.mrb[50].mxu0  ;;  %v3128_v35 = vsel %vm421_vm2, %v3122_v27, -inf }
0x19b7   :  { %v4619_v29 = vpop.f32.mrb[51].mxu0  ;;  %3129 = vmax.xlane.f32.xlu0 %v3128_v35  ;;  %v3388_v33 = vadd.f32 %v6111_v60, %v3387_v24  ;;  %v3391_v39 = vsel %vm421_vm2, %v3385_v37, -inf }
0x19b8   :  { %v3131_v47 = vsel %vm421_vm2, %v3125_v3, -inf }
0x19b9   :  { %3132 = vmax.xlane.f32.xlu1 %v3131_v47  ;;  %v3394_v36 = vsel %vm421_vm2, %v3388_v33, -inf }
0x19bb   :  { %3261 = vmax.xlane.f32.xlu0 %v3260_v19 }
0x19bd   :  { %3395 = vmax.xlane.f32.xlu1 %v3394_v36 }
0x19bf   :  { %3264 = vmax.xlane.f32.xlu0 %v3263_v38 }
0x19c3   :  { %3392 = vmax.xlane.f32.xlu0 %v3391_v39 }
0x1a44   :  { %v3130_v42 = vpop.xlane.xlu0 %3129 }
0x1a45   :  { %v3134_v53 = vsub.f32 %v3122_v27, %v3130_v42 }
0x1a46   :  { %v3133_v43 = vpop.xlane.xlu1 %3132 }
0x1a47   :  { %v3135_v55 = vsub.f32 %v3125_v3, %v3133_v43  ;;  %v3136_v59 = vmul.f32 1.442695, %v3134_v53 }
0x1a48   :  { %v3262_v44 = vpop.xlane.xlu0 %3261 }
0x1a49   :  { %v3266_v45 = vsub.f32 %v3254_v48, %v3262_v44  ;;  %v3138_v63 = vmul.f32 1.442695, %v3135_v55  ;;  %v4850_v44 = vld [vmem:[#allocation6] sm:$0xff]   ;;  %v4855_v55 = vld [vmem:[#allocation6 + $0x28] sm:$0xff]  }
0x1a4a   :  { %v3396_v28 = vpop.xlane.xlu1 %3395  ;;  %4627 = vmatpush3.bf16.msra.mxu0 %v4850_v44  ;;  %v4884_v44 = vld [vmem:[%s6353_s7 + $0x48] sm:$0xff]  }
0x1a4b   :  { %v3268_v60 = vmul.f32 1.442695, %v3266_v45  ;;  %v3398_v46 = vsub.f32 %v3388_v33, %v3396_v28  ;;  %4628 = vmatprep.subr.bf16.mxu0 %v5128_v7  ;;  %v4851_v45 = vld [vmem:[#allocation6 + $0x8] sm:$0xff]   ;;  %v4852_v28 = vld [vmem:[#allocation6 + $0x10] sm:$0xff]  }
0x1a4c   :  { %v3265_v50 = vpop.xlane.xlu0 %3264 }
0x1a4d   :  { %5006 = vpow2.f32 %v3268_v60  ;;  %v3267_v51 = vsub.f32 %v3257_v0, %v3265_v50  ;;  %v3401_v25 = vmul.f32 1.442695, %v3398_v46  ;;  %v4853_v60 = vld [vmem:[#allocation6 + $0x18] sm:$0xff]   ;;  %v4854_v46 = vld [vmem:[#allocation6 + $0x20] sm:$0xff]  }
0x1a4e   :  { %4629 = vmatpush3.bf16.msra.mxu0 %v4851_v45  ;;  %v4885_v45 = vld [vmem:[%s6353_s7 + $0x8] sm:$0xff]  }
0x1a4f   :  { %v3270_v4 = vmul.f32 1.442695, %v3267_v51  ;;  %4630 = vmatprep.subr.bf16.mxu0 %v5128_v7 }
0x1a50   :  { %v3393_v57 = vpop.xlane.xlu0 %3392 }
0x1a51   :  { %5008 = vpow2.f32 %v3270_v4  ;;  %v3397_v58 = vsub.f32 %v3385_v37, %v3393_v57 }
0x1a52   :  { %5010 = vpow2.f32 %v3401_v25  ;;  %4631 = vmatpush3.bf16.msra.mxu0 %v4852_v28  ;;  %v4856_v25 = vld [vmem:[#allocation6 + $0x30] sm:$0xff]  }
0x1a53   :  { %v3399_v6 = vmul.f32 1.442695, %v3397_v58  ;;  %4632 = vmatprep.subr.bf16.mxu0 %v5128_v7 }
0x1a55   :  { %5012 = vpow2.f32 %v3399_v6 }
0x1a56   :  { %5014 = vpow2.f32 %v3136_v59  ;;  %4633 = vmatpush3.bf16.msra.mxu0 %v4853_v60  ;;  %v4857_v59 = vld [vmem:[#allocation6 + $0x38] sm:$0xff]  }
0x1a57   :  { %v5007_v2 = vpop.eup %5006  ;;  %5016 = vpow2.f32 %v3138_v63  ;;  %4634 = vmatprep.subr.bf16.mxu0 %v5128_v7 }
0x1a58   :  { %v3272_v10 = vsel %vm421_vm2, %v5007_v2, 0.0 }
0x1a59   :  { %3273 = vadd.xlane.f32.xlu0 %v3272_v10 }
0x1a5a   :  { %4635 = vmatpush3.bf16.msra.mxu0 %v4854_v46 }
0x1a5b   :  { %v5009_v32 = vpop.eup %5008  ;;  %4636 = vmatprep.subr.bf16.mxu0 %v5128_v7 }
0x1a5c   :  { %v3275_v52 = vsel %vm421_vm2, %v5009_v32, 0.0  ;;  %v5011_v9 = vpop.eup %5010 }
0x1a5d   :  { %3276 = vadd.xlane.f32.xlu1 %v3275_v52  ;;  %v3406_v13 = vsel %vm421_vm2, %v5011_v9, 0.0 }
0x1a5e   :  { %4637 = vmatpush3.bf16.msra.mxu0 %v4855_v55 }
0x1a5f   :  { %v5013_v5 = vpop.eup %5012  ;;  %4638 = vmatprep.subr.bf16.mxu0 %v5128_v7 }
0x1a60   :  { %v5015_v11 = vpop.eup %5014  ;;  %v3403_v12 = vsel %vm421_vm2, %v5013_v5, 0.0 }
0x1a61   :  { %v5017_v14 = vpop.eup %5016  ;;  %3404 = vadd.xlane.f32.xlu0 %v3403_v12  ;;  %3407 = vadd.xlane.f32.xlu1 %v3406_v13  ;;  %v3140_v16 = vsel %vm421_vm2, %v5015_v11, 0.0 }
0x1a62   :  { %v3143_v56 = vsel %vm421_vm2, %v5017_v14, 0.0  ;;  %4639 = vmatpush3.bf16.msra.mxu0 %v4856_v25 }
0x1a63   :  { %4640 = vmatprep.subr.bf16.mxu0 %v5128_v7 }
0x1a65   :  { %3141 = vadd.xlane.f32.xlu0 %v3140_v16  ;;  %3144 = vadd.xlane.f32.xlu1 %v3143_v56 }
0x1a66   :  { %4641 = vmatpush3.bf16.msra.mxu0 %v4857_v59 }
0x1a76   :  { %3283 = vrot.lane.b32.xlu1 %v6093_v61, %s5126_s2 }
0x1a7a   :  { %3414 = vrot.lane.b32.xlu1 %v6093_v61, %s5132_s23 }
0x1a7b   :  { %3152 = vrot.lane.b32.xlu0 %v6093_v61, %s5131_s22 }
0x1ae6   :  { %v3274_v17 = vpop.xlane.xlu0 %3273 }
0x1aea   :  { %v3277_v21 = vpop.xlane.xlu1 %3276 }
0x1aee   :  { %v3405_v27 = vpop.xlane.xlu0 %3404  ;;  %v3408_v22 = vpop.xlane.xlu1 %3407 }
0x1af2   :  { %v3142_v49 = vpop.xlane.xlu0 %3141  ;;  %v3145_v31 = vpop.xlane.xlu1 %3144 }
0x1af3   :  { %5018 = vrcp.f32 %v3142_v49 }
0x1af4   :  { %5020 = vrcp.f32 %v3145_v31 }
0x1af5   :  { %5022 = vrcp.f32 %v3277_v21 }
0x1af6   :  { %v3153_v62 = vpop.permute.xlu0 %3152  ;;  %5024 = vrcp.f32 %v3274_v17  ;;  %v3284_v29 = vpop.permute.xlu1 %3283 }
0x1af7   :  { %4597 = vmatpush3.bf16.msra.mxu1 %v3153_v62  ;;  %5026 = vrcp.f32 %v3405_v27 }
0x1af8   :  { %4608 = vmatprep.subr.bf16.mxu1 %v5128_v7  ;;  %5028 = vrcp.f32 %v3408_v22 }
0x1afa   :  { %v3415_v38 = vpop.permute.xlu1 %3414 }
0x1afd   :  { %v5019_v48 = vpop.eup %5018 }
0x1afe   :  { %v5021_v3 = vpop.eup %5020  ;;  %v3148_v8 = vmul.f32 %v5019_v48, %v5015_v11 }
0x1aff   :  { %v3149_v24 = vmul.f32 %v5021_v3, %v5017_v14  ;;  %v5023_v35 = vpop.eup %5022 }
0x1b00   :  { %v5025_v33 = vpop.eup %5024  ;;  %v3281_v47 = vmul.f32 %v5023_v35, %v5009_v32  ;;  %v4869_v35 = vld [vmem:[%s6352_s6 + $0x34] ss:$8 sps:$4 sm:$0xff]  }
0x1b01   :  { %v3150_v61 = vpack.c.bf16 %v3149_v24, %v3148_v8  ;;  %v3280_v0 = vmul.f32 %v5025_v33, %v5007_v2  ;;  %v5027_v19 = vpop.eup %5026  ;;  %v4861_v8 = vld [vmem:[%s6352_s6 + $0x10] ss:$8 sps:$4 sm:$0xff]   ;;  %v4866_v24 = vld [vmem:[%s6352_s6 + $0x24] ss:$8 sps:$4 sm:$0xff]  }
0x1b02   :  { %v5029_v37 = vpop.eup %5028  ;;  %v3411_v39 = vmul.f32 %v5027_v19, %v5013_v5  ;;  %v4872_v33 = vld [vmem:[%s6352_s6 + $0x44] ss:$8 sps:$4 sm:$0xff]   ;;  %v4873_v19 = vld [vmem:[%s6352_s6 + $0x50] ss:$8 sps:$4 sm:$0xff]  }
0x1b03   :  { %4599 = vmatmul.mubr.msk.bf16.vlgmr.msra.gmra.mrb[80].mxu1 %vm421_vm2, %v3150_v61  ;;  %v3282_v36 = vpack.c.bf16 %v3281_v47, %v3280_v0  ;;  %v3412_v42 = vmul.f32 %v5029_v37, %v5011_v9  ;;  %v4864_v61 = vld [vmem:[%s6352_s6 + $0x20] ss:$8 sps:$4 sm:$0xff]   ;;  %v4875_v0 = vld [vmem:[%s6352_s6 + $0x54] ss:$8 sps:$4 sm:$0xff]  }
0x1b04   :  { %4609 = vmatpush3.bf16.msra.mxu1 %v3284_v29  ;;  %4610 = vmatprep.mubr.msk.bf16.mxu1 %vm5130_vm0, %v5128_v7  ;;  %v4867_v29 = vld [vmem:[%s6352_s6 + $0x30] ss:$8 sps:$4 sm:$0xff]   ;;  %v4870_v47 = vld [vmem:[%s6352_s6 + $0x40] ss:$8 sps:$4 sm:$0xff]  }
0x1b05   :  { %4620 = vmatprep.subr.bf16.mxu1 %v5128_v7  ;;  %v3413_v43 = vpack.c.bf16 %v3412_v42, %v3411_v39  ;;  %v4876_v37 = vld [vmem:[%s6352_s6 + $0x60] ss:$8 sps:$4 sm:$0xff]   ;;  %v4879_v39 = vld [vmem:[%s6352_s6 + $0x70] ss:$8 sps:$4 sm:$0xff]  }
0x1b06   :  { %v4882_v42 = vld [vmem:[%s6353_s7 + $0x40] sm:$0xff]  }
0x1b07   :  { %4360 = vmatprep.subr.bf16.mxu0 %v4882_v42 }
0x1b0b   :  { %4611 = vmatmul.mubr.msk.bf16.vlgmr.msra.gmra.mrb[84].mxu1 %vm421_vm2, %v3282_v36  ;;  %v4878_v36 = vld [vmem:[%s6352_s6 + $0x64] ss:$8 sps:$4 sm:$0xff]  }
0x1b0c   :  { %4621 = vmatpush3.bf16.msra.mxu1 %v3415_v38  ;;  %4622 = vmatprep.mubr.msk.bf16.mxu1 %vm5130_vm0, %v5128_v7  ;;  %v4881_v38 = vld [vmem:[%s6352_s6 + $0x74] ss:$8 sps:$4 sm:$0xff]  }
0x1b13   :  { %4623 = vmatmul.mubr.msk.bf16.vlgmr.msra.gmra.mrb[88].mxu1 %vm421_vm2, %v3413_v43  ;;  %v4883_v43 = vld [vmem:[%s6353_s7] sm:$0xff]  }
0x1b14   :  { %3742 = vmatprep.mubr.bf16.mxu1 %v5129_v26 }
0x1bd6   :  { %v3192_v50 = vpop.f32.mrb[80].mxu1 }
0x1bd7   :  { %3201 = vrot.lane.b32.xlu1 %v3192_v50, %s5132_s23  ;;  %v4600_v26 = vpop.f32.mrb[81].mxu1 }
0x1bd8   :  { %v3195_v51 = vpop.f32.mrb[82].mxu1 }
0x1bd9   :  { %3203 = vrot.lane.b32.xlu0 %v3195_v51, %s5132_s23  ;;  %v4601_v53 = vpop.f32.mrb[83].mxu1 }
0x1bde   :  { %v3323_v4 = vpop.f32.mrb[84].mxu1 }
0x1bdf   :  { %3332 = vrot.lane.b32.xlu1 %v3323_v4, %s5126_s2  ;;  %v4612_v57 = vpop.f32.mrb[85].mxu1 }
0x1be0   :  { %v3326_v58 = vpop.f32.mrb[86].mxu1 }
0x1be1   :  { %3334 = vrot.lane.b32.xlu0 %v3326_v58, %s5126_s2  ;;  %v4613_v63 = vpop.f32.mrb[87].mxu1 }
0x1be6   :  { %v3454_v6 = vpop.f32.mrb[88].mxu1 }
0x1be7   :  { %3463 = vrot.lane.b32.xlu1 %v3454_v6, %s5131_s22  ;;  %v4624_v2 = vpop.f32.mrb[89].mxu1 }
0x1be8   :  { %v3457_v10 = vpop.f32.mrb[90].mxu1 }
0x1be9   :  { %3465 = vrot.lane.b32.xlu0 %v3457_v10, %s5131_s22  ;;  %v4625_v32 = vpop.f32.mrb[91].mxu1 }
0x1c49   :  { %v3202_v52 = vpop.permute.xlu1 %3201 }
0x1c4a   :  { %3207 = vst.msk [vmem:[#allocation2] sm:$0xff] %vm623_vm3, %v3202_v52 }
0x1c4b   :  { %v3204_v9 = vpop.permute.xlu0 %3203 }
0x1c4c   :  { %3208 = vst.msk [vmem:[#allocation2 + $0x8] sm:$0xff] %vm623_vm3, %v3204_v9 }
0x1c51   :  { %v3333_v5 = vpop.permute.xlu1 %3332 }
0x1c52   :  { %3338 = vst.msk [vmem:[#allocation2] sm:$0xff] %vm755_vm4, %v3333_v5 }
0x1c53   :  { %v3335_v11 = vpop.permute.xlu0 %3334 }
0x1c54   :  { %3339 = vst.msk [vmem:[#allocation2 + $0x8] sm:$0xff] %vm755_vm4, %v3335_v11 }
0x1c59   :  { %v3464_v7 = vpop.permute.xlu1 %3463 }
0x1c5a   :  { %3469 = vst.msk [vmem:[#allocation2] sm:$0xff] %vm887_vm5, %v3464_v7 }
0x1c5b   :  { %v3466_v12 = vpop.permute.xlu0 %3465 }
0x1c5c   :  { %3470 = vst.msk [vmem:[#allocation2 + $0x8] sm:$0xff] %vm887_vm5, %v3466_v12 }
0x1c61   :  { %v3471_v13 = vld [vmem:[#allocation2] sm:$0xff] }
0x1c63   :  { %v3472_v14 = vld [vmem:[#allocation2 + $0x8] sm:$0xff] }
0x1c64   :  { %v3473_v16 = vpack.c.bf16 %v3472_v14, %v3471_v13 }
0x1c66   :  { %4643 = vmatmul.mubr.bf16.vlgmr.msra.gmra.mrb[52].mxu0 %v3473_v16 }
0x1c67   :  { %4361 = vmatpush3.bf16.msra.mxu0 %v4883_v43 }
0x1c68   :  { %4362 = vmatprep.subr.bf16.mxu0 %v4884_v44 }
0x1c6b   :  { %4363 = vmatpush3.bf16.msra.mxu0 %v4885_v45 }
0x1d39   :  { %v3572_v56 = vpop.f32.mrb[52].mxu0 }
0x1d3a   :  { %v3573_v17 = vadd.f32 %v3572_v56, %v5461_v18  ;;  %v4644_v21 = vpop.f32.mrb[53].mxu0  ;;  %v4886_v56 = vld [vmem:[%s6353_s7 + $0x50] sm:$0xff]  }
0x1d3b   :  { %v3575_v27 = vpop.f32.mrb[54].mxu0  ;;  %4364 = vmatprep.subr.bf16.mxu0 %v4886_v56  ;;  %v4890_v21 = vld [vmem:[%s6353_s7 + $0x60] sm:$0xff]  }
0x1d3c   :  { %v6199_v22 = vadd.f32 %v3573_v17, %v6076_v54  ;;  %v3576_v49 = vadd.f32 %v3575_v27, %v5461_v18  ;;  %v4645_v31 = vpop.f32.mrb[55].mxu0  ;;  %v4858_v18 = vld [vmem:[%s6352_s6] ss:$8 sps:$4 sm:$0xff]   ;;  %v4860_v54 = vld [vmem:[%s6352_s6 + $0x4] ss:$8 sps:$4 sm:$0xff]   ;;  %v4887_v17 = vld [vmem:[%s6353_s7 + $0x10] sm:$0xff]  }
0x1d3d   :  { %3710 = vmatprep.subr.bf16.mxu1 %v4860_v54  ;;  %4365 = vmatpush3.bf16.msra.mxu0 %v4887_v17  ;;  %v4891_v27 = vld [vmem:[%s6353_s7 + $0x20] sm:$0xff]   ;;  %v4894_v31 = vld [vmem:[%s6353_s7 + $0x70] sm:$0xff]  }
0x1d3e   :  { %v6203_v62 = vadd.f32 %v3576_v49, %v6079_v1  ;;  %3581 = vadd.xlane.f32.xlu1 %v6199_v22  ;;  %v3587_v48 = vmul.f32 %v6199_v22, %v6199_v22  ;;  %3711 = vmatpush1.bf16.msra.mxu1 %v4858_v18  ;;  %v4863_v1 = vld [vmem:[%s6352_s6 + $0x14] ss:$8 sps:$4 sm:$0xff]   ;;  %v4893_v49 = vld [vmem:[%s6353_s7 + $0x28] sm:$0xff]  }
0x1d3f   :  { %3712 = vmatprep.subr.bf16.mxu1 %v4863_v1 }
0x1d40   :  { %3583 = vadd.xlane.f32.xlu0 %v6203_v62  ;;  %v3588_v3 = vmul.f32 %v6203_v62, %v6203_v62 }
0x1d42   :  { %3713 = vmatpush1.bf16.msra.mxu1 %v4861_v8 }
0x1d43   :  { %3714 = vmatprep.subr.bf16.mxu1 %v4866_v24 }
0x1d44   :  { %3589 = vadd.xlane.f32.xlu0 %v3587_v48  ;;  %v4896_v48 = vld [vmem:[%s6353_s7 + $0x78] sm:$0xff]  }
0x1d46   :  { %3715 = vmatpush1.bf16.msra.mxu1 %v4864_v61 }
0x1d47   :  { %3716 = vmatprep.subr.bf16.mxu1 %v4869_v35 }
0x1d48   :  { %3591 = vadd.xlane.f32.xlu0 %v3588_v3  ;;  %v4897_v3 = vld [vmem:[%s6353_s7 + $0x38] sm:$0xff]  }
0x1d4a   :  { %3717 = vmatpush1.bf16.msra.mxu1 %v4867_v29 }
0x1d4b   :  { %3718 = vmatprep.subr.bf16.mxu1 %v4872_v33 }
0x1d4e   :  { %3719 = vmatpush1.bf16.msra.mxu1 %v4870_v47 }
0x1d4f   :  { %3720 = vmatprep.subr.bf16.mxu1 %v4875_v0 }
0x1d52   :  { %3721 = vmatpush1.bf16.msra.mxu1 %v4873_v19 }
0x1d53   :  { %3722 = vmatprep.subr.bf16.mxu1 %v4878_v36 }
0x1d56   :  { %3723 = vmatpush1.bf16.msra.mxu1 %v4876_v37 }
0x1d57   :  { %3724 = vmatprep.subr.bf16.mxu1 %v4881_v38 }
0x1d5a   :  { %3725 = vmatpush1.bf16.msra.mxu1 %v4879_v39 }
0x1dcb   :  { %v3582_v28 = vpop.xlane.xlu1 %3581 }
0x1dcc   :  { %v3585_v46 = vmul.f32 0.0078125, %v3582_v28 }
0x1dcd   :  { %v3584_v60 = vpop.xlane.xlu0 %3583 }
0x1dce   :  { %v3595_v26 = vmul.f32 %v3585_v46, %v3585_v46  ;;  %v3586_v51 = vmul.f32 0.0078125, %v3584_v60  ;;  %v3601_v10 = vsub.f32 %v6199_v22, %v3585_v46  ;;  %v4892_v22 = vld [vmem:[%s6353_s7 + $0x68] sm:$0xff]  }
0x1dd0   :  { %v3596_v4 = vmul.f32 %v3586_v51, %v3586_v51  ;;  %v3602_v9 = vsub.f32 %v6203_v62, %v3586_v51  ;;  %v4895_v62 = vld [vmem:[%s6353_s7 + $0x30] sm:$0xff]  }
0x1dd1   :  { %v3590_v50 = vpop.xlane.xlu0 %3589 }
0x1dd2   :  { %v3593_v53 = vmul.f32 0.0078125, %v3590_v50 }
0x1dd4   :  { %v3597_v55 = vsub.f32 %v3593_v53, %v3595_v26 }
0x1dd5   :  { %v3592_v25 = vpop.xlane.xlu0 %3591 }
0x1dd6   :  { %v3599_v57 = vmax.f32 %v3597_v55, 0.0  ;;  %v3594_v58 = vmul.f32 0.0078125, %v3592_v25 }
0x1dd8   :  { %v3603_v59 = vadd.f32 1e-12, %v3599_v57  ;;  %v3598_v63 = vsub.f32 %v3594_v58, %v3596_v4 }
0x1dda   :  { %5030 = vrsqrt.f32 %v3603_v59  ;;  %v3600_v6 = vmax.f32 %v3598_v63, 0.0 }
0x1ddc   :  { %v3604_v2 = vadd.f32 1e-12, %v3600_v6 }
0x1dde   :  { %5032 = vrsqrt.f32 %v3604_v2 }
0x1de4   :  { %v5031_v32 = vpop.eup %5030 }
0x1de5   :  { %v3607_v52 = vmul.f32 %v5031_v32, %v3601_v10 }
0x1de7   :  { %v3609_v7 = vmul.f32 %v3607_v52, %v5540_v15 }
0x1de8   :  { %v5033_v5 = vpop.eup %5032 }
0x1de9   :  { %v3608_v11 = vmul.f32 %v5033_v5, %v3602_v9  ;;  %v6276_v13 = vadd.f32 %v3609_v7, %v5546_v23 }
0x1deb   :  { %v3610_v12 = vmul.f32 %v3608_v11, %v5540_v15  ;;  %v4888_v15 = vld [vmem:[%s6353_s7 + $0x58] sm:$0xff]  }
0x1dec   :  { %4366 = vmatprep.subr.bf16.mxu0 %v4888_v15 }
0x1ded   :  { %v6279_v14 = vadd.f32 %v3610_v12, %v5546_v23  ;;  %v4889_v23 = vld [vmem:[%s6353_s7 + $0x18] sm:$0xff]   ;;  %s5133_s7 = smov [#allocation8]  }
0x1dee   :  { %4367 = vmatpush3.bf16.msra.mxu0 %v4889_v23  ;;  %s3985_s13 = sshll.u32 %s5133_s7, 4  ;;  %s3986_s13 = int_to_ptr.vmem [resolvable:$true] %s3985_s13 }
0x1def   :  { %v3613_v16 = vpack.c.bf16 %v6279_v14, %v6276_v13  ;;  %4368 = vmatprep.subr.bf16.mxu0 %v4890_v21  ;;  %s5094_s5 = scalar_lea.vmem %s3986_s13, 256  ;;  %p5099_p3 = scmp.lt.s32.totalorder %s3986_s13, %s3986_s13 }
0x1df0   :  { %p5095_p2 = scmp.ne.s32.totalorder %s3986_s13, %s5094_s5  ;;  %p5100_p4 = scmp.lt.s32.totalorder %s5094_s5, %s5094_s5 }
0x1df1   :  { %3743 = vmatmul.mubr.bf16.vlgmr.msra.gmra.mrb[92].mxu1 %v3613_v16 }
0x1df2   :  { %4369 = vmatpush3.bf16.msra.mxu0 %v4891_v27  ;;  %p5101_p5 = por %p5100_p4, %p5099_p3 }
0x1df3   :  { %4370 = vmatprep.subr.bf16.mxu0 %v4892_v22 }
0x1df4   :  { %p5102_p6 = pnand %p5101_p5, %p5095_p2 }
0x1df6   :  { %4371 = vmatpush3.bf16.msra.mxu0 %v4893_v49 }
0x1df7   :  { %4372 = vmatprep.subr.bf16.mxu0 %v4894_v31 }
0x1dfa   :  { %4373 = vmatpush3.bf16.msra.mxu0 %v4895_v62 }
0x1dfb   :  { %4374 = vmatprep.subr.bf16.mxu0 %v4896_v48 }
0x1dfe   :  { %4375 = vmatpush3.bf16.msra.mxu0 %v4897_v3 }
0x1ec4   :  { %v3744_v18 = vpop.f32.mrb[92].mxu1 }
0x1ec5   :  { %v3745_v54 = vadd.f32 %v3744_v18, %v5599_v40  ;;  %v3746_v1 = vpop.f32.mrb[93].mxu1 }
0x1ec6   :  { %v3747_v8 = vadd.f32 %v3746_v1, %v5602_v41  ;;  %v3748_v24 = vpop.f32.mrb[94].mxu1 }
0x1ec7   :  { %v3757_v61 = vmul.f32 0.70710677, %v3745_v54  ;;  %v3749_v35 = vadd.f32 %v3748_v24, %v5599_v40  ;;  %v3750_v29 = vpop.f32.mrb[95].mxu1  ;;  %v3753_v44 = vmul.f32 0.5, %v3745_v54 }
0x1ec8   :  { %v3758_v33 = vmul.f32 0.70710677, %v3747_v8  ;;  %v3751_v47 = vadd.f32 %v3750_v29, %v5602_v41  ;;  %v3754_v40 = vmul.f32 0.5, %v3747_v8 }
0x1ec9   :  { %5034 = verf.f32 %v3757_v61  ;;  %v3759_v0 = vmul.f32 0.70710677, %v3749_v35  ;;  %v3755_v45 = vmul.f32 0.5, %v3749_v35 }
0x1eca   :  { %5036 = verf.f32 %v3758_v33  ;;  %v3760_v19 = vmul.f32 0.70710677, %v3751_v47  ;;  %v3756_v60 = vmul.f32 0.5, %v3751_v47 }
0x1ecb   :  { %5038 = verf.f32 %v3759_v0 }
0x1ecc   :  { %5040 = verf.f32 %v3760_v19 }
0x1ed3   :  { %v5035_v36 = vpop.eup %5034 }
0x1ed4   :  { %v5037_v37 = vpop.eup %5036  ;;  %v3765_v38 = vadd.f32 1.0, %v5035_v36 }
0x1ed5   :  { %v5039_v39 = vpop.eup %5038  ;;  %v3766_v42 = vadd.f32 1.0, %v5037_v37 }
0x1ed6   :  { %v5041_v43 = vpop.eup %5040  ;;  %v3767_v28 = vadd.f32 1.0, %v5039_v39  ;;  %v3769_v50 = vmul.f32 %v3765_v38, %v3753_v44 }
0x1ed7   :  { %v3768_v46 = vadd.f32 1.0, %v5041_v43  ;;  %v3770_v26 = vmul.f32 %v3766_v42, %v3754_v40 }
0x1ed8   :  { %v3771_v41 = vmul.f32 %v3767_v28, %v3755_v45 }
0x1ed9   :  { %v3772_v51 = vmul.f32 %v3768_v46, %v3756_v60 }
0x1eda   :  { %v3773_v53 = vpack.c.bf16 %v3771_v41, %v3769_v50 }
0x1edb   :  { %v3774_v55 = vpack.c.bf16 %v3772_v51, %v3770_v26 }
0x1edd   :  { %3935 = vmatprep.mubr.bf16.mxu0 %v3774_v55 }
0x1ede   :  { %3936 = vmatmul.mubr.bf16.vlgmr.msra.gmra.mrb[56].mxu0 %v3773_v53 }
0x1fb1   :  { %v4376_v25 = vpop.f32.mrb[56].mxu0 }
0x1fb2   :  { %v4377_v4 = vpop.f32.mrb[57].mxu0 }
0x1fb3   :  { %v4378_v57 = vadd.f32 %v4377_v4, %v4376_v25  ;;  %v4379_v58 = vpop.f32.mrb[58].mxu0 }
0x1fb4   :  { %v4380_v59 = vpop.f32.mrb[59].mxu0 }
0x1fb5   :  { %v3938_v63 = vadd.f32 %v4378_v57, %v5614_v20  ;;  %v4381_v6 = vadd.f32 %v4380_v59, %v4379_v58 }
0x1fb7   :  { %v3941_v2 = vadd.f32 %v4381_v6, %v5614_v20  ;;  %v3944_v10 = vadd.f32 %v3938_v63, %v6276_v13 }
0x1fb9   :  { %3946 = vadd.xlane.f32.xlu1 %v3944_v10  ;;  %v3945_v32 = vadd.f32 %v3941_v2, %v6279_v14  ;;  %v3952_v52 = vmul.f32 %v3944_v10, %v3944_v10 }
0x1fbb   :  { %3948 = vadd.xlane.f32.xlu0 %v3945_v32  ;;  %v3953_v9 = vmul.f32 %v3945_v32, %v3945_v32 }
0x1fbd   :  { %3954 = vadd.xlane.f32.xlu1 %v3952_v52 }
0x1fbf   :  { %3956 = vadd.xlane.f32.xlu0 %v3953_v9 }
0x2046   :  { %v3947_v5 = vpop.xlane.xlu1 %3946 }
0x2047   :  { %v3950_v11 = vmul.f32 0.0078125, %v3947_v5 }
0x2048   :  { %v3949_v7 = vpop.xlane.xlu0 %3948 }
0x2049   :  { %v3951_v12 = vmul.f32 0.0078125, %v3949_v7  ;;  %v3960_v56 = vmul.f32 %v3950_v11, %v3950_v11  ;;  %v3966_v31 = vsub.f32 %v3944_v10, %v3950_v11 }
0x204a   :  { %v3955_v16 = vpop.xlane.xlu1 %3954 }
0x204b   :  { %v3958_v17 = vmul.f32 0.0078125, %v3955_v16  ;;  %v3961_v23 = vmul.f32 %v3951_v12, %v3951_v12  ;;  %v3967_v48 = vsub.f32 %v3945_v32, %v3951_v12 }
0x204c   :  { %v3957_v15 = vpop.xlane.xlu0 %3956 }
0x204d   :  { %v3962_v20 = vsub.f32 %v3958_v17, %v3960_v56  ;;  %v3959_v21 = vmul.f32 0.0078125, %v3957_v15 }
0x204f   :  { %v3964_v13 = vmax.f32 %v3962_v20, 0.0  ;;  %v3963_v27 = vsub.f32 %v3959_v21, %v3961_v23 }
0x2051   :  { %v3968_v22 = vadd.f32 1e-12, %v3964_v13  ;;  %v3965_v14 = vmax.f32 %v3963_v27, 0.0 }
0x2053   :  { %5042 = vrsqrt.f32 %v3968_v22  ;;  %v3969_v49 = vadd.f32 1e-12, %v3965_v14 }
0x2055   :  { %5044 = vrsqrt.f32 %v3969_v49 }
0x205d   :  { %v5043_v62 = vpop.eup %5042 }
0x205e   :  { %v3972_v3 = vmul.f32 %v5043_v62, %v3966_v31 }
0x205f   :  { %v5045_v18 = vpop.eup %5044 }
0x2060   :  { %v3973_v54 = vmul.f32 %v5045_v18, %v3967_v48  ;;  %v3974_v1 = vmul.f32 %v3972_v3, %v5713_v30 }
0x2062   :  { %v3975_v8 = vmul.f32 %v3973_v54, %v5713_v30  ;;  %v3976_v24 = vadd.f32 %v3974_v1, %v5720_v34 }
0x2064   :  { %v3977_v61 = vadd.f32 %v3975_v8, %v5720_v34  ;;  %3978 = vst [vmem:[#allocation8] sm:$0xff] %v3976_v24 }
0x2066   :  { %3979 = vst [vmem:[#allocation8 + $0x8] sm:$0xff] %v3977_v61 }
0x2067   :  { %5105 = shalt.err (!%p5102_p6)
}
0x2068   :  { %s5106_s17 = scalar_lea.hbm %s6354_s8, 256 }
0x2069   :  { %p5107_p7 = scmp.ne.s32.totalorder %s6354_s8, %s5106_s17  ;;  %p5110_p8 = scmp.lt.u32.totalorder %s5106_s17, %s6354_s8 }
0x206b   :  { %p5112_p9 = pnand %p5110_p8, %p5107_p7 }
0x206d   :  { %5115 = shalt.err (!%p5112_p9)
}
0x206e   :  { %3991 = dma.vmem_to_hbm [thread:$0]  %s3986_s13, 256, %s6354_s8, [#allocation5], %s5123_s15, %s5123_s15, %s5124_s16  }
0x206f   :  { %5120 = dma.done.wait [#allocation5], 256  }
0x2070   :  { %5121 = vsyncadd [#allocation5], 4294967040 }
0x2071   :  { %3995 = vsyncpa [#allocation4], 1 }
0x2072   :  { %3996 = vsyncpa [#allocation7], 1 }
0x2073   :  { %3997 = vsyncpa [#allocation5], 1 }

</bundles_post_ra>
